<compile_context>
chip_gen: v7x
topology: tpu7x:2x2x1
jax: 0.10.0
libtpu: 0.0.40
codegen_flags: <defaults>
</compile_context>

<pallas_src>
import functools

import jax
import jax.numpy as jnp
from jax import lax
from jax.experimental import pallas as pl
from jax.experimental.pallas import tpu as pltpu

EPS = 1e-5


# ----------------------------------------------------------------------------
# Stage A kernel: conv1-3 on a point tile, running point-max into g_ref.
# ----------------------------------------------------------------------------
def _conv_max_kernel(x_ref,
                     w1_ref, b1_ref,
                     w2_ref, b2_ref,
                     w3_ref,
                     g_ref, tmax_ref, *, n_valid_last):
    t = pl.program_id(1)
    last = pl.num_programs(1) - 1

    # x tile arrives in PyTorch (K, NT) bf16 layout; transpose on-chip (XLU).
    xt = jnp.transpose(x_ref[0])                                  # (NT, K)

    # conv1 + folded bn1 (scale already in w1) + relu
    h = jnp.dot(xt, w1_ref[...], preferred_element_type=jnp.float32)
    h = jnp.maximum(h + b1_ref[...], 0.0)                         # (NT, 64)
    # conv2 + folded bn2 + relu
    h = jnp.dot(h.astype(jnp.bfloat16), w2_ref[...],
                preferred_element_type=jnp.float32)
    h = jnp.maximum(h + b2_ref[...], 0.0)                         # (NT, 128)
    # conv3 with bn3 scale folded into w3; bias add + ReLU are deferred past
    # the point max (applied once on the pooled vector in Stage B).
    h = jnp.dot(h.astype(jnp.bfloat16), w3_ref[...],
                preferred_element_type=jnp.float32)               # (NT, 1024)

    # Per-tile max over points (sublane reduction -> lane-dense (1, 1024)).
    tmax_ref[...] = jnp.max(h, axis=0, keepdims=True)

    if n_valid_last is not None:
        # Zero-padded points exist only in the LAST tile.  Must mask with -inf
        # (no ReLU before the max any more, so a 0-fill could win the max).
        @pl.when(t == last)
        def _():
            row = lax.broadcasted_iota(jnp.int32, h.shape, 0)
            tmax_ref[...] = jnp.max(
                jnp.where(row < n_valid_last, h, -jnp.inf),
                axis=0, keepdims=True)

    # torch.max(x, 2)[0] as a running max in the resident output block.
    @pl.when(t == 0)
    def _():
        g_ref[0] = tmax_ref[...].astype(g_ref.dtype)

    @pl.when(t > 0)
    def _():
        g_ref[0] = jnp.maximum(g_ref[0].astype(jnp.float32),
                               tmax_ref[...]).astype(g_ref.dtype)


# ----------------------------------------------------------------------------
# Stage B kernel: batched FC head (M = B), runs once for the whole batch.
# ----------------------------------------------------------------------------
def _fc_kernel(g_ref, b3_ref,
               wf1_ref, b4_ref,
               wf2_ref, b5_ref,
               wf3_ref, bf3_ref,
               out_ref):
    # Deferred conv3/bn3 bias + ReLU, applied once on the pooled vector.
    g = jnp.maximum(g_ref[...].astype(jnp.float32) + b3_ref[...], 0.0)
    f = jnp.dot(g.astype(jnp.bfloat16), wf1_ref[...],
                preferred_element_type=jnp.float32)
    f = jnp.maximum(f + b4_ref[...], 0.0)                         # (B, 512)
    f = jnp.dot(f.astype(jnp.bfloat16), wf2_ref[...],
                preferred_element_type=jnp.float32)
    f = jnp.maximum(f + b5_ref[...], 0.0)                         # (B, 256)
    o = jnp.dot(f.astype(jnp.bfloat16), wf3_ref[...],
                preferred_element_type=jnp.float32)
    out_ref[...] = o + bf3_ref[...]    # bf3 already contains the k*k identity


# ----------------------------------------------------------------------------
# Parameter init (deterministic, matches the shapes declared in STNkd.__init__)
# ----------------------------------------------------------------------------
def init_params(key, k):
    keys = iter(jax.random.split(key, 32))

    def lin(cin, cout):
        w = 0.05 * jax.random.normal(next(keys), (cin, cout), jnp.float32)
        b = 0.05 * jax.random.normal(next(keys), (cout,), jnp.float32)
        return w, b

    def bn(c):
        gamma = 1.0 + 0.1 * jax.random.normal(next(keys), (c,), jnp.float32)
        beta = 0.1 * jax.random.normal(next(keys), (c,), jnp.float32)
        mean = 0.1 * jax.random.normal(next(keys), (c,), jnp.float32)
        var = 1.0 + 0.1 * jnp.abs(jax.random.normal(next(keys), (c,), jnp.float32))
        return gamma, beta, mean, var

    p = {}
    p["conv1"], p["bn1"] = lin(k, 64), bn(64)
    p["conv2"], p["bn2"] = lin(64, 128), bn(128)
    p["conv3"], p["bn3"] = lin(128, 1024), bn(1024)
    p["fc1"], p["bn4"] = lin(1024, 512), bn(512)
    p["fc2"], p["bn5"] = lin(512, 256), bn(256)
    p["fc3"] = lin(256, k * k)
    return p


def _fold_into_weight(lin_params, bn_params):
    """Fold eval-mode BN into (W * scale_per_column, bias).  f32, pre-bf16."""
    w, b = lin_params
    gamma, beta, mean, var = bn_params
    scale = gamma / jnp.sqrt(var + EPS)
    w_f = w * scale[None, :]
    bias = (b - mean) * scale + beta
    return w_f, bias[None, :]


# ----------------------------------------------------------------------------
# Wrapper: BN folding, bf16 weight/input cast, identity-into-bias fold.
# ----------------------------------------------------------------------------
def stnkd_forward(x_bkn, p, k, *, point_tile=1024):
    B, K, N = x_bkn.shape
    assert K == k

    # ---- parameter prep (all folds in f32, then bf16 cast for MXU) --------
    w1, b1 = _fold_into_weight(p["conv1"], p["bn1"])
    w2, b2 = _fold_into_weight(p["conv2"], p["bn2"])
    w3, b3 = _fold_into_weight(p["conv3"], p["bn3"])
    if B == 1:  # reproduce PyTorch's batchsize==1 branch: no bn4/bn5
        wf1, bf1 = p["fc1"]
        b4 = bf1[None, :]
        wf2, bf2 = p["fc2"]
        b5 = bf2[None, :]
    else:
        wf1, b4 = _fold_into_weight(p["fc1"], p["bn4"])
        wf2, b5 = _fold_into_weight(p["fc2"], p["bn5"])
    wf3, bfc3 = p["fc3"]
    # Fold the flattened k*k identity into fc3's bias (no in-kernel iota/where).
    bf3 = (bfc3 + jnp.eye(k, dtype=jnp.float32).reshape(k * k))[None, :]

    # bf16 matmul operands (f32 MXU accumulation kept inside the kernels).
    w1, w2, w3, wf1, wf2, wf3 = (a.astype(jnp.bfloat16)
                                 for a in (w1, w2, w3, wf1, wf2, wf3))

    # ---- Stage A: conv1-3 + max over points --------------------------------
    x = x_bkn.astype(jnp.bfloat16)          # bf16 DMA halves the HBM read
    nt = min(point_tile, ((N + 127) // 128) * 128)
    n_pad = ((N + nt - 1) // nt) * nt
    if n_pad != N:
        x = jnp.pad(x, ((0, 0), (0, 0), (0, n_pad - N)))
    n_tiles = n_pad // nt
    rem = N % nt
    n_valid_last = rem if rem != 0 else None

    conv_params = (w1, b1, w2, b2, w3)

    def const_spec(a):
        nd = a.ndim
        return pl.BlockSpec(a.shape, lambda b, t, _nd=nd: (0,) * _nd)

    g = pl.pallas_call(
        functools.partial(_conv_max_kernel, n_valid_last=n_valid_last),
        out_shape=jax.ShapeDtypeStruct((B, 1, 1024), jnp.bfloat16),
        grid=(B, n_tiles),
        in_specs=[pl.BlockSpec((1, K, nt), lambda b, t: (b, 0, t))]
                 + [const_spec(a) for a in conv_params],
        out_specs=pl.BlockSpec((1, 1, 1024), lambda b, t: (b, 0, 0)),
        scratch_shapes=[pltpu.VMEM((1, 1024), jnp.float32)],
        compiler_params=pltpu.CompilerParams(
            dimension_semantics=("parallel", "arbitrary"),
            vmem_limit_bytes=32 * 1024 * 1024),
    )(x, *conv_params)
    g = g.reshape(B, 1024)

    # ---- Stage B: batched FC head, runs once with M = B ---------------------
    fc_params = (b3, wf1, b4, wf2, b5, wf3, bf3)

    def full_spec(a):
        nd = a.ndim
        return pl.BlockSpec(a.shape, lambda i, _nd=nd: (0,) * _nd)

    out = pl.pallas_call(
        _fc_kernel,
        out_shape=jax.ShapeDtypeStruct((B, k * k), jnp.float32),
        grid=(1,),
        in_specs=[full_spec(g)] + [full_spec(a) for a in fc_params],
        out_specs=pl.BlockSpec((B, k * k), lambda i: (0, 0)),
        compiler_params=pltpu.CompilerParams(
            dimension_semantics=("arbitrary",)),
    )(g, *fc_params)
    return out.reshape(B, k, k)


# ----------------------------------------------------------------------------
# Pure-JAX reference (mirrors the PyTorch forward with eval-mode BN, f32).
# ----------------------------------------------------------------------------
def stnkd_reference(x_bkn, p, k):
    def bn_apply(z, bnp):
        gamma, beta, mean, var = bnp
        return gamma * (z - mean) / jnp.sqrt(var + EPS) + beta

    B = x_bkn.shape[0]
    x = jnp.transpose(x_bkn, (0, 2, 1)).astype(jnp.float32)   # (B, N, K)

    def conv(z, lp):
        w, b = lp
        return jnp.einsum("bnc,cd->bnd", z, w,
                          precision=jax.lax.Precision.HIGHEST) + b

    def fc(z, lp):
        w, b = lp
        return jnp.dot(z, w, precision=jax.lax.Precision.HIGHEST) + b

    h = jax.nn.relu(bn_apply(conv(x, p["conv1"]), p["bn1"]))
    h = jax.nn.relu(bn_apply(conv(h, p["conv2"]), p["bn2"]))
    h = jax.nn.relu(bn_apply(conv(h, p["conv3"]), p["bn3"]))
    g = jnp.max(h, axis=1)                                     # (B, 1024)
    if B == 1:
        f = jax.nn.relu(fc(g, p["fc1"]))
        f = jax.nn.relu(fc(f, p["fc2"]))
    else:
        f = jax.nn.relu(bn_apply(fc(g, p["fc1"]), p["bn4"]))
        f = jax.nn.relu(bn_apply(fc(f, p["fc2"]), p["bn5"]))
    o = fc(f, p["fc3"]) + jnp.eye(k, dtype=jnp.float32).reshape(1, k * k)
    return o.reshape(B, k, k)


if __name__ == "__main__":
    K = 16    # feature-transform size (module default is 64; kept small here)
    B = 4     # batch
    N = 500   # number of points (not a tile multiple -> exercises masking)

    root = jax.random.PRNGKey(0)
    k_param, k_x = jax.random.split(root)
    params = init_params(k_param, K)

    # PyTorch-layout input: (B, K, N)
    x = jax.random.normal(k_x, (B, K, N), jnp.float32)

    # Reference is full f32; kernel uses bf16 MXU operands (f32 accumulation),
    # so compare with a tolerance covering the precision difference.
    y_ref = jax.block_until_ready(stnkd_reference(x, params, K))

    # Default tiling (single point tile at this small N).
    y = jax.block_until_ready(stnkd_forward(x, params, K))
    assert y.shape == (B, K, K), y.shape
    err = float(jnp.max(jnp.abs(y - y_ref)))
    assert jnp.allclose(y, y_ref, atol=5e-2, rtol=5e-2), err

    # Small tile: exercises the multi-tile running max + last-tile-only mask.
    y2 = jax.block_until_ready(stnkd_forward(x, params, K, point_tile=128))
    err2 = float(jnp.max(jnp.abs(y2 - y_ref)))
    assert jnp.allclose(y2, y_ref, atol=5e-2, rtol=5e-2), err2

    print("KERNEL_OK")
</pallas_src>

<mosaic_0001>
module attributes {stable_mosaic.version = 11 : i64} {
  func.func @_conv_max_kernel(%arg0: i32, %arg1: i32, %arg2: memref<1x16x512xbf16, #tpu.memory_space<vmem>>, %arg3: memref<16x64xbf16, #tpu.memory_space<vmem>>, %arg4: memref<1x64xf32, #tpu.memory_space<vmem>>, %arg5: memref<64x128xbf16, #tpu.memory_space<vmem>>, %arg6: memref<1x128xf32, #tpu.memory_space<vmem>>, %arg7: memref<128x1024xbf16, #tpu.memory_space<vmem>>, %arg8: memref<1x1x1024xbf16, #tpu.memory_space<vmem>>, %arg9: memref<1x1024xf32, #tpu.memory_space<vmem>>) attributes {dimension_semantics = [#tpu.dimension_semantics<parallel>, #tpu.dimension_semantics<arbitrary>], iteration_bounds = array<i64: 4, 1>, scalar_prefetch = 0 : i64, scratch_operands = 1 : i64, tpu.core_type = #tpu.core_type<tc>, window_params = [{transform_indices = @transform_0, window_bounds = array<i64: 1, 16, 512>}, {pipeline_mode = #tpu.pipeline_mode<synchronous>, transform_indices = @transform_1, window_bounds = array<i64: 16, 64>}, {pipeline_mode = #tpu.pipeline_mode<synchronous>, transform_indices = @transform_2, window_bounds = array<i64: 1, 64>}, {pipeline_mode = #tpu.pipeline_mode<synchronous>, transform_indices = @transform_3, window_bounds = array<i64: 64, 128>}, {pipeline_mode = #tpu.pipeline_mode<synchronous>, transform_indices = @transform_4, window_bounds = array<i64: 1, 128>}, {pipeline_mode = #tpu.pipeline_mode<synchronous>, transform_indices = @transform_5, window_bounds = array<i64: 128, 1024>}, {transform_indices = @transform_6, window_bounds = array<i64: 1, 1, 1024>}]} {
    %c0 = arith.constant 0 : index
    %c0_0 = arith.constant 0 : index
    %c0_1 = arith.constant 0 : index
    %0 = vector.load %arg2[%c0, %c0_0, %c0_1] : memref<1x16x512xbf16, #tpu.memory_space<vmem>>, vector<1x16x512xbf16>
    %1 = vector.shape_cast %0 : vector<1x16x512xbf16> to vector<16x512xbf16>
    %2 = tpu.transpose %1, [1, 0] : vector<16x512xbf16> -> vector<512x16xbf16>
    %c0_2 = arith.constant 0 : index
    %c0_3 = arith.constant 0 : index
    %3 = vector.load %arg3[%c0_2, %c0_3] : memref<16x64xbf16, #tpu.memory_space<vmem>>, vector<16x64xbf16>
    %cst = arith.constant dense<0.000000e+00> : vector<512x64xf32>
    %4 = tpu.matmul %2, %3, %cst {dimension_numbers = #tpu.dot_dimension_numbers<[1], [0], [0], [1], [0, 0, 1, 1], [], []>} : vector<512x16xbf16>, vector<16x64xbf16>, vector<512x64xf32> -> vector<512x64xf32>
    %c0_4 = arith.constant 0 : index
    %c0_5 = arith.constant 0 : index
    %5 = vector.load %arg4[%c0_4, %c0_5] : memref<1x64xf32, #tpu.memory_space<vmem>>, vector<1x64xf32>
    %6 = vector.broadcast %5 : vector<1x64xf32> to vector<512x64xf32>
    %7 = arith.addf %4, %6 : vector<512x64xf32>
    %cst_6 = arith.constant 0.000000e+00 : f32
    %8 = vector.broadcast %cst_6 : f32 to vector<512x64xf32>
    %9 = arith.maximumf %7, %8 : vector<512x64xf32>
    %10 = arith.truncf %9 : vector<512x64xf32> to vector<512x64xbf16>
    %c0_7 = arith.constant 0 : index
    %c0_8 = arith.constant 0 : index
    %11 = vector.load %arg5[%c0_7, %c0_8] : memref<64x128xbf16, #tpu.memory_space<vmem>>, vector<64x128xbf16>
    %cst_9 = arith.constant dense<0.000000e+00> : vector<512x128xf32>
    %12 = tpu.matmul %10, %11, %cst_9 {dimension_numbers = #tpu.dot_dimension_numbers<[1], [0], [0], [1], [0, 0, 1, 1], [], []>} : vector<512x64xbf16>, vector<64x128xbf16>, vector<512x128xf32> -> vector<512x128xf32>
    %c0_10 = arith.constant 0 : index
    %c0_11 = arith.constant 0 : index
    %13 = vector.load %arg6[%c0_10, %c0_11] : memref<1x128xf32, #tpu.memory_space<vmem>>, vector<1x128xf32>
    %14 = vector.broadcast %13 : vector<1x128xf32> to vector<512x128xf32>
    %15 = arith.addf %12, %14 : vector<512x128xf32>
    %cst_12 = arith.constant 0.000000e+00 : f32
    %16 = vector.broadcast %cst_12 : f32 to vector<512x128xf32>
    %17 = arith.maximumf %15, %16 : vector<512x128xf32>
    %18 = arith.truncf %17 : vector<512x128xf32> to vector<512x128xbf16>
    %c0_13 = arith.constant 0 : index
    %c0_14 = arith.constant 0 : index
    %19 = vector.load %arg7[%c0_13, %c0_14] : memref<128x1024xbf16, #tpu.memory_space<vmem>>, vector<128x1024xbf16>
    %cst_15 = arith.constant dense<0.000000e+00> : vector<512x1024xf32>
    %20 = tpu.matmul %18, %19, %cst_15 {dimension_numbers = #tpu.dot_dimension_numbers<[1], [0], [0], [1], [0, 0, 1, 1], [], []>} : vector<512x128xbf16>, vector<128x1024xbf16>, vector<512x1024xf32> -> vector<512x1024xf32>
    %cst_16 = arith.constant dense<0xFF800000> : vector<1024xf32>
    %21 = vector.multi_reduction <maximumf>, %20, %cst_16 [0] : vector<512x1024xf32> to vector<1024xf32>
    %22 = vector.shape_cast %21 : vector<1024xf32> to vector<1x1024xf32>
    %c0_17 = arith.constant 0 : index
    %c0_18 = arith.constant 0 : index
    %23 = vector.load %arg9[%c0_17, %c0_18] : memref<1x1024xf32, #tpu.memory_space<vmem>>, vector<1x1024xf32>
    tpu.vector_store %arg9[%c0_17, %c0_18], %22 {strides = array<i32>} : memref<1x1024xf32, #tpu.memory_space<vmem>>, vector<1x1024xf32>,
    %c0_i32 = arith.constant 0 : i32
    %24 = arith.cmpi eq, %arg1, %c0_i32 : i32
    %25 = arith.extui %24 : i1 to i32
    %c0_i32_19 = arith.constant 0 : i32
    %26 = arith.cmpi ne, %25, %c0_i32_19 : i32
    scf.if %26 {
      %33 = tpu.iota {dimensions = array<i32: 0>} : vector<512x1024xi32>
      %c500_i32 = arith.constant 500 : i32
      %34 = vector.broadcast %c500_i32 : i32 to vector<512x1024xi32>
      %35 = arith.cmpi slt, %33, %34 : vector<512x1024xi32>
      %cst_24 = arith.constant 0xFF800000 : f32
      %36 = vector.broadcast %cst_24 : f32 to vector<512x1024xf32>
      %37 = arith.select %35, %20, %36 : vector<512x1024xi1>, vector<512x1024xf32>
      %cst_25 = arith.constant dense<0xFF800000> : vector<1024xf32>
      %38 = vector.multi_reduction <maximumf>, %37, %cst_25 [0] : vector<512x1024xf32> to vector<1024xf32>
      %39 = vector.shape_cast %38 : vector<1024xf32> to vector<1x1024xf32>
      %c0_26 = arith.constant 0 : index
      %c0_27 = arith.constant 0 : index
      %40 = vector.load %arg9[%c0_26, %c0_27] : memref<1x1024xf32, #tpu.memory_space<vmem>>, vector<1x1024xf32>
      tpu.vector_store %arg9[%c0_26, %c0_27], %39 {strides = array<i32>} : memref<1x1024xf32, #tpu.memory_space<vmem>>, vector<1x1024xf32>,
    } else {
    }
    %c0_i32_20 = arith.constant 0 : i32
    %27 = arith.cmpi eq, %arg1, %c0_i32_20 : i32
    %28 = arith.extui %27 : i1 to i32
    %c0_i32_21 = arith.constant 0 : i32
    %29 = arith.cmpi ne, %28, %c0_i32_21 : i32
    scf.if %29 {
      %c0_24 = arith.constant 0 : index
      %c0_25 = arith.constant 0 : index
      %33 = vector.load %arg9[%c0_24, %c0_25] : memref<1x1024xf32, #tpu.memory_space<vmem>>, vector<1x1024xf32>
      %34 = arith.truncf %33 : vector<1x1024xf32> to vector<1x1024xbf16>
      %c0_26 = arith.constant 0 : index
      %c0_27 = arith.constant 0 : index
      %c0_28 = arith.constant 0 : index
      %35 = vector.load %arg8[%c0_26, %c0_27, %c0_28] : memref<1x1x1024xbf16, #tpu.memory_space<vmem>>, vector<1x1x1024xbf16>
      %36 = vector.shape_cast %35 : vector<1x1x1024xbf16> to vector<1x1024xbf16>
      %37 = vector.shape_cast %34 : vector<1x1024xbf16> to vector<1x1x1024xbf16>
      tpu.vector_store %arg8[%c0_26, %c0_27, %c0_28], %37 {strides = array<i32>} : memref<1x1x1024xbf16, #tpu.memory_space<vmem>>, vector<1x1x1024xbf16>,
    } else {
    }
    %c0_i32_22 = arith.constant 0 : i32
    %30 = arith.cmpi sgt, %arg1, %c0_i32_22 : i32
    %31 = arith.extui %30 : i1 to i32
    %c0_i32_23 = arith.constant 0 : i32
    %32 = arith.cmpi ne, %31, %c0_i32_23 : i32
    scf.if %32 {
      %c0_24 = arith.constant 0 : index
      %c0_25 = arith.constant 0 : index
      %c0_26 = arith.constant 0 : index
      %33 = vector.load %arg8[%c0_24, %c0_25, %c0_26] : memref<1x1x1024xbf16, #tpu.memory_space<vmem>>, vector<1x1x1024xbf16>
      %34 = vector.shape_cast %33 : vector<1x1x1024xbf16> to vector<1x1024xbf16>
      %35 = arith.extf %34 : vector<1x1024xbf16> to vector<1x1024xf32>
      %c0_27 = arith.constant 0 : index
      %c0_28 = arith.constant 0 : index
      %36 = vector.load %arg9[%c0_27, %c0_28] : memref<1x1024xf32, #tpu.memory_space<vmem>>, vector<1x1024xf32>
      %37 = arith.maximumf %35, %36 : vector<1x1024xf32>
      %38 = arith.truncf %37 : vector<1x1024xf32> to vector<1x1024xbf16>
      %c0_29 = arith.constant 0 : index
      %c0_30 = arith.constant 0 : index
      %c0_31 = arith.constant 0 : index
      %39 = vector.load %arg8[%c0_29, %c0_30, %c0_31] : memref<1x1x1024xbf16, #tpu.memory_space<vmem>>, vector<1x1x1024xbf16>
      %40 = vector.shape_cast %39 : vector<1x1x1024xbf16> to vector<1x1024xbf16>
      %41 = vector.shape_cast %38 : vector<1x1024xbf16> to vector<1x1x1024xbf16>
      tpu.vector_store %arg8[%c0_29, %c0_30, %c0_31], %41 {strides = array<i32>} : memref<1x1x1024xbf16, #tpu.memory_space<vmem>>, vector<1x1x1024xbf16>,
    } else {
    }
    return
  }
  func.func @transform_0(%arg0: i32, %arg1: i32) -> (i32, i32, i32) {
    %c0_i32 = arith.constant 0 : i32
    %c0_i32_0 = arith.constant 0 : i32
    return %arg0, %c0_i32, %arg1 : i32, i32, i32
  }
  func.func @transform_1(%arg0: i32, %arg1: i32) -> (i32, i32) {
    %c0_i32 = arith.constant 0 : i32
    %c0_i32_0 = arith.constant 0 : i32
    %c0_i32_1 = arith.constant 0 : i32
    return %c0_i32, %c0_i32_0 : i32, i32
  }
  func.func @transform_2(%arg0: i32, %arg1: i32) -> (i32, i32) {
    %c0_i32 = arith.constant 0 : i32
    %c0_i32_0 = arith.constant 0 : i32
    %c0_i32_1 = arith.constant 0 : i32
    return %c0_i32, %c0_i32_0 : i32, i32
  }
  func.func @transform_3(%arg0: i32, %arg1: i32) -> (i32, i32) {
    %c0_i32 = arith.constant 0 : i32
    %c0_i32_0 = arith.constant 0 : i32
    %c0_i32_1 = arith.constant 0 : i32
    return %c0_i32, %c0_i32_0 : i32, i32
  }
  func.func @transform_4(%arg0: i32, %arg1: i32) -> (i32, i32) {
    %c0_i32 = arith.constant 0 : i32
    %c0_i32_0 = arith.constant 0 : i32
    %c0_i32_1 = arith.constant 0 : i32
    return %c0_i32, %c0_i32_0 : i32, i32
  }
  func.func @transform_5(%arg0: i32, %arg1: i32) -> (i32, i32) {
    %c0_i32 = arith.constant 0 : i32
    %c0_i32_0 = arith.constant 0 : i32
    %c0_i32_1 = arith.constant 0 : i32
    return %c0_i32, %c0_i32_0 : i32, i32
  }
  func.func @transform_6(%arg0: i32, %arg1: i32) -> (i32, i32, i32) {
    %c0_i32 = arith.constant 0 : i32
    %c0_i32_0 = arith.constant 0 : i32
    %c0_i32_1 = arith.constant 0 : i32
    return %arg0, %c0_i32, %c0_i32_0 : i32, i32, i32
  }
}

</mosaic_0001>

<bundles_post_ra>
// kernel: tpu_custom_call.1
= control target key start
LH: loop header
LB: loop body
LE: loop exit
PB: predicated region body
PF: predicated region fallthrough
CT: control target
= control target key end

     0   :  { %11 = vsyncpa [#allocation4], 0  ;;  %s7094_s0 = inlined_call_operand.hbm [shape: bf16[4,16,512], index: 0, kind: input, shape index: {}]   ;;  %s7095_s1 = inlined_call_operand.hbm [shape: bf16[16,64], index: 1, kind: input, shape index: {}]   ;;  %s7096_s2 = inlined_call_operand.vmem [shape: f32[1,64], index: 2, kind: input, shape index: {}]   ;;  %s7097_s3 = inlined_call_operand.hbm [shape: bf16[64,128], index: 3, kind: input, shape index: {}]   ;;  %s7098_s4 = inlined_call_operand.vmem [shape: f32[1,128], index: 4, kind: input, shape index: {}]   ;;  %s7099_s5 = inlined_call_operand.hbm [shape: bf16[128,1024], index: 5, kind: input, shape index: {}]   ;;  %s7100_s6 = inlined_call_operand.vmem [shape: bf16[4,1,1024], index: 6, kind: output, shape index: {}]  }
   0x1   :  { %13 = vsyncpa [#allocation4 + $0x1], 0 }
   0x2   :  { %14 = vsyncpa [#allocation6], 0 }
   0x3   :  { %15 = vsyncpa [#allocation9], 0  ;;  %s6215_s21 = smov 0   ;;  %s6217_s22 = smov 0  }
   0x4   :  { %s6219_s23 = smov 0   ;;  %s6221_s24 = smov 0  }
   0x5   :  { %s6223_s25 = smov 0   ;;  %s6225_s26 = smov 0  }
   0x6 LB: > { %s5516_s27 = sadd.s32 4294967295, %s6166_s26   ;;  %p55_p0 = scmp.ne.s32.totalorder %s6150_s22, %s6146_s21  ;;  %s6166_s26 = sphi %s6225_s26, %s21_s26   ;;  %s6162_s25 = sphi %s6223_s25, %s7130_s25   ;;  %s6158_s24 = sphi %s6221_s24, %s7129_s24   ;;  %s6154_s23 = sphi %s6219_s23, %s7128_s23   ;;  %s6150_s22 = sphi %s6217_s22, %s7127_s22   ;;  %s6146_s21 = sphi %s6215_s21, %s7126_s21  }
   0x7   : > { %p6245_p1 = scmp.eq.s32.totalorder %s5516_s27, 0  ;;  %p5518_p2 = scmp.ge.s32.totalorder %s6166_s26, 1 }
   0x8   : > { %p197_p3 = scmp.lt.s32.totalorder %s6166_s26, 5  ;;  %s6168_s7 = smov [#allocation5]  }
   0x9   : > { %s7105_s28 = scalar_select %p6245_p1, 1, 0 }
   0xa   : > { %p6253_p4 = por %p6245_p1, %p55_p0  ;;  %p6257_p5 = pnand %p5518_p2, %p197_p3 }
   0xb   : > { %s209_s8 = sshll.u32 %s6168_s7, 4  ;;  %s6169_s10 = smov [#allocation7]   ;;  %s6261_s8 = int_to_ptr.vmem [resolvable:$true] %s209_s8 }
   0xc   : > { %s7106_s29 = scalar_select %p6253_p4, 1, 0 }
   0xd   : > { %s7107_s30 = scalar_select %p6257_p5, 1, 0 }
   0xe   : > { %p5903_p6 = pneg %p6257_p5  ;;  %s225_s11 = sshll.u32 %s6169_s10, 4  ;;  %s6271_s11 = int_to_ptr.vmem [resolvable:$true] %s225_s11 }
   0xf   : > { %s6170_s12 = smov [#allocation8]   ;;  %s5994_s16 = scalar_lea.hbm %s7095_s1, 128 }
  0x10   : > { %p6267_p7 = pnand %p5903_p6, %p6245_p1  ;;  %s6273_s13 = sshll.u32 %s6170_s12, 4  ;;  %s242_s13 = int_to_ptr.vmem [resolvable:$true] %s6273_s13 }
  0x11   : > { %p5995_p8 = scmp.ne.s32.totalorder %s7095_s1, %s5994_s16  ;;  %p6001_p12 = scmp.lt.u32.totalorder %s5994_s16, %s7095_s1 }
  0x12   : > { %p6283_p9 = pneg %p6267_p7 }
  0x14   : > { %p5997_p10 = pnand %p6283_p9, %p5995_p8 }
  0x16   : > { %p5998_p11 = pneg %p5997_p10 }
  0x18   : > { %p6003_p13 = pnand %p6001_p12, %p5998_p11 }
  0x1a   : > { %6006 = shalt.err (!%p6003_p13)
}
  0x1b   : > { %s6007_s27 = scalar_lea.vmem %s6261_s8, 128  ;;  %p6015_p6 = scmp.lt.s32.totalorder %s6261_s8, %s6261_s8 }
  0x1c   : > { %p6008_p0 = scmp.ne.s32.totalorder %s6261_s8, %s6007_s27  ;;  %p6016_p1 = scmp.lt.s32.totalorder %s6007_s27, %s6007_s27 }
  0x1e   : > { %p6010_p2 = pnand %p6008_p0, %p6283_p9  ;;  %p6017_p8 = por %p6016_p1, %p6015_p6 }
  0x20   : > { %p6011_p3 = pneg %p6010_p2 }
  0x22   : > { %p6018_p10 = pnand %p6017_p8, %p6011_p3 }
  0x24   : > { %6021 = shalt.err (!%p6018_p10)
}
  0x25   : > { %s6171_s7 = smov 64   ;;  %s6172_s10 = smov 4  }
  0x26   : > { %5906 = dma.hbm_to_vmem [thread:$0]  (!%p6267_p7), %s7095_s1, 128, %s6261_s8, [#allocation6], %s6171_s7, %s6171_s7, %s6172_s10  }
  0x27   : > { %s6022_s17 = scalar_lea.hbm %s7097_s3, 512 }
  0x28   : > { %p6023_p1 = scmp.ne.s32.totalorder %s7097_s3, %s6022_s17  ;;  %p6029_p13 = scmp.lt.u32.totalorder %s6022_s17, %s7097_s3 }
  0x2a   : > { %p6025_p11 = pnand %p6023_p1, %p6283_p9 }
  0x2c   : > { %p6026_p12 = pneg %p6025_p11 }
  0x2e   : > { %p6031_p0 = pnand %p6029_p13, %p6026_p12 }
  0x30   : > { %6034 = shalt.err (!%p6031_p0)
}
  0x31   : > { %s6035_s8 = scalar_lea.vmem %s6271_s11, 512  ;;  %p6043_p8 = scmp.lt.s32.totalorder %s6271_s11, %s6271_s11 }
  0x32   : > { %p6036_p2 = scmp.ne.s32.totalorder %s6271_s11, %s6035_s8  ;;  %p6044_p10 = scmp.lt.s32.totalorder %s6035_s8, %s6035_s8 }
  0x34   : > { %p6038_p3 = pnand %p6036_p2, %p6283_p9  ;;  %p6045_p1 = por %p6044_p10, %p6043_p8 }
  0x36   : > { %p6039_p6 = pneg %p6038_p3 }
  0x38   : > { %p6046_p11 = pnand %p6045_p1, %p6039_p6 }
  0x3a   : > { %6049 = shalt.err (!%p6046_p11)
}
  0x3b   : > { %5909 = dma.hbm_to_vmem [thread:$0]  (!%p6267_p7), %s7097_s3, 512, %s6271_s11, [#allocation6], %s6171_s7, %s6171_s7, %s6172_s10  }
  0x3c   : > { %s6050_s17 = scalar_lea.hbm %s7099_s5, 8192 }
  0x3d   : > { %p6051_p12 = scmp.ne.s32.totalorder %s7099_s5, %s6050_s17  ;;  %p6057_p2 = scmp.lt.u32.totalorder %s6050_s17, %s7099_s5 }
  0x3f   : > { %p6053_p13 = pnand %p6051_p12, %p6283_p9 }
  0x41   : > { %p6054_p0 = pneg %p6053_p13 }
  0x43   : > { %p6059_p3 = pnand %p6057_p2, %p6054_p0 }
  0x45   : > { %6062 = shalt.err (!%p6059_p3)
}
  0x46   : > { %s6063_s8 = scalar_lea.vmem %s242_s13, 8192  ;;  %p6071_p1 = scmp.lt.s32.totalorder %s242_s13, %s242_s13 }
  0x47   : > { %p6064_p6 = scmp.ne.s32.totalorder %s242_s13, %s6063_s8  ;;  %p6072_p11 = scmp.lt.s32.totalorder %s6063_s8, %s6063_s8 }
  0x49   : > { %p6066_p8 = pnand %p6064_p6, %p6283_p9  ;;  %p6073_p4 = por %p6072_p11, %p6071_p1 }
  0x4b   : > { %p6067_p10 = pneg %p6066_p8 }
  0x4d   : > { %p6074_p5 = pnand %p6073_p4, %p6067_p10 }
  0x4f   : > { %6077 = shalt.err (!%p6074_p5)
}
  0x50   : > { %s6173_s11 = smov 512   ;;  %s6174_s7 = smov 32  }
  0x51   : > { %5912 = dma.hbm_to_vmem [thread:$0]  (!%p6267_p7), %s7099_s5, 8192, %s242_s13, [#allocation9], %s6173_s11, %s6173_s11, %s6174_s7  }
  0x52   : > { %s42_s12 = sadd.s32 1, %s6154_s23  ;;  %s33_s14 = sadd.s32 1, %s6162_s25 }
  0x53   : > { %p49_p4 = scmp.ne.s32.totalorder %s6154_s23, %s6150_s22  ;;  %p35_p5 = scmp.ge.s32.totalorder %s33_s14, 4 }
  0x54   : > { %p50_p9 = scmp.eq.s32.totalorder %s6166_s26, 0  ;;  %p5920_p12 = scmp.lt.s32.totalorder %s6166_s26, 4 }
  0x55   : > { %s255_s15 = sand.u32 1, %s6154_s23   ;;  %s7132_s14 = smov (%p35_p5, %s33_s14), 0 }
  0x56   : > { %p51_p13 = por %p50_p9, %p49_p4  ;;  %s37_s16 = ssub.s32 %s6162_s25, %s7132_s14 }
  0x57   : > { %s5523_s17 = sshll.u32 %s255_s15, 5  ;;  %p40_p0 = scmp.eq.s32.totalorder %s37_s16, 0 }
  0x58   : > { %s5681_s9 = sshll.u32 %s6162_s25, 9  ;;  %s259_s18 = scalar_lea.vmem [#allocation3], %s5523_s17 }
  0x59   : > { %s268_s20 = sshll.u32 %s259_s18, 4  ;;  %s6364_s8 = scalar_lea.hbm %s7094_s0, %s5681_s9  ;;  %s6366_s20 = int_to_ptr.vmem [resolvable:$true] %s268_s20 }
  0x5a   : > { %s6359_s13 = scalar_select %p40_p0, %s6154_s23, %s42_s12  }
  0x5b   : > { %p6370_p7 = pnand %p5920_p12, %p51_p13  ;;  %s6374_s7 = scalar_lea.sflag [#allocation4], %s255_s15 }
  0x5c   : > { %s6078_s19 = scalar_lea.hbm %s6364_s8, 512  ;;  %s6083_s16 = scalar_lea.hbm %s7094_s0, 2048 }
  0x5d   : > { %p6079_p2 = scmp.ne.s32.totalorder %s6364_s8, %s6078_s19  ;;  %p6080_p3 = pneg %p6370_p7 }
  0x5e   : > { %p6084_p10 = scmp.lt.u32.totalorder %s6364_s8, %s7094_s0  ;;  %p6085_p1 = scmp.lt.u32.totalorder %s6083_s16, %s6078_s19 }
  0x5f   : > { %p6081_p6 = pnand %p6080_p3, %p6079_p2  ;;  %p6087_p4 = scmp.lt.u32.totalorder %s6078_s19, %s6364_s8 }
  0x60   : > { %p6086_p11 = por %p6085_p1, %p6084_p10 }
  0x61   : > { %p6082_p8 = pneg %p6081_p6 }
  0x62   : > { %p6088_p5 = por %p6087_p4, %p6086_p11 }
  0x64   : > { %p6089_p9 = pnand %p6088_p5, %p6082_p8 }
  0x66   : > { %6092 = shalt.err (!%p6089_p9)
}
  0x67   : > { %s6093_s15 = scalar_lea.vmem %s6366_s20, 512  ;;  %s6175_s18 = smov [#allocation3]  }
  0x68   : > { %p6094_p12 = scmp.ne.s32.totalorder %s6366_s20, %s6093_s15  ;;  %s6098_s21 = sshll.u32 %s6175_s18, 4  ;;  %s6099_s21 = int_to_ptr.vmem [resolvable:$false] %s6098_s21 }
  0x69   : > { %s6100_s27 = scalar_lea.vmem %s6099_s21, 1024  ;;  %p6101_p2 = scmp.lt.s32.totalorder %s6366_s20, %s6099_s21 }
  0x6a   : > { %p6096_p13 = pnand %p6094_p12, %p6080_p3  ;;  %p6102_p6 = scmp.lt.s32.totalorder %s6100_s27, %s6093_s15 }
  0x6c   : > { %p6097_p0 = pneg %p6096_p13  ;;  %p6103_p10 = por %p6102_p6, %p6101_p2 }
  0x6e   : > { %p6104_p1 = pnand %p6103_p10, %p6097_p0 }
  0x70   : > { %6107 = shalt.err (!%p6104_p1)
}
  0x71   : > { %s6176_s19 = smov 256   ;;  %s6177_s10 = smov 16  }
  0x72   : > { %5916 = dma.hbm_to_vmem [thread:$0]  (!%p6370_p7), %s6364_s8, 512, %s6366_s20, %s6374_s7, %s6176_s19, %s6176_s19, %s6177_s10  }
  0x73   : > { %p7111_p3 = scmp.ne.s32.totalorder %s7107_s30, 0 }
  0x74   : > { %s282_s12 = sand.u32 (!%p7111_p3), 1, %s6150_s22   ;;  %p7112_p8 = scmp.ne.s32.totalorder (!%p7111_p3), %s7106_s29, 0 }
  0x75   : > { %280 = sbr.rel (%p7111_p3) target bundleno = 1438 (0x59e), region = 44  ;;  %s5527_s16 = sshll.u32 (!%p7111_p3), %s282_s12, 5 }
  0x76   : > { %s283_s17 = scalar_lea.sflag (!%p7111_p3), [#allocation4], %s282_s12  ;;  %s286_s9 = scalar_lea.vmem (!%p7111_p3), [#allocation3], %s5527_s16 }
  0x7c   : > { %6133 = dma.done.wait (%p7112_p8), %s283_s17, 512  }
  0x7d   : > { %6135 = vsyncadd (%p7112_p8), %s283_s17, 4294966784  ;;  %p7113_p11 = scmp.ne.s32.totalorder %s7105_s28, 0 }
  0x7f   : > { %6137 = dma.done.wait (%p7113_p11), [#allocation6], 640  }
  0x80   : > { %6139 = vsyncadd (%p7113_p11), [#allocation6], 4294966656 }
  0x81   : > { %6141 = dma.done.wait (%p7113_p11), [#allocation9], 8192  }
  0x82   : > { %6143 = vsyncadd (%p7113_p11), [#allocation9], 4294959104  ;;  %v5983_v0 = vld [vmem:[%s286_s9] ss:$16 sps:$4 sm:$0xff]   ;;  %v5987_v2 = vld [vmem:[%s286_s9 + $0x8] ss:$16 sps:$4 sm:$0xff]  }
  0x83   : > { %356 = vxpose.xlu0.c.b16.start.end [1/1] (short) %v5983_v0, 128  ;;  %v5986_v1 = vld [vmem:[#allocation5] sm:$0xff]   ;;  %388 = vxpose.xlu1.c.b16.start.end [1/1] (short) %v5987_v2, 128  ;;  %v5989_v4 = vld [vmem:[%s286_s9 + $0xc] ss:$16 sps:$4 sm:$0xff]   ;;  %v5991_v6 = vld [vmem:[#allocation7 + $0x8] sm:$0xff]   ;;  %vm435_vm0 = vcmask 130048   ;;  %vm956_vm1 = vcmask 523264  }
  0x84   : > { %5751 = vmatprep.subr.bf16.mxu0 %v5986_v1  ;;  %v5985_v3 = vld [vmem:[%s286_s9 + $0x4] ss:$16 sps:$4 sm:$0xff]   ;;  %v5990_v5 = vld [vmem:[#allocation7] sm:$0xff]   ;;  %v5992_v33 = vld [vmem:[#allocation7 + $0x10] sm:$0xff]   ;;  %vm5209_vm3 = vcmask 1040384   ;;  %vm5212_vm5 = vcmask 1041409  }
  0x85   : > { %5752 = vmatpush3.bf16.msra.mxu0 %v5986_v1  ;;  %5817 = vmatprep.subr.bf16.mxu1 %v5990_v5  ;;  %v5993_v35 = vld [vmem:[#allocation7 + $0x18] sm:$0xff]   ;;  %v1438_v41 = vld [vmem:[#allocation8] sm:$0xff]  ;;  %v6449_v43 = vld [vmem:[#allocation8 + $0x8] sm:$0xff]  ;;  %vm5210_vm4 = vsmask.f32 256  ;;  %vm5216_vm9 = vcmask 1042434  }
  0x86   : > { %5818 = vmatpush3.bf16.msra.mxu1 %v5990_v5  ;;  %v1442_v42 = vld [vmem:[#allocation8 + $0x20] sm:$0xff]  ;;  %v6451_v46 = vld [vmem:[#allocation8 + $0x28] sm:$0xff]  ;;  %vm5213_vm6 = vsmask.f32 1280  ;;  %vm7005_vm7 = vmand %vm5209_vm3, %vm5210_vm4  ;;  %vm5217_vm10 = vsmask.f32 2304 }
  0x87   : > { %5819 = vmatprep.subr.bf16.mxu1 %v5991_v6  ;;  %v5607_v44 = vcombine.low %v1438_v41, %v1442_v42  ;;  %v5608_v45 = vcombine.high %v1438_v41, %v1442_v42  ;;  %v5609_v47 = vcombine.low %v6449_v43, %v6451_v46  ;;  %v5610_v48 = vcombine.high %v6449_v43, %v6451_v46  ;;  %v1446_v49 = vld [vmem:[#allocation8 + $0x40] sm:$0xff]  ;;  %vm7009_vm8 = vmand %vm5212_vm5, %vm5213_vm6  ;;  %p327_p7 = scmp.lt.s32.totalorder %s6158_s24, 3 }
  0x88   : > { %v1450_v50 = vld [vmem:[#allocation8 + $0x60] sm:$0xff]  ;;  %vm5215_vm11 = vmor %vm7009_vm8, %vm7005_vm7  ;;  %vm5220_vm13 = vcmask 1043459   ;;  %vm5221_vm14 = vsmask.f32 3328  ;;  %vm5228_vm5 = vcmask 1045509  }
  0x89   : > { %1822 = vmatprep.subr.bf16.mxu0 %v5608_v45  ;;  %v5615_v51 = vcombine.low %v1446_v49, %v1450_v50  ;;  %v5616_v52 = vcombine.high %v1446_v49, %v1450_v50  ;;  %v1454_v53 = vld [vmem:[#allocation8 + $0x80] sm:$0xff]  ;;  %v1463_v50 = vld [vmem:[#allocation8 + $0xc8] sm:$0xff]  ;;  %vm5218_vm12 = vmand %vm5216_vm9, %vm5217_vm10  ;;  %vm5229_vm6 = vsmask.f32 5376  ;;  %vm5232_vm9 = vcmask 1046534   ;;  %s7134_s24 = smov (!%p327_p7, %s6158_s24), 3 }
  0x8a   : > { %5820 = vmatpush3.bf16.msra.mxu1 %v5991_v6  ;;  %v1458_v54 = vld [vmem:[#allocation8 + $0xa0] sm:$0xff]  ;;  %vm7017_vm15 = vmor %vm5218_vm12, %vm5215_vm11  ;;  %vm5233_vm10 = vsmask.f32 6400  ;;  %s5531_s8 = sshll.u32 %s7134_s24, 3 }
  0x8b   : > { %5821 = vmatprep.subr.bf16.mxu1 %v5992_v33  ;;  %v5623_v55 = vcombine.low %v1454_v53, %v1458_v54  ;;  %v5624_v56 = vcombine.high %v1454_v53, %v1458_v54  ;;  %v1462_v57 = vld [vmem:[#allocation8 + $0xc0] sm:$0xff]  ;;  %vm7054_vm8 = vmand %vm5228_vm5, %vm5229_vm6  ;;  %s330_s15 = scalar_lea.vmem %s7100_s6, %s5531_s8 }
  0x8c   : > { %v1466_v58 = vld [vmem:[#allocation8 + $0xe0] sm:$0xff]  ;;  %vm5234_vm12 = vmand %vm5232_vm9, %vm5233_vm10 }
  0x8d   : > { %v5631_v59 = vcombine.low %v1462_v57, %v1466_v58  ;;  %v5632_v60 = vcombine.high %v1462_v57, %v1466_v58  ;;  %v1470_v61 = vld [vmem:[#allocation8 + $0x100] sm:$0xff] }
  0x8e   : > { %5822 = vmatpush3.bf16.msra.mxu1 %v5992_v33  ;;  %v1474_v62 = vld [vmem:[#allocation8 + $0x120] sm:$0xff] }
  0x8f   : > { %5823 = vmatprep.subr.bf16.mxu1 %v5993_v35  ;;  %v5639_v63 = vcombine.low %v1470_v61, %v1474_v62  ;;  %v5640_v0 = vcombine.high %v1470_v61, %v1474_v62  ;;  %v1478_v1 = vld [vmem:[#allocation8 + $0x140] sm:$0xff] }
  0x90   : > { %v1482_v2 = vld [vmem:[#allocation8 + $0x160] sm:$0xff] }
  0x91   : > { %v1486_v5 = vld [vmem:[#allocation8 + $0x180] sm:$0xff] }
  0x92   : > { %5824 = vmatpush3.bf16.msra.mxu1 %v5993_v35  ;;  %v1490_v6 = vld [vmem:[#allocation8 + $0x1a0] sm:$0xff] }
  0x93   : > { %2175 = vmatprep.subr.bf16.mxu1 %v5610_v48 }
  0xa0   : > { %372 = vxpose.xlu0.c.b16.start.end [1/1] (short) %v5985_v3, 128  ;;  %404 = vxpose.xlu1.c.b16.start.end [1/1] (short) %v5989_v4, 128  ;;  %v5647_v3 = vcombine.low %v1478_v1, %v1482_v2  ;;  %v5648_v4 = vcombine.high %v1478_v1, %v1482_v2 }
  0xe9   : > { %v364_v7 = vpop.trf.xlu0  ;;  %v396_v18 = vpop.trf.xlu1 }
  0xea   : > { %5753 = vmatprep.mubr.msk.bf16.mxu0 %vm435_vm0, %v364_v7  ;;  %v5655_v7 = vcombine.low %v1486_v5, %v1490_v6 }
  0xed   : > { %v365_v8 = vpop.trf.xlu0  ;;  %v397_v20 = vpop.trf.xlu1 }
  0xee   : > { %5754 = vmatmul.mubr.msk.bf16.vlgmr.msra.gmra.mrb[0].mxu0 %vm435_vm0, %v365_v8  ;;  %v5656_v8 = vcombine.high %v1486_v5, %v1490_v6  ;;  %v1479_v5 = vld [vmem:[#allocation8 + $0x148] sm:$0xff] }
  0xef   : > { %1823 = vmatpush1.bf16.msra.mxu0 %v5607_v44  ;;  %v1483_v6 = vld [vmem:[#allocation8 + $0x168] sm:$0xff] }
  0xf0   : > { %1824 = vmatprep.subr.bf16.mxu0 %v5616_v52 }
  0xf1   : > { %v366_v9 = vpop.trf.xlu0  ;;  %v398_v22 = vpop.trf.xlu1 }
  0xf2   : > { %5757 = vmatprep.mubr.msk.bf16.mxu0 %vm435_vm0, %v366_v9  ;;  %v6460_v9 = vld [vmem:[%s7096_s2] ss:$0 sm:$0xff] }
  0xf3   : > { %1825 = vmatpush1.bf16.msra.mxu0 %v5615_v51  ;;  %v1467_v51 = vld [vmem:[#allocation8 + $0xe8] sm:$0xff] }
  0xf4   : > { %1826 = vmatprep.subr.bf16.mxu0 %v5624_v56  ;;  %v5634_v58 = vcombine.high %v1463_v50, %v1467_v51  ;;  %v5633_v1 = vcombine.low %v1463_v50, %v1467_v51 }
  0xf5   : > { %v367_v10 = vpop.trf.xlu0  ;;  %v399_v25 = vpop.trf.xlu1 }
  0xf6   : > { %5758 = vmatmul.mubr.msk.bf16.gmra.mrb[4].mxu0 %vm435_vm0, %v367_v10 }
  0xf7   : > { %1827 = vmatpush1.bf16.msra.mxu0 %v5623_v55 }
  0xf8   : > { %1828 = vmatprep.subr.bf16.mxu0 %v5632_v60 }
  0xf9   : > { %v368_v11 = vpop.trf.xlu0  ;;  %v400_v27 = vpop.trf.xlu1 }
  0xfa   : > { %5761 = vmatprep.mubr.msk.bf16.mxu0 %vm435_vm0, %v368_v11  ;;  %v1494_v11 = vld [vmem:[#allocation8 + $0x1c0] sm:$0xff] }
  0xfb   : > { %1829 = vmatpush1.bf16.msra.mxu0 %v5631_v59  ;;  %v1475_v59 = vld [vmem:[#allocation8 + $0x128] sm:$0xff] }
  0xfc   : > { %1830 = vmatprep.subr.bf16.mxu0 %v5640_v0 }
  0xfd   : > { %v369_v12 = vpop.trf.xlu0  ;;  %v401_v28 = vpop.trf.xlu1 }
  0xfe   : > { %5762 = vmatmul.mubr.msk.bf16.gmra.mrb[8].mxu0 %vm435_vm0, %v369_v12  ;;  %v1498_v12 = vld [vmem:[#allocation8 + $0x1e0] sm:$0xff] }
  0xff   : > { %1831 = vmatpush1.bf16.msra.mxu0 %v5639_v63 }
 0x100   : > { %1832 = vmatprep.subr.bf16.mxu0 %v5648_v4 }
 0x101   : > { %v370_v13 = vpop.trf.xlu0  ;;  %v402_v29 = vpop.trf.xlu1 }
 0x102   : > { %5765 = vmatprep.mubr.msk.bf16.mxu0 %vm435_vm0, %v370_v13 }
 0x103   : > { %1833 = vmatpush1.bf16.msra.mxu0 %v5647_v3 }
 0x104   : > { %1834 = vmatprep.subr.bf16.mxu0 %v5656_v8 }
 0x105   : > { %v371_v14 = vpop.trf.xlu0  ;;  %v403_v30 = vpop.trf.xlu1 }
 0x106   : > { %5766 = vmatmul.mubr.msk.bf16.gmra.mrb[12].mxu0 %vm435_vm0, %v371_v14 }
 0x107   : > { %1835 = vmatpush1.bf16.msra.mxu0 %v5655_v7 }
 0x109   : > { %v380_v15 = vpop.trf.xlu0  ;;  %v412_v31 = vpop.trf.xlu1 }
 0x10a   : > { %5769 = vmatprep.mubr.msk.bf16.mxu0 %vm435_vm0, %v380_v15  ;;  %v5663_v15 = vcombine.low %v1494_v11, %v1498_v12 }
 0x10d   : > { %v381_v16 = vpop.trf.xlu0  ;;  %v413_v32 = vpop.trf.xlu1 }
 0x10e   : > { %5770 = vmatmul.mubr.msk.bf16.gmra.mrb[16].mxu0 %vm435_vm0, %v381_v16  ;;  %v5664_v16 = vcombine.high %v1494_v11, %v1498_v12 }
 0x110   : > { %1836 = vmatprep.subr.bf16.mxu0 %v5664_v16 }
 0x111   : > { %v382_v17 = vpop.trf.xlu0  ;;  %v414_v34 = vpop.trf.xlu1  ;;  %1837 = vmatpush1.bf16.msra.mxu0 %v5663_v15 }
 0x112   : > { %5773 = vmatprep.mubr.msk.bf16.mxu0 %vm435_vm0, %v382_v17 }
 0x115   : > { %v383_v19 = vpop.trf.xlu0  ;;  %v415_v36 = vpop.trf.xlu1 }
 0x116   : > { %5774 = vmatmul.mubr.msk.bf16.gmra.mrb[20].mxu0 %vm435_vm0, %v383_v19 }
 0x119   : > { %v384_v21 = vpop.trf.xlu0  ;;  %v416_v37 = vpop.trf.xlu1 }
 0x11a   : > { %5777 = vmatprep.mubr.msk.bf16.mxu0 %vm435_vm0, %v384_v21 }
 0x11d   : > { %v385_v23 = vpop.trf.xlu0  ;;  %v417_v38 = vpop.trf.xlu1 }
 0x11e   : > { %5778 = vmatmul.mubr.msk.bf16.gmra.mrb[24].mxu0 %vm435_vm0, %v385_v23 }
 0x121   : > { %v386_v24 = vpop.trf.xlu0  ;;  %v418_v39 = vpop.trf.xlu1 }
 0x122   : > { %5781 = vmatprep.mubr.msk.bf16.mxu0 %vm435_vm0, %v386_v24 }
 0x125   : > { %v387_v26 = vpop.trf.xlu0  ;;  %v419_v40 = vpop.trf.xlu1 }
 0x126   : > { %5782 = vmatmul.mubr.msk.bf16.gmra.mrb[28].mxu0 %vm435_vm0, %v387_v26  ;;  %v1447_v26 = vld [vmem:[#allocation8 + $0x48] sm:$0xff] }
 0x127   : > { %5785 = vmatprep.mubr.msk.bf16.mxu0 %vm435_vm0, %v396_v18 }
 0x12e   : > { %5786 = vmatmul.mubr.msk.bf16.gmra.mrb[32].mxu0 %vm435_vm0, %v397_v20 }
 0x12f   : > { %5789 = vmatprep.mubr.msk.bf16.mxu0 %vm435_vm0, %v398_v22 }
 0x136   : > { %5790 = vmatmul.mubr.msk.bf16.gmra.mrb[36].mxu0 %vm435_vm0, %v399_v25 }
 0x137   : > { %5793 = vmatprep.mubr.msk.bf16.mxu0 %vm435_vm0, %v400_v27  ;;  %v1451_v27 = vld [vmem:[#allocation8 + $0x68] sm:$0xff] }
 0x138   : > { %v5618_v33 = vcombine.high %v1447_v26, %v1451_v27  ;;  %v5617_v44 = vcombine.low %v1447_v26, %v1451_v27 }
 0x13e   : > { %5794 = vmatmul.mubr.msk.bf16.gmra.mrb[40].mxu0 %vm435_vm0, %v401_v28 }
 0x13f   : > { %5797 = vmatprep.mubr.msk.bf16.mxu0 %vm435_vm0, %v402_v29 }
 0x146   : > { %5798 = vmatmul.mubr.msk.bf16.gmra.mrb[44].mxu0 %vm435_vm0, %v403_v30 }
 0x147   : > { %5801 = vmatprep.mubr.msk.bf16.mxu0 %vm435_vm0, %v412_v31 }
 0x14e   : > { %5802 = vmatmul.mubr.msk.bf16.gmra.mrb[48].mxu0 %vm435_vm0, %v413_v32 }
 0x14f   : > { %5805 = vmatprep.mubr.msk.bf16.mxu0 %vm435_vm0, %v414_v34 }
 0x156   : > { %5806 = vmatmul.mubr.msk.bf16.gmra.mrb[52].mxu0 %vm435_vm0, %v415_v36  ;;  %v1455_v36 = vld [vmem:[#allocation8 + $0x88] sm:$0xff] }
 0x157   : > { %5809 = vmatprep.mubr.msk.bf16.mxu0 %vm435_vm0, %v416_v37  ;;  %v1459_v37 = vld [vmem:[#allocation8 + $0xa8] sm:$0xff] }
 0x158   : > { %v5626_v48 = vcombine.high %v1455_v36, %v1459_v37  ;;  %v5625_v55 = vcombine.low %v1455_v36, %v1459_v37 }
 0x15e   : > { %5810 = vmatmul.mubr.msk.bf16.gmra.mrb[56].mxu0 %vm435_vm0, %v417_v38 }
 0x15f   : > { %5813 = vmatprep.mubr.msk.bf16.mxu0 %vm435_vm0, %v418_v39 }
 0x166   : > { %5814 = vmatmul.mubr.msk.bf16.gmra.mrb[60].mxu0 %vm435_vm0, %v419_v40  ;;  %vm7021_vm0 = vmand %vm5220_vm13, %vm5221_vm14  ;;  %vm5236_vm13 = vcmask 1047559   ;;  %vm5237_vm14 = vsmask.f32 7424 }
 0x167   : > { %vm5223_vm3 = vmor %vm7021_vm0, %vm7017_vm15 }
 0x168   : > { %vm5238_vm0 = vmand %vm5236_vm13, %vm5237_vm14 }
 0x1c1   : > { %v5755_v10 = vpop.f32.mrb[0].mxu0 }
 0x1c2   : > { %v575_v13 = vadd.f32 %v5755_v10, %v6460_v9  ;;  %v566_v14 = vpop.f32.mrb[1].mxu0 }
 0x1c3   : > { %v567_v17 = vadd.f32 %v6460_v9, %v566_v14  ;;  %v5756_v18 = vpop.f32.mrb[2].mxu0  ;;  %v5650_v14 = vcombine.high %v1479_v5, %v1483_v6 }
 0x1c4   : > { %v578_v19 = vadd.f32 %v5756_v18, %v6460_v9  ;;  %v569_v20 = vpop.f32.mrb[3].mxu0  ;;  %v823_v22 = vmax.f32 %v575_v13, 0.0  ;;  %v1491_v18 = vld [vmem:[#allocation8 + $0x1a8] sm:$0xff] }
 0x1c5   : > { %v570_v21 = vadd.f32 %v6460_v9, %v569_v20  ;;  %v821_v24 = vmax.f32 %v567_v17, 0.0  ;;  %v1487_v17 = vld [vmem:[#allocation8 + $0x188] sm:$0xff] }
 0x1c6   : > { %v824_v23 = vmax.f32 %v578_v19, 0.0  ;;  %v5658_v26 = vcombine.high %v1487_v17, %v1491_v18 }
 0x1c7   : > { %v822_v25 = vmax.f32 %v570_v21, 0.0 }
 0x1c8   : > { %v886_v28 = vpack.c.bf16 %v824_v23, %v823_v22 }
 0x1c9   : > { %v5759_v29 = vpop.f32.mrb[4].mxu0  ;;  %v885_v30 = vpack.c.bf16 %v822_v25, %v821_v24  ;;  %v5649_v24 = vcombine.low %v1479_v5, %v1483_v6 }
 0x1ca   : > { %v591_v31 = vadd.f32 %v5759_v29, %v6460_v9  ;;  %v582_v32 = vpop.f32.mrb[5].mxu0  ;;  %v1499_v29 = vld [vmem:[#allocation8 + $0x1e8] sm:$0xff] }
 0x1cb   : > { %v583_v34 = vadd.f32 %v6460_v9, %v582_v32  ;;  %5825 = vmatprep.mubr.msk.bf16.mxu1 %vm956_vm1, %v885_v30  ;;  %v5760_v35 = vpop.f32.mrb[6].mxu0 }
 0x1cc   : > { %v827_v38 = vmax.f32 %v591_v31, 0.0  ;;  %v594_v39 = vadd.f32 %v5760_v35, %v6460_v9  ;;  %5826 = vmatmul.mubr.msk.bf16.vlgmr.msra.gmra.mrb[0].mxu1 %vm956_vm1, %v886_v28  ;;  %v585_v40 = vpop.f32.mrb[7].mxu0  ;;  %v1495_v28 = vld [vmem:[#allocation8 + $0x1c8] sm:$0xff] }
 0x1cd   : > { %v825_v41 = vmax.f32 %v583_v34, 0.0  ;;  %v586_v42 = vadd.f32 %v6460_v9, %v585_v40  ;;  %2176 = vmatpush1.bf16.msra.mxu1 %v5609_v47  ;;  %v1471_v47 = vld [vmem:[#allocation8 + $0x108] sm:$0xff]  ;;  %v5666_v36 = vcombine.high %v1495_v28, %v1499_v29 }
 0x1ce   : > { %v828_v45 = vmax.f32 %v594_v39, 0.0  ;;  %2177 = vmatprep.subr.bf16.mxu1 %v5618_v33  ;;  %v5642_v3 = vcombine.high %v1471_v47, %v1475_v59  ;;  %v5641_v11 = vcombine.low %v1471_v47, %v1475_v59  ;;  %v5657_v33 = vcombine.low %v1487_v17, %v1491_v18 }
 0x1cf   : > { %v826_v49 = vmax.f32 %v586_v42, 0.0 }
 0x1d0   : > { %v888_v52 = vpack.c.bf16 %v828_v45, %v827_v38  ;;  %v5665_v45 = vcombine.low %v1495_v28, %v1499_v29 }
 0x1d1   : > { %v887_v53 = vpack.c.bf16 %v826_v49, %v825_v41  ;;  %v5763_v54 = vpop.f32.mrb[8].mxu0  ;;  %2178 = vmatpush1.bf16.msra.mxu1 %v5617_v44 }
 0x1d2   : > { %v607_v56 = vadd.f32 %v5763_v54, %v6460_v9  ;;  %v598_v57 = vpop.f32.mrb[9].mxu0  ;;  %2179 = vmatprep.subr.bf16.mxu1 %v5626_v48 }
 0x1d3   : > { %5829 = vmatprep.mubr.msk.bf16.mxu1 %vm956_vm1, %v887_v53  ;;  %v599_v43 = vadd.f32 %v6460_v9, %v598_v57  ;;  %v5764_v46 = vpop.f32.mrb[10].mxu0 }
 0x1d4   : > { %5830 = vmatmul.mubr.msk.bf16.gmra.mrb[4].mxu1 %vm956_vm1, %v888_v52  ;;  %v831_v60 = vmax.f32 %v607_v56, 0.0  ;;  %v610_v61 = vadd.f32 %v5764_v46, %v6460_v9  ;;  %v601_v62 = vpop.f32.mrb[11].mxu0 }
 0x1d5   : > { %v829_v63 = vmax.f32 %v599_v43, 0.0  ;;  %v602_v0 = vadd.f32 %v6460_v9, %v601_v62  ;;  %2180 = vmatpush1.bf16.msra.mxu1 %v5625_v55 }
 0x1d6   : > { %v832_v2 = vmax.f32 %v610_v61, 0.0  ;;  %2181 = vmatprep.subr.bf16.mxu1 %v5634_v58 }
 0x1d7   : > { %v830_v4 = vmax.f32 %v602_v0, 0.0 }
 0x1d8   : > { %v890_v7 = vpack.c.bf16 %v832_v2, %v831_v60 }
 0x1d9   : > { %v889_v8 = vpack.c.bf16 %v830_v4, %v829_v63  ;;  %v5767_v10 = vpop.f32.mrb[12].mxu0  ;;  %2182 = vmatpush1.bf16.msra.mxu1 %v5633_v1 }
 0x1da   : > { %v623_v12 = vadd.f32 %v5767_v10, %v6460_v9  ;;  %v614_v13 = vpop.f32.mrb[13].mxu0  ;;  %2183 = vmatprep.subr.bf16.mxu1 %v5642_v3 }
 0x1db   : > { %5833 = vmatprep.mubr.msk.bf16.mxu1 %vm956_vm1, %v889_v8  ;;  %v615_v15 = vadd.f32 %v6460_v9, %v614_v13  ;;  %v5768_v16 = vpop.f32.mrb[14].mxu0 }
 0x1dc   : > { %5834 = vmatmul.mubr.msk.bf16.gmra.mrb[8].mxu1 %vm956_vm1, %v890_v7  ;;  %v835_v19 = vmax.f32 %v623_v12, 0.0  ;;  %v626_v20 = vadd.f32 %v5768_v16, %v6460_v9  ;;  %v617_v21 = vpop.f32.mrb[15].mxu0 }
 0x1dd   : > { %v833_v22 = vmax.f32 %v615_v15, 0.0  ;;  %v618_v23 = vadd.f32 %v6460_v9, %v617_v21  ;;  %2184 = vmatpush1.bf16.msra.mxu1 %v5641_v11 }
 0x1de   : > { %v836_v25 = vmax.f32 %v626_v20, 0.0  ;;  %2185 = vmatprep.subr.bf16.mxu1 %v5650_v14 }
 0x1df   : > { %v834_v27 = vmax.f32 %v618_v23, 0.0 }
 0x1e0   : > { %v892_v30 = vpack.c.bf16 %v836_v25, %v835_v19 }
 0x1e1   : > { %v891_v31 = vpack.c.bf16 %v834_v27, %v833_v22  ;;  %v5771_v32 = vpop.f32.mrb[16].mxu0  ;;  %2186 = vmatpush1.bf16.msra.mxu1 %v5649_v24 }
 0x1e2   : > { %v639_v34 = vadd.f32 %v5771_v32, %v6460_v9  ;;  %v630_v35 = vpop.f32.mrb[17].mxu0  ;;  %2187 = vmatprep.subr.bf16.mxu1 %v5658_v26 }
 0x1e3   : > { %5837 = vmatprep.mubr.msk.bf16.mxu1 %vm956_vm1, %v891_v31  ;;  %v631_v37 = vadd.f32 %v6460_v9, %v630_v35  ;;  %v5772_v38 = vpop.f32.mrb[18].mxu0 }
 0x1e4   : > { %5838 = vmatmul.mubr.msk.bf16.gmra.mrb[12].mxu1 %vm956_vm1, %v892_v30  ;;  %v839_v39 = vmax.f32 %v639_v34, 0.0  ;;  %v642_v40 = vadd.f32 %v5772_v38, %v6460_v9  ;;  %v633_v41 = vpop.f32.mrb[19].mxu0 }
 0x1e5   : > { %v837_v42 = vmax.f32 %v631_v37, 0.0  ;;  %v634_v44 = vadd.f32 %v6460_v9, %v633_v41  ;;  %2188 = vmatpush1.bf16.msra.mxu1 %v5657_v33 }
 0x1e6   : > { %v840_v48 = vmax.f32 %v642_v40, 0.0  ;;  %2189 = vmatprep.subr.bf16.mxu1 %v5666_v36 }
 0x1e7   : > { %v838_v49 = vmax.f32 %v634_v44, 0.0 }
 0x1e8   : > { %v894_v50 = vpack.c.bf16 %v840_v48, %v839_v39 }
 0x1e9   : > { %v893_v51 = vpack.c.bf16 %v838_v49, %v837_v42  ;;  %v5775_v52 = vpop.f32.mrb[20].mxu0  ;;  %2190 = vmatpush1.bf16.msra.mxu1 %v5665_v45 }
 0x1ea   : > { %v655_v53 = vadd.f32 %v5775_v52, %v6460_v9  ;;  %v646_v54 = vpop.f32.mrb[21].mxu0 }
 0x1eb   : > { %5841 = vmatprep.mubr.msk.bf16.mxu1 %vm956_vm1, %v893_v51  ;;  %v647_v55 = vadd.f32 %v6460_v9, %v646_v54  ;;  %v5776_v56 = vpop.f32.mrb[22].mxu0 }
 0x1ec   : > { %5842 = vmatmul.mubr.msk.bf16.gmra.mrb[16].mxu1 %vm956_vm1, %v894_v50  ;;  %v843_v57 = vmax.f32 %v655_v53, 0.0  ;;  %v658_v58 = vadd.f32 %v5776_v56, %v6460_v9  ;;  %v649_v43 = vpop.f32.mrb[23].mxu0 }
 0x1ed   : > { %v841_v46 = vmax.f32 %v647_v55, 0.0  ;;  %v650_v47 = vadd.f32 %v6460_v9, %v649_v43 }
 0x1ee   : > { %v844_v59 = vmax.f32 %v658_v58, 0.0 }
 0x1ef   : > { %v842_v60 = vmax.f32 %v650_v47, 0.0 }
 0x1f0   : > { %v896_v61 = vpack.c.bf16 %v844_v59, %v843_v57 }
 0x1f1   : > { %v895_v62 = vpack.c.bf16 %v842_v60, %v841_v46  ;;  %v5779_v63 = vpop.f32.mrb[24].mxu0 }
 0x1f2   : > { %v671_v0 = vadd.f32 %v5779_v63, %v6460_v9  ;;  %v662_v1 = vpop.f32.mrb[25].mxu0 }
 0x1f3   : > { %5845 = vmatprep.mubr.msk.bf16.mxu1 %vm956_vm1, %v895_v62  ;;  %v663_v2 = vadd.f32 %v6460_v9, %v662_v1  ;;  %v5780_v3 = vpop.f32.mrb[26].mxu0 }
 0x1f4   : > { %5846 = vmatmul.mubr.msk.bf16.gmra.mrb[20].mxu1 %vm956_vm1, %v896_v61  ;;  %v847_v4 = vmax.f32 %v671_v0, 0.0  ;;  %v674_v5 = vadd.f32 %v5780_v3, %v6460_v9  ;;  %v665_v6 = vpop.f32.mrb[27].mxu0 }
 0x1f5   : > { %v845_v7 = vmax.f32 %v663_v2, 0.0  ;;  %v666_v8 = vadd.f32 %v6460_v9, %v665_v6 }
 0x1f6   : > { %v848_v10 = vmax.f32 %v674_v5, 0.0 }
 0x1f7   : > { %v846_v11 = vmax.f32 %v666_v8, 0.0 }
 0x1f8   : > { %v898_v12 = vpack.c.bf16 %v848_v10, %v847_v4 }
 0x1f9   : > { %v897_v13 = vpack.c.bf16 %v846_v11, %v845_v7  ;;  %v5783_v14 = vpop.f32.mrb[28].mxu0 }
 0x1fa   : > { %v687_v15 = vadd.f32 %v5783_v14, %v6460_v9  ;;  %v678_v16 = vpop.f32.mrb[29].mxu0 }
 0x1fb   : > { %5849 = vmatprep.mubr.msk.bf16.mxu1 %vm956_vm1, %v897_v13  ;;  %v679_v17 = vadd.f32 %v6460_v9, %v678_v16  ;;  %v5784_v18 = vpop.f32.mrb[30].mxu0 }
 0x1fc   : > { %5850 = vmatmul.mubr.msk.bf16.gmra.mrb[24].mxu1 %vm956_vm1, %v898_v12  ;;  %v851_v19 = vmax.f32 %v687_v15, 0.0  ;;  %v690_v20 = vadd.f32 %v5784_v18, %v6460_v9  ;;  %v681_v21 = vpop.f32.mrb[31].mxu0 }
 0x1fd   : > { %v849_v22 = vmax.f32 %v679_v17, 0.0  ;;  %v682_v23 = vadd.f32 %v6460_v9, %v681_v21 }
 0x1fe   : > { %v852_v24 = vmax.f32 %v690_v20, 0.0 }
 0x1ff   : > { %v850_v25 = vmax.f32 %v682_v23, 0.0 }
 0x200   : > { %v900_v26 = vpack.c.bf16 %v852_v24, %v851_v19 }
 0x201   : > { %v899_v27 = vpack.c.bf16 %v850_v25, %v849_v22  ;;  %v5787_v28 = vpop.f32.mrb[32].mxu0 }
 0x202   : > { %v703_v29 = vadd.f32 %v5787_v28, %v6460_v9  ;;  %v694_v30 = vpop.f32.mrb[33].mxu0 }
 0x203   : > { %5853 = vmatprep.mubr.msk.bf16.mxu1 %vm956_vm1, %v899_v27  ;;  %v695_v31 = vadd.f32 %v6460_v9, %v694_v30  ;;  %v5788_v32 = vpop.f32.mrb[34].mxu0 }
 0x204   : > { %5854 = vmatmul.mubr.msk.bf16.gmra.mrb[28].mxu1 %vm956_vm1, %v900_v26  ;;  %v855_v33 = vmax.f32 %v703_v29, 0.0  ;;  %v706_v34 = vadd.f32 %v5788_v32, %v6460_v9  ;;  %v697_v35 = vpop.f32.mrb[35].mxu0 }
 0x205   : > { %v853_v36 = vmax.f32 %v695_v31, 0.0  ;;  %v698_v37 = vadd.f32 %v6460_v9, %v697_v35 }
 0x206   : > { %v856_v38 = vmax.f32 %v706_v34, 0.0  ;;  %v6178_v34 = vmov 0  }
 0x207   : > { %v854_v39 = vmax.f32 %v698_v37, 0.0  ;;  %1854 = vmatprep.mubr.bf16.mxu0 %v6178_v34 }
 0x208   : > { %v902_v40 = vpack.c.bf16 %v856_v38, %v855_v33 }
 0x209   : > { %v901_v41 = vpack.c.bf16 %v854_v39, %v853_v36  ;;  %v5791_v42 = vpop.f32.mrb[36].mxu0  ;;  %v6543_v39 = vld [vmem:[#allocation8 + $0x10] sm:$0xff] }
 0x20a   : > { %v719_v44 = vadd.f32 %v5791_v42, %v6460_v9  ;;  %v710_v45 = vpop.f32.mrb[37].mxu0 }
 0x20b   : > { %5857 = vmatprep.mubr.msk.bf16.mxu1 %vm956_vm1, %v901_v41  ;;  %v711_v48 = vadd.f32 %v6460_v9, %v710_v45  ;;  %v5792_v49 = vpop.f32.mrb[38].mxu0  ;;  %v6547_v41 = vld [vmem:[#allocation8 + $0x18] sm:$0xff] }
 0x20c   : > { %5858 = vmatmul.mubr.msk.bf16.gmra.mrb[32].mxu1 %vm956_vm1, %v902_v40  ;;  %v859_v50 = vmax.f32 %v719_v44, 0.0  ;;  %v722_v51 = vadd.f32 %v5792_v49, %v6460_v9  ;;  %v713_v52 = vpop.f32.mrb[39].mxu0  ;;  %v6545_v40 = vld [vmem:[#allocation8 + $0x30] sm:$0xff]  ;;  %v6555_v49 = vld [vmem:[#allocation8 + $0x38] sm:$0xff] }
 0x20d   : > { %v857_v53 = vmax.f32 %v711_v48, 0.0  ;;  %v714_v54 = vadd.f32 %v6460_v9, %v713_v52  ;;  %v5611_v45 = vcombine.low %v6543_v39, %v6545_v40  ;;  %v5612_v48 = vcombine.high %v6543_v39, %v6545_v40  ;;  %v1464_v40 = vld [vmem:[#allocation8 + $0xd0] sm:$0xff] }
 0x20e   : > { %v860_v55 = vmax.f32 %v722_v51, 0.0 }
 0x20f   : > { %v858_v56 = vmax.f32 %v714_v54, 0.0  ;;  %v5614_v54 = vcombine.high %v6547_v41, %v6555_v49  ;;  %2528 = vmatprep.subr.bf16.mxu0 %v5612_v48 }
 0x210   : > { %v904_v57 = vpack.c.bf16 %v860_v55, %v859_v50 }
 0x211   : > { %v903_v58 = vpack.c.bf16 %v858_v56, %v857_v53  ;;  %v5795_v43 = vpop.f32.mrb[40].mxu0  ;;  %v5613_v53 = vcombine.low %v6547_v41, %v6555_v49  ;;  %2881 = vmatprep.subr.bf16.mxu1 %v5614_v54  ;;  %v1465_v49 = vld [vmem:[#allocation8 + $0xd8] sm:$0xff] }
 0x212   : > { %v735_v46 = vadd.f32 %v5795_v43, %v6460_v9  ;;  %v726_v47 = vpop.f32.mrb[41].mxu0 }
 0x213   : > { %5861 = vmatprep.mubr.msk.bf16.mxu1 %vm956_vm1, %v903_v58  ;;  %v727_v59 = vadd.f32 %v6460_v9, %v726_v47  ;;  %v5796_v60 = vpop.f32.mrb[42].mxu0 }
 0x214   : > { %5862 = vmatmul.mubr.msk.bf16.gmra.mrb[36].mxu1 %vm956_vm1, %v904_v57  ;;  %v863_v61 = vmax.f32 %v735_v46, 0.0  ;;  %v738_v62 = vadd.f32 %v5796_v60, %v6460_v9  ;;  %v729_v63 = vpop.f32.mrb[43].mxu0 }
 0x215   : > { %v861_v0 = vmax.f32 %v727_v59, 0.0  ;;  %v730_v1 = vadd.f32 %v6460_v9, %v729_v63 }
 0x216   : > { %v864_v2 = vmax.f32 %v738_v62, 0.0 }
 0x217   : > { %v862_v3 = vmax.f32 %v730_v1, 0.0 }
 0x218   : > { %v906_v4 = vpack.c.bf16 %v864_v2, %v863_v61 }
 0x219   : > { %v905_v5 = vpack.c.bf16 %v862_v3, %v861_v0  ;;  %v5799_v6 = vpop.f32.mrb[44].mxu0 }
 0x21a   : > { %v751_v7 = vadd.f32 %v5799_v6, %v6460_v9  ;;  %v742_v8 = vpop.f32.mrb[45].mxu0 }
 0x21b   : > { %5865 = vmatprep.mubr.msk.bf16.mxu1 %vm956_vm1, %v905_v5  ;;  %v743_v10 = vadd.f32 %v6460_v9, %v742_v8  ;;  %v5800_v11 = vpop.f32.mrb[46].mxu0 }
 0x21c   : > { %5866 = vmatmul.mubr.msk.bf16.gmra.mrb[40].mxu1 %vm956_vm1, %v906_v4  ;;  %v867_v12 = vmax.f32 %v751_v7, 0.0  ;;  %v754_v13 = vadd.f32 %v5800_v11, %v6460_v9  ;;  %v745_v14 = vpop.f32.mrb[47].mxu0 }
 0x21d   : > { %v865_v15 = vmax.f32 %v743_v10, 0.0  ;;  %v746_v16 = vadd.f32 %v6460_v9, %v745_v14 }
 0x21e   : > { %v868_v17 = vmax.f32 %v754_v13, 0.0 }
 0x21f   : > { %v866_v18 = vmax.f32 %v746_v16, 0.0 }
 0x220   : > { %v908_v19 = vpack.c.bf16 %v868_v17, %v867_v12 }
 0x221   : > { %v907_v20 = vpack.c.bf16 %v866_v18, %v865_v15  ;;  %v5803_v21 = vpop.f32.mrb[48].mxu0 }
 0x222   : > { %v767_v22 = vadd.f32 %v5803_v21, %v6460_v9  ;;  %v758_v23 = vpop.f32.mrb[49].mxu0 }
 0x223   : > { %5869 = vmatprep.mubr.msk.bf16.mxu1 %vm956_vm1, %v907_v20  ;;  %v759_v24 = vadd.f32 %v6460_v9, %v758_v23  ;;  %v5804_v25 = vpop.f32.mrb[50].mxu0  ;;  %v6582_v23 = vld [vmem:[%s7098_s4] ss:$0 sm:$0xff] }
 0x224   : > { %5870 = vmatmul.mubr.msk.bf16.gmra.mrb[44].mxu1 %vm956_vm1, %v908_v19  ;;  %v871_v26 = vmax.f32 %v767_v22, 0.0  ;;  %v770_v27 = vadd.f32 %v5804_v25, %v6460_v9  ;;  %v761_v28 = vpop.f32.mrb[51].mxu0 }
 0x225   : > { %v869_v29 = vmax.f32 %v759_v24, 0.0  ;;  %v762_v30 = vadd.f32 %v6460_v9, %v761_v28 }
 0x226   : > { %v872_v31 = vmax.f32 %v770_v27, 0.0 }
 0x227   : > { %v870_v32 = vmax.f32 %v762_v30, 0.0 }
 0x228   : > { %v910_v33 = vpack.c.bf16 %v872_v31, %v871_v26 }
 0x229   : > { %v909_v35 = vpack.c.bf16 %v870_v32, %v869_v29  ;;  %v5807_v36 = vpop.f32.mrb[52].mxu0 }
 0x22a   : > { %v783_v37 = vadd.f32 %v5807_v36, %v6460_v9  ;;  %v774_v38 = vpop.f32.mrb[53].mxu0 }
 0x22b   : > { %v775_v42 = vadd.f32 %v6460_v9, %v774_v38  ;;  %v5808_v44 = vpop.f32.mrb[54].mxu0  ;;  %5873 = vmatprep.mubr.msk.bf16.mxu1 %vm956_vm1, %v909_v35  ;;  %v1449_v38 = vld [vmem:[#allocation8 + $0x58] sm:$0xff] }
 0x22c   : > { %v875_v50 = vmax.f32 %v783_v37, 0.0  ;;  %v786_v51 = vadd.f32 %v5808_v44, %v6460_v9  ;;  %v777_v52 = vpop.f32.mrb[55].mxu0  ;;  %5874 = vmatmul.mubr.msk.bf16.gmra.mrb[48].mxu1 %vm956_vm1, %v910_v33  ;;  %v1448_v33 = vld [vmem:[#allocation8 + $0x50] sm:$0xff] }
 0x22d   : > { %v873_v55 = vmax.f32 %v775_v42, 0.0  ;;  %v778_v56 = vadd.f32 %v6460_v9, %v777_v52  ;;  %v1452_v37 = vld [vmem:[#allocation8 + $0x70] sm:$0xff]  ;;  %v1453_v42 = vld [vmem:[#allocation8 + $0x78] sm:$0xff] }
 0x22e   : > { %v876_v57 = vmax.f32 %v786_v51, 0.0  ;;  %v1456_v51 = vld [vmem:[#allocation8 + $0x90] sm:$0xff] }
 0x22f   : > { %v874_v58 = vmax.f32 %v778_v56, 0.0  ;;  %v5622_v56 = vcombine.high %v1449_v38, %v1453_v42 }
 0x230   : > { %v912_v43 = vpack.c.bf16 %v876_v57, %v875_v50  ;;  %v1460_v57 = vld [vmem:[#allocation8 + $0xb0] sm:$0xff] }
 0x231   : > { %v911_v46 = vpack.c.bf16 %v874_v58, %v873_v55  ;;  %v5811_v47 = vpop.f32.mrb[56].mxu0  ;;  %v5620_v55 = vcombine.high %v1448_v33, %v1452_v37  ;;  %v1457_v58 = vld [vmem:[#allocation8 + $0x98] sm:$0xff] }
 0x232   : > { %v799_v59 = vadd.f32 %v5811_v47, %v6460_v9  ;;  %v790_v60 = vpop.f32.mrb[57].mxu0 }
 0x233   : > { %v791_v61 = vadd.f32 %v6460_v9, %v790_v60  ;;  %v5812_v62 = vpop.f32.mrb[58].mxu0  ;;  %5877 = vmatprep.mubr.msk.bf16.mxu1 %vm956_vm1, %v911_v46 }
 0x234   : > { %v879_v63 = vmax.f32 %v799_v59, 0.0  ;;  %v802_v0 = vadd.f32 %v5812_v62, %v6460_v9  ;;  %v793_v1 = vpop.f32.mrb[59].mxu0  ;;  %5878 = vmatmul.mubr.msk.bf16.gmra.mrb[52].mxu1 %vm956_vm1, %v912_v43  ;;  %v1461_v43 = vld [vmem:[#allocation8 + $0xb8] sm:$0xff]  ;;  %v5619_v62 = vcombine.low %v1448_v33, %v1452_v37 }
 0x235   : > { %v877_v2 = vmax.f32 %v791_v61, 0.0  ;;  %v794_v3 = vadd.f32 %v6460_v9, %v793_v1 }
 0x236   : > { %v880_v4 = vmax.f32 %v802_v0, 0.0 }
 0x237   : > { %v878_v5 = vmax.f32 %v794_v3, 0.0  ;;  %v5630_v3 = vcombine.high %v1457_v58, %v1461_v43 }
 0x238   : > { %v914_v6 = vpack.c.bf16 %v880_v4, %v879_v63  ;;  %v5621_v63 = vcombine.low %v1449_v38, %v1453_v42 }
 0x239   : > { %v913_v7 = vpack.c.bf16 %v878_v5, %v877_v2  ;;  %v5815_v8 = vpop.f32.mrb[60].mxu0  ;;  %v5628_v2 = vcombine.high %v1456_v51, %v1460_v57 }
 0x23a   : > { %v815_v10 = vadd.f32 %v5815_v8, %v6460_v9  ;;  %v806_v11 = vpop.f32.mrb[61].mxu0  ;;  %v5629_v8 = vcombine.low %v1457_v58, %v1461_v43 }
 0x23b   : > { %v807_v12 = vadd.f32 %v6460_v9, %v806_v11  ;;  %v5816_v13 = vpop.f32.mrb[62].mxu0  ;;  %5881 = vmatprep.mubr.msk.bf16.mxu1 %vm956_vm1, %v913_v7  ;;  %v5627_v7 = vcombine.low %v1456_v51, %v1460_v57 }
 0x23c   : > { %v883_v14 = vmax.f32 %v815_v10, 0.0  ;;  %v818_v15 = vadd.f32 %v5816_v13, %v6460_v9  ;;  %v809_v16 = vpop.f32.mrb[63].mxu0  ;;  %5882 = vmatmul.mubr.msk.bf16.gmra.mrb[56].mxu1 %vm956_vm1, %v914_v6 }
 0x23d   : > { %v881_v17 = vmax.f32 %v807_v12, 0.0  ;;  %v810_v18 = vadd.f32 %v6460_v9, %v809_v16 }
 0x23e   : > { %v884_v19 = vmax.f32 %v818_v15, 0.0 }
 0x23f   : > { %v882_v20 = vmax.f32 %v810_v18, 0.0  ;;  %v1473_v18 = vld [vmem:[#allocation8 + $0x118] sm:$0xff] }
 0x240   : > { %v916_v21 = vpack.c.bf16 %v884_v19, %v883_v14  ;;  %v1472_v14 = vld [vmem:[#allocation8 + $0x110] sm:$0xff]  ;;  %v1477_v19 = vld [vmem:[#allocation8 + $0x138] sm:$0xff] }
 0x241   : > { %v915_v22 = vpack.c.bf16 %v882_v20, %v881_v17  ;;  %v1476_v17 = vld [vmem:[#allocation8 + $0x130] sm:$0xff] }
 0x243   : > { %5885 = vmatprep.mubr.msk.bf16.mxu1 %vm956_vm1, %v915_v22 }
 0x244   : > { %5886 = vmatmul.mubr.msk.bf16.gmra.mrb[60].mxu1 %vm956_vm1, %v916_v21  ;;  %vm5224_vm1 = vcmask 1044484  }
 0x245   : > { %2207 = vmatprep.mubr.bf16.mxu1 %v6178_v34 }
 0x29f   : > { %v5827_v24 = vpop.f32.mrb[0].mxu1 }
 0x2a0   : > { %v1096_v25 = vadd.f32 %v5827_v24, %v6582_v23  ;;  %v1087_v26 = vpop.f32.mrb[1].mxu1 }
 0x2a1   : > { %v1088_v9 = vadd.f32 %v6582_v23, %v1087_v26  ;;  %v5828_v27 = vpop.f32.mrb[2].mxu1 }
 0x2a2   : > { %v1099_v28 = vadd.f32 %v5828_v27, %v6582_v23  ;;  %v1090_v29 = vpop.f32.mrb[3].mxu1  ;;  %v1344_v31 = vmax.f32 %v1096_v25, 0.0 }
 0x2a3   : > { %v1091_v30 = vadd.f32 %v6582_v23, %v1090_v29  ;;  %v1342_v35 = vmax.f32 %v1088_v9, 0.0  ;;  %v5646_v29 = vcombine.high %v1473_v18, %v1477_v19 }
 0x2a4   : > { %v1345_v32 = vmax.f32 %v1099_v28, 0.0  ;;  %v5644_v28 = vcombine.high %v1472_v14, %v1476_v17 }
 0x2a5   : > { %v1343_v36 = vmax.f32 %v1091_v30, 0.0 }
 0x2a6   : > { %v6588_v44 = vpack.c.bf16 %v1345_v32, %v1344_v31 }
 0x2a7   : > { %v6590_v48 = vpack.c.bf16 %v1343_v36, %v1342_v35  ;;  %v5831_v50 = vpop.f32.mrb[4].mxu1  ;;  %v5643_v35 = vcombine.low %v1472_v14, %v1476_v17  ;;  %v5645_v36 = vcombine.low %v1473_v18, %v1477_v19 }
 0x2a8   : > { %v1112_v52 = vadd.f32 %v5831_v50, %v6582_v23  ;;  %v1103_v54 = vpop.f32.mrb[5].mxu1 }
 0x2a9   : > { %v1104_v46 = vadd.f32 %v6582_v23, %v1103_v54  ;;  %1855 = vmatmul.mubr.bf16.vlgmr.msra.gmra.mrb[64].mxu0 %v6590_v48  ;;  %2208 = vmatmul.mubr.bf16.vlgmr.msra.gmra.mrb[64].mxu1 %v6590_v48  ;;  %v5832_v47 = vpop.f32.mrb[6].mxu1 }
 0x2aa   : > { %v1348_v59 = vmax.f32 %v1112_v52, 0.0  ;;  %2529 = vmatpush1.bf16.msra.mxu0 %v5611_v45  ;;  %2882 = vmatpush1.bf16.msra.mxu1 %v5613_v53  ;;  %v1115_v60 = vadd.f32 %v5832_v47, %v6582_v23  ;;  %v1106_v61 = vpop.f32.mrb[7].mxu1  ;;  %v1468_v45 = vld [vmem:[#allocation8 + $0xf0] sm:$0xff]  ;;  %v1469_v53 = vld [vmem:[#allocation8 + $0xf8] sm:$0xff] }
 0x2ab   : > { %v1346_v0 = vmax.f32 %v1104_v46, 0.0  ;;  %v1107_v1 = vadd.f32 %v6582_v23, %v1106_v61  ;;  %1864 = vmatprep.mubr.bf16.mxu0 %v6178_v34  ;;  %2217 = vmatprep.mubr.bf16.mxu1 %v6178_v34  ;;  %v5636_v12 = vcombine.high %v1464_v40, %v1468_v45  ;;  %v5638_v13 = vcombine.high %v1465_v49, %v1469_v53 }
 0x2ac   : > { %v1349_v39 = vmax.f32 %v1115_v60, 0.0  ;;  %2530 = vmatprep.subr.bf16.mxu0 %v5620_v55  ;;  %2883 = vmatprep.subr.bf16.mxu1 %v5622_v56  ;;  %v5635_v26 = vcombine.low %v1464_v40, %v1468_v45  ;;  %v5637_v9 = vcombine.low %v1465_v49, %v1469_v53  ;;  %v1485_v53 = vld [vmem:[#allocation8 + $0x178] sm:$0xff] }
 0x2ad   : > { %v1347_v41 = vmax.f32 %v1107_v1, 0.0 }
 0x2ae   : > { %v6606_v4 = vpack.c.bf16 %v1349_v39, %v1348_v59  ;;  %2531 = vmatpush1.bf16.msra.mxu0 %v5619_v62  ;;  %2884 = vmatpush1.bf16.msra.mxu1 %v5621_v63  ;;  %v1481_v39 = vld [vmem:[#allocation8 + $0x158] sm:$0xff] }
 0x2af   : > { %v6608_v5 = vpack.c.bf16 %v1347_v41, %v1346_v0  ;;  %v5835_v6 = vpop.f32.mrb[8].mxu1  ;;  %2532 = vmatprep.subr.bf16.mxu0 %v5628_v2  ;;  %2885 = vmatprep.subr.bf16.mxu1 %v5630_v3  ;;  %v1480_v2 = vld [vmem:[#allocation8 + $0x150] sm:$0xff] }
 0x2b0   : > { %v1128_v10 = vadd.f32 %v5835_v6, %v6582_v23  ;;  %v1119_v11 = vpop.f32.mrb[9].mxu1  ;;  %v1484_v3 = vld [vmem:[#allocation8 + $0x170] sm:$0xff] }
 0x2b1   : > { %1865 = vmatmul.mubr.bf16.gmra.mrb[68].mxu0 %v6588_v44  ;;  %2218 = vmatmul.mubr.bf16.gmra.mrb[68].mxu1 %v6588_v44  ;;  %v1120_v15 = vadd.f32 %v6582_v23, %v1119_v11  ;;  %v5836_v16 = vpop.f32.mrb[10].mxu1  ;;  %v5651_v45 = vcombine.low %v1480_v2, %v1484_v3  ;;  %v5652_v49 = vcombine.high %v1480_v2, %v1484_v3 }
 0x2b2   : > { %v1352_v20 = vmax.f32 %v1128_v10, 0.0  ;;  %1874 = vmatprep.mubr.bf16.mxu0 %v6178_v34  ;;  %2227 = vmatprep.mubr.bf16.mxu1 %v6178_v34  ;;  %v1131_v21 = vadd.f32 %v5836_v16, %v6582_v23  ;;  %v1122_v22 = vpop.f32.mrb[11].mxu1 }
 0x2b3   : > { %v1350_v24 = vmax.f32 %v1120_v15, 0.0  ;;  %v1123_v25 = vadd.f32 %v6582_v23, %v1122_v22  ;;  %2533 = vmatpush1.bf16.msra.mxu0 %v5627_v7  ;;  %2886 = vmatpush1.bf16.msra.mxu1 %v5629_v8  ;;  %v5653_v7 = vcombine.low %v1481_v39, %v1485_v53  ;;  %v5654_v8 = vcombine.high %v1481_v39, %v1485_v53 }
 0x2b4   : > { %v1353_v27 = vmax.f32 %v1131_v21, 0.0  ;;  %2534 = vmatprep.subr.bf16.mxu0 %v5636_v12  ;;  %2887 = vmatprep.subr.bf16.mxu1 %v5638_v13 }
 0x2b5   : > { %v1351_v30 = vmax.f32 %v1123_v25, 0.0 }
 0x2b6   : > { %v6618_v31 = vpack.c.bf16 %v1353_v27, %v1352_v20 }
 0x2b7   : > { %v6620_v32 = vpack.c.bf16 %v1351_v30, %v1350_v24  ;;  %v5839_v33 = vpop.f32.mrb[12].mxu1  ;;  %2535 = vmatpush1.bf16.msra.mxu0 %v5635_v26  ;;  %2888 = vmatpush1.bf16.msra.mxu1 %v5637_v9 }
 0x2b8   : > { %v1144_v37 = vadd.f32 %v5839_v33, %v6582_v23  ;;  %v1135_v38 = vpop.f32.mrb[13].mxu1  ;;  %2536 = vmatprep.subr.bf16.mxu0 %v5644_v28  ;;  %2889 = vmatprep.subr.bf16.mxu1 %v5646_v29 }
 0x2b9   : > { %1875 = vmatmul.mubr.bf16.gmra.mrb[72].mxu0 %v6608_v5  ;;  %2228 = vmatmul.mubr.bf16.gmra.mrb[72].mxu1 %v6608_v5  ;;  %v1136_v42 = vadd.f32 %v6582_v23, %v1135_v38  ;;  %v5840_v50 = vpop.f32.mrb[14].mxu1 }
 0x2ba   : > { %1884 = vmatprep.mubr.bf16.mxu0 %v6178_v34  ;;  %2237 = vmatprep.mubr.bf16.mxu1 %v6178_v34  ;;  %v1356_v51 = vmax.f32 %v1144_v37, 0.0  ;;  %v1147_v52 = vadd.f32 %v5840_v50, %v6582_v23  ;;  %v1138_v54 = vpop.f32.mrb[15].mxu1 }
 0x2bb   : > { %v1354_v55 = vmax.f32 %v1136_v42, 0.0  ;;  %v1139_v56 = vadd.f32 %v6582_v23, %v1138_v54  ;;  %2537 = vmatpush1.bf16.msra.mxu0 %v5643_v35  ;;  %2890 = vmatpush1.bf16.msra.mxu1 %v5645_v36 }
 0x2bc   : > { %v1357_v57 = vmax.f32 %v1147_v52, 0.0  ;;  %2538 = vmatprep.subr.bf16.mxu0 %v5652_v49  ;;  %2891 = vmatprep.subr.bf16.mxu1 %v5654_v8  ;;  %v1488_v8 = vld [vmem:[#allocation8 + $0x190] sm:$0xff] }
 0x2bd   : > { %v1355_v58 = vmax.f32 %v1139_v56, 0.0 }
 0x2be   : > { %v6630_v43 = vpack.c.bf16 %v1357_v57, %v1356_v51 }
 0x2bf   : > { %v6632_v46 = vpack.c.bf16 %v1355_v58, %v1354_v55  ;;  %v5843_v47 = vpop.f32.mrb[16].mxu1  ;;  %2539 = vmatpush1.bf16.msra.mxu0 %v5651_v45  ;;  %2892 = vmatpush1.bf16.msra.mxu1 %v5653_v7 }
 0x2c0   : > { %v1160_v59 = vadd.f32 %v5843_v47, %v6582_v23  ;;  %v1151_v60 = vpop.f32.mrb[17].mxu1 }
 0x2c1   : > { %1885 = vmatmul.mubr.bf16.gmra.mrb[76].mxu0 %v6606_v4  ;;  %2238 = vmatmul.mubr.bf16.gmra.mrb[76].mxu1 %v6606_v4  ;;  %v1152_v61 = vadd.f32 %v6582_v23, %v1151_v60  ;;  %v5844_v62 = vpop.f32.mrb[18].mxu1 }
 0x2c2   : > { %1894 = vmatprep.mubr.bf16.mxu0 %v6178_v34  ;;  %2247 = vmatprep.mubr.bf16.mxu1 %v6178_v34  ;;  %v1360_v63 = vmax.f32 %v1160_v59, 0.0  ;;  %v1163_v0 = vadd.f32 %v5844_v62, %v6582_v23  ;;  %v1154_v1 = vpop.f32.mrb[19].mxu1 }
 0x2c3   : > { %v1358_v40 = vmax.f32 %v1152_v61, 0.0  ;;  %v1155_v41 = vadd.f32 %v6582_v23, %v1154_v1 }
 0x2c4   : > { %v1361_v6 = vmax.f32 %v1163_v0, 0.0 }
 0x2c5   : > { %v1359_v10 = vmax.f32 %v1155_v41, 0.0 }
 0x2c6   : > { %v6642_v11 = vpack.c.bf16 %v1361_v6, %v1360_v63 }
 0x2c7   : > { %v6644_v12 = vpack.c.bf16 %v1359_v10, %v1358_v40  ;;  %v5847_v13 = vpop.f32.mrb[20].mxu1  ;;  %v1492_v10 = vld [vmem:[#allocation8 + $0x1b0] sm:$0xff] }
 0x2c8   : > { %v1176_v14 = vadd.f32 %v5847_v13, %v6582_v23  ;;  %v1167_v15 = vpop.f32.mrb[21].mxu1  ;;  %v1489_v13 = vld [vmem:[#allocation8 + $0x198] sm:$0xff] }
 0x2c9   : > { %1895 = vmatmul.mubr.bf16.gmra.mrb[80].mxu0 %v6620_v32  ;;  %2248 = vmatmul.mubr.bf16.gmra.mrb[80].mxu1 %v6620_v32  ;;  %v1168_v16 = vadd.f32 %v6582_v23, %v1167_v15  ;;  %v5848_v17 = vpop.f32.mrb[22].mxu1 }
 0x2ca   : > { %1904 = vmatprep.mubr.bf16.mxu0 %v6178_v34  ;;  %2257 = vmatprep.mubr.bf16.mxu1 %v6178_v34  ;;  %v1364_v18 = vmax.f32 %v1176_v14, 0.0  ;;  %v1179_v19 = vadd.f32 %v5848_v17, %v6582_v23  ;;  %v1170_v20 = vpop.f32.mrb[23].mxu1  ;;  %v5660_v17 = vcombine.high %v1488_v8, %v1492_v10 }
 0x2cb   : > { %v1362_v21 = vmax.f32 %v1168_v16, 0.0  ;;  %v1171_v22 = vadd.f32 %v6582_v23, %v1170_v20  ;;  %v5659_v16 = vcombine.low %v1488_v8, %v1492_v10 }
 0x2cc   : > { %v1365_v24 = vmax.f32 %v1179_v19, 0.0  ;;  %2540 = vmatprep.subr.bf16.mxu0 %v5660_v17 }
 0x2cd   : > { %v1363_v25 = vmax.f32 %v1171_v22, 0.0  ;;  %2541 = vmatpush1.bf16.msra.mxu0 %v5659_v16 }
 0x2ce   : > { %v6654_v26 = vpack.c.bf16 %v1365_v24, %v1364_v18  ;;  %v1493_v18 = vld [vmem:[#allocation8 + $0x1b8] sm:$0xff] }
 0x2cf   : > { %v6656_v9 = vpack.c.bf16 %v1363_v25, %v1362_v21  ;;  %v5851_v27 = vpop.f32.mrb[24].mxu1  ;;  %v5661_v20 = vcombine.low %v1489_v13, %v1493_v18  ;;  %v5662_v21 = vcombine.high %v1489_v13, %v1493_v18 }
 0x2d0   : > { %v1192_v28 = vadd.f32 %v5851_v27, %v6582_v23  ;;  %v1183_v29 = vpop.f32.mrb[25].mxu1 }
 0x2d1   : > { %1905 = vmatmul.mubr.bf16.gmra.mrb[84].mxu0 %v6618_v31  ;;  %2258 = vmatmul.mubr.bf16.gmra.mrb[84].mxu1 %v6618_v31  ;;  %v1184_v30 = vadd.f32 %v6582_v23, %v1183_v29  ;;  %v5852_v33 = vpop.f32.mrb[26].mxu1 }
 0x2d2   : > { %1914 = vmatprep.mubr.bf16.mxu0 %v6178_v34  ;;  %2267 = vmatprep.mubr.bf16.mxu1 %v6178_v34  ;;  %v1368_v35 = vmax.f32 %v1192_v28, 0.0  ;;  %v1195_v36 = vadd.f32 %v5852_v33, %v6582_v23  ;;  %v1186_v37 = vpop.f32.mrb[27].mxu1 }
 0x2d3   : > { %v1366_v38 = vmax.f32 %v1184_v30, 0.0  ;;  %v1187_v42 = vadd.f32 %v6582_v23, %v1186_v37  ;;  %2893 = vmatprep.subr.bf16.mxu1 %v5662_v21 }
 0x2d4   : > { %v1369_v50 = vmax.f32 %v1195_v36, 0.0  ;;  %2894 = vmatpush1.bf16.msra.mxu1 %v5661_v20 }
 0x2d5   : > { %v1367_v51 = vmax.f32 %v1187_v42, 0.0 }
 0x2d6   : > { %v6666_v52 = vpack.c.bf16 %v1369_v50, %v1368_v35 }
 0x2d7   : > { %v6668_v54 = vpack.c.bf16 %v1367_v51, %v1366_v38  ;;  %v5855_v55 = vpop.f32.mrb[28].mxu1 }
 0x2d8   : > { %v1208_v56 = vadd.f32 %v5855_v55, %v6582_v23  ;;  %v1199_v57 = vpop.f32.mrb[29].mxu1 }
 0x2d9   : > { %1915 = vmatmul.mubr.bf16.gmra.mrb[88].mxu0 %v6632_v46  ;;  %2268 = vmatmul.mubr.bf16.gmra.mrb[88].mxu1 %v6632_v46  ;;  %v1200_v58 = vadd.f32 %v6582_v23, %v1199_v57  ;;  %v5856_v47 = vpop.f32.mrb[30].mxu1 }
 0x2da   : > { %1924 = vmatprep.mubr.bf16.mxu0 %v6178_v34  ;;  %2277 = vmatprep.mubr.bf16.mxu1 %v6178_v34  ;;  %v1372_v59 = vmax.f32 %v1208_v56, 0.0  ;;  %v1211_v60 = vadd.f32 %v5856_v47, %v6582_v23  ;;  %v1202_v61 = vpop.f32.mrb[31].mxu1 }
 0x2db   : > { %v1370_v62 = vmax.f32 %v1200_v58, 0.0  ;;  %v1203_v63 = vadd.f32 %v6582_v23, %v1202_v61 }
 0x2dc   : > { %v1373_v0 = vmax.f32 %v1211_v60, 0.0 }
 0x2dd   : > { %v1371_v1 = vmax.f32 %v1203_v63, 0.0 }
 0x2de   : > { %v6678_v2 = vpack.c.bf16 %v1373_v0, %v1372_v59 }
 0x2df   : > { %v6680_v3 = vpack.c.bf16 %v1371_v1, %v1370_v62  ;;  %v5859_v39 = vpop.f32.mrb[32].mxu1 }
 0x2e0   : > { %v1224_v40 = vadd.f32 %v5859_v39, %v6582_v23  ;;  %v1215_v41 = vpop.f32.mrb[33].mxu1 }
 0x2e1   : > { %1925 = vmatmul.mubr.bf16.gmra.mrb[92].mxu0 %v6630_v43  ;;  %2278 = vmatmul.mubr.bf16.gmra.mrb[92].mxu1 %v6630_v43  ;;  %v1216_v45 = vadd.f32 %v6582_v23, %v1215_v41  ;;  %v5860_v49 = vpop.f32.mrb[34].mxu1 }
 0x2e2   : > { %1934 = vmatprep.mubr.bf16.mxu0 %v6178_v34  ;;  %2287 = vmatprep.mubr.bf16.mxu1 %v6178_v34  ;;  %v1376_v53 = vmax.f32 %v1224_v40, 0.0  ;;  %v1227_v6 = vadd.f32 %v5860_v49, %v6582_v23  ;;  %v1218_v7 = vpop.f32.mrb[35].mxu1 }
 0x2e3   : > { %v1374_v14 = vmax.f32 %v1216_v45, 0.0  ;;  %v1219_v15 = vadd.f32 %v6582_v23, %v1218_v7 }
 0x2e4   : > { %v1377_v19 = vmax.f32 %v1227_v6, 0.0 }
 0x2e5   : > { %v1375_v22 = vmax.f32 %v1219_v15, 0.0 }
 0x2e6   : > { %v6690_v24 = vpack.c.bf16 %v1377_v19, %v1376_v53 }
 0x2e7   : > { %v6692_v25 = vpack.c.bf16 %v1375_v22, %v1374_v14  ;;  %v5863_v27 = vpop.f32.mrb[36].mxu1 }
 0x2e8   : > { %v1240_v28 = vadd.f32 %v5863_v27, %v6582_v23  ;;  %v1231_v29 = vpop.f32.mrb[37].mxu1 }
 0x2e9   : > { %1935 = vmatmul.mubr.bf16.gmra.mrb[96].mxu0 %v6644_v12  ;;  %2288 = vmatmul.mubr.bf16.gmra.mrb[96].mxu1 %v6644_v12  ;;  %v1232_v30 = vadd.f32 %v6582_v23, %v1231_v29  ;;  %v5864_v33 = vpop.f32.mrb[38].mxu1 }
 0x2ea   : > { %1944 = vmatprep.mubr.bf16.mxu0 %v6178_v34  ;;  %2297 = vmatprep.mubr.bf16.mxu1 %v6178_v34  ;;  %v1380_v35 = vmax.f32 %v1240_v28, 0.0  ;;  %v1243_v36 = vadd.f32 %v5864_v33, %v6582_v23  ;;  %v1234_v37 = vpop.f32.mrb[39].mxu1 }
 0x2eb   : > { %v1378_v38 = vmax.f32 %v1232_v30, 0.0  ;;  %v1235_v42 = vadd.f32 %v6582_v23, %v1234_v37 }
 0x2ec   : > { %v1381_v50 = vmax.f32 %v1243_v36, 0.0 }
 0x2ed   : > { %v1379_v51 = vmax.f32 %v1235_v42, 0.0 }
 0x2ee   : > { %v6702_v55 = vpack.c.bf16 %v1381_v50, %v1380_v35 }
 0x2ef   : > { %v6704_v56 = vpack.c.bf16 %v1379_v51, %v1378_v38  ;;  %v5867_v57 = vpop.f32.mrb[40].mxu1 }
 0x2f0   : > { %v1256_v58 = vadd.f32 %v5867_v57, %v6582_v23  ;;  %v1247_v47 = vpop.f32.mrb[41].mxu1 }
 0x2f1   : > { %1945 = vmatmul.mubr.bf16.gmra.mrb[100].mxu0 %v6642_v11  ;;  %2298 = vmatmul.mubr.bf16.gmra.mrb[100].mxu1 %v6642_v11  ;;  %v1248_v59 = vadd.f32 %v6582_v23, %v1247_v47  ;;  %v5868_v60 = vpop.f32.mrb[42].mxu1 }
 0x2f2   : > { %1954 = vmatprep.mubr.bf16.mxu0 %v6178_v34  ;;  %2307 = vmatprep.mubr.bf16.mxu1 %v6178_v34  ;;  %v1384_v61 = vmax.f32 %v1256_v58, 0.0  ;;  %v1259_v62 = vadd.f32 %v5868_v60, %v6582_v23  ;;  %v1250_v63 = vpop.f32.mrb[43].mxu1  ;;  %v1500_v60 = vld [vmem:[#allocation8 + $0x1f0] sm:$0xff] }
 0x2f3   : > { %v1382_v0 = vmax.f32 %v1248_v59, 0.0  ;;  %v1251_v1 = vadd.f32 %v6582_v23, %v1250_v63  ;;  %v1496_v59 = vld [vmem:[#allocation8 + $0x1d0] sm:$0xff] }
 0x2f4   : > { %v1385_v39 = vmax.f32 %v1259_v62, 0.0 }
 0x2f5   : > { %v1383_v40 = vmax.f32 %v1251_v1, 0.0  ;;  %v5668_v1 = vcombine.high %v1496_v59, %v1500_v60 }
 0x2f6   : > { %v6714_v41 = vpack.c.bf16 %v1385_v39, %v1384_v61  ;;  %v1497_v61 = vld [vmem:[#allocation8 + $0x1d8] sm:$0xff] }
 0x2f7   : > { %v6716_v45 = vpack.c.bf16 %v1383_v40, %v1382_v0  ;;  %v5871_v49 = vpop.f32.mrb[44].mxu1  ;;  %v5667_v0 = vcombine.low %v1496_v59, %v1500_v60  ;;  %v1501_v39 = vld [vmem:[#allocation8 + $0x1f8] sm:$0xff]  ;;  %2542 = vmatprep.subr.bf16.mxu0 %v5668_v1 }
 0x2f8   : > { %v1272_v53 = vadd.f32 %v5871_v49, %v6582_v23  ;;  %v1263_v6 = vpop.f32.mrb[45].mxu1 }
 0x2f9   : > { %1955 = vmatmul.mubr.bf16.gmra.mrb[104].mxu0 %v6656_v9  ;;  %2308 = vmatmul.mubr.bf16.gmra.mrb[104].mxu1 %v6656_v9  ;;  %v1264_v7 = vadd.f32 %v6582_v23, %v1263_v6  ;;  %v5872_v8 = vpop.f32.mrb[46].mxu1  ;;  %v5669_v6 = vcombine.low %v1497_v61, %v1501_v39 }
 0x2fa   : > { %1964 = vmatprep.mubr.bf16.mxu0 %v6178_v34  ;;  %2317 = vmatprep.mubr.bf16.mxu1 %v6178_v34  ;;  %v1388_v10 = vmax.f32 %v1272_v53, 0.0  ;;  %v1275_v13 = vadd.f32 %v5872_v8, %v6582_v23  ;;  %v1266_v14 = vpop.f32.mrb[47].mxu1 }
 0x2fb   : > { %v1386_v15 = vmax.f32 %v1264_v7, 0.0  ;;  %v1267_v16 = vadd.f32 %v6582_v23, %v1266_v14  ;;  %v5670_v7 = vcombine.high %v1497_v61, %v1501_v39  ;;  %2543 = vmatpush1.bf16.msra.mxu0 %v5667_v0 }
 0x2fc   : > { %v1389_v17 = vmax.f32 %v1275_v13, 0.0 }
 0x2fd   : > { %v1387_v18 = vmax.f32 %v1267_v16, 0.0  ;;  %2895 = vmatprep.subr.bf16.mxu1 %v5670_v7 }
 0x2fe   : > { %v6726_v19 = vpack.c.bf16 %v1389_v17, %v1388_v10  ;;  %2896 = vmatpush1.bf16.msra.mxu1 %v5669_v6 }
 0x2ff   : > { %v6728_v20 = vpack.c.bf16 %v1387_v18, %v1386_v15  ;;  %v5875_v21 = vpop.f32.mrb[48].mxu1 }
 0x300   : > { %v1288_v22 = vadd.f32 %v5875_v21, %v6582_v23  ;;  %v1279_v27 = vpop.f32.mrb[49].mxu1 }
 0x301   : > { %1965 = vmatmul.mubr.bf16.gmra.mrb[108].mxu0 %v6654_v26  ;;  %2318 = vmatmul.mubr.bf16.gmra.mrb[108].mxu1 %v6654_v26  ;;  %v1280_v28 = vadd.f32 %v6582_v23, %v1279_v27  ;;  %v5876_v29 = vpop.f32.mrb[50].mxu1 }
 0x302   : > { %1974 = vmatprep.mubr.bf16.mxu0 %v6178_v34  ;;  %2327 = vmatprep.mubr.bf16.mxu1 %v6178_v34  ;;  %v1392_v30 = vmax.f32 %v1288_v22, 0.0  ;;  %v1291_v33 = vadd.f32 %v5876_v29, %v6582_v23  ;;  %v1282_v35 = vpop.f32.mrb[51].mxu1 }
 0x303   : > { %v1390_v36 = vmax.f32 %v1280_v28, 0.0  ;;  %v1283_v37 = vadd.f32 %v6582_v23, %v1282_v35 }
 0x304   : > { %v1393_v38 = vmax.f32 %v1291_v33, 0.0 }
 0x305   : > { %v1391_v42 = vmax.f32 %v1283_v37, 0.0 }
 0x306   : > { %v6738_v50 = vpack.c.bf16 %v1393_v38, %v1392_v30 }
 0x307   : > { %v6740_v51 = vpack.c.bf16 %v1391_v42, %v1390_v36  ;;  %v5879_v57 = vpop.f32.mrb[52].mxu1 }
 0x308   : > { %v1304_v58 = vadd.f32 %v5879_v57, %v6582_v23  ;;  %v1295_v47 = vpop.f32.mrb[53].mxu1 }
 0x309   : > { %1975 = vmatmul.mubr.bf16.gmra.mrb[112].mxu0 %v6668_v54  ;;  %2328 = vmatmul.mubr.bf16.gmra.mrb[112].mxu1 %v6668_v54  ;;  %v1296_v62 = vadd.f32 %v6582_v23, %v1295_v47  ;;  %v5880_v63 = vpop.f32.mrb[54].mxu1 }
 0x30a   : > { %1984 = vmatprep.mubr.bf16.mxu0 %v6178_v34  ;;  %2337 = vmatprep.mubr.bf16.mxu1 %v6178_v34  ;;  %v1396_v40 = vmax.f32 %v1304_v58, 0.0  ;;  %v1307_v49 = vadd.f32 %v5880_v63, %v6582_v23  ;;  %v1298_v53 = vpop.f32.mrb[55].mxu1 }
 0x30b   : > { %v1394_v8 = vmax.f32 %v1296_v62, 0.0  ;;  %v1299_v10 = vadd.f32 %v6582_v23, %v1298_v53 }
 0x30c   : > { %v1397_v13 = vmax.f32 %v1307_v49, 0.0 }
 0x30d   : > { %v1395_v14 = vmax.f32 %v1299_v10, 0.0 }
 0x30e   : > { %v6750_v15 = vpack.c.bf16 %v1397_v13, %v1396_v40 }
 0x30f   : > { %v6752_v16 = vpack.c.bf16 %v1395_v14, %v1394_v8  ;;  %v5883_v17 = vpop.f32.mrb[56].mxu1 }
 0x310   : > { %v1320_v18 = vadd.f32 %v5883_v17, %v6582_v23  ;;  %v1311_v21 = vpop.f32.mrb[57].mxu1 }
 0x311   : > { %1985 = vmatmul.mubr.bf16.gmra.mrb[116].mxu0 %v6666_v52  ;;  %2338 = vmatmul.mubr.bf16.gmra.mrb[116].mxu1 %v6666_v52  ;;  %v1312_v22 = vadd.f32 %v6582_v23, %v1311_v21  ;;  %v5884_v27 = vpop.f32.mrb[58].mxu1 }
 0x312   : > { %1994 = vmatprep.mubr.bf16.mxu0 %v6178_v34  ;;  %2347 = vmatprep.mubr.bf16.mxu1 %v6178_v34  ;;  %v1400_v28 = vmax.f32 %v1320_v18, 0.0  ;;  %v1323_v29 = vadd.f32 %v5884_v27, %v6582_v23  ;;  %v1314_v30 = vpop.f32.mrb[59].mxu1 }
 0x313   : > { %v1398_v33 = vmax.f32 %v1312_v22, 0.0  ;;  %v1315_v35 = vadd.f32 %v6582_v23, %v1314_v30 }
 0x314   : > { %v1401_v36 = vmax.f32 %v1323_v29, 0.0 }
 0x315   : > { %v1399_v37 = vmax.f32 %v1315_v35, 0.0 }
 0x316   : > { %v6762_v38 = vpack.c.bf16 %v1401_v36, %v1400_v28 }
 0x317   : > { %v6764_v42 = vpack.c.bf16 %v1399_v37, %v1398_v33  ;;  %v5887_v57 = vpop.f32.mrb[60].mxu1 }
 0x318   : > { %v1336_v58 = vadd.f32 %v5887_v57, %v6582_v23  ;;  %v1327_v47 = vpop.f32.mrb[61].mxu1 }
 0x319   : > { %1995 = vmatmul.mubr.bf16.gmra.mrb[120].mxu0 %v6680_v3  ;;  %2348 = vmatmul.mubr.bf16.gmra.mrb[120].mxu1 %v6680_v3  ;;  %v1328_v59 = vadd.f32 %v6582_v23, %v1327_v47  ;;  %v5888_v60 = vpop.f32.mrb[62].mxu1 }
 0x31a   : > { %2004 = vmatprep.mubr.bf16.mxu0 %v6178_v34  ;;  %2357 = vmatprep.mubr.bf16.mxu1 %v6178_v34  ;;  %v1404_v61 = vmax.f32 %v1336_v58, 0.0  ;;  %v1339_v62 = vadd.f32 %v5888_v60, %v6582_v23  ;;  %v1330_v63 = vpop.f32.mrb[63].mxu1 }
 0x31b   : > { %v1402_v0 = vmax.f32 %v1328_v59, 0.0  ;;  %v1331_v1 = vadd.f32 %v6582_v23, %v1330_v63 }
 0x31c   : > { %v1405_v39 = vmax.f32 %v1339_v62, 0.0 }
 0x31d   : > { %v1403_v40 = vmax.f32 %v1331_v1, 0.0 }
 0x31e   : > { %v6774_v49 = vpack.c.bf16 %v1405_v39, %v1404_v61 }
 0x31f   : > { %v6776_v53 = vpack.c.bf16 %v1403_v40, %v1402_v0 }
 0x321   : > { %2005 = vmatmul.mubr.bf16.gmra.mrb[124].mxu0 %v6678_v2  ;;  %2358 = vmatmul.mubr.bf16.gmra.mrb[124].mxu1 %v6678_v2 }
 0x322   : > { %2014 = vmatprep.mubr.bf16.mxu0 %v6178_v34  ;;  %2367 = vmatprep.mubr.bf16.mxu1 %v6178_v34 }
 0x329   : > { %2015 = vmatmul.mubr.bf16.gmra.mrb[128].mxu0 %v6692_v25  ;;  %2368 = vmatmul.mubr.bf16.gmra.mrb[128].mxu1 %v6692_v25 }
 0x32a   : > { %2024 = vmatprep.mubr.bf16.mxu0 %v6178_v34  ;;  %2377 = vmatprep.mubr.bf16.mxu1 %v6178_v34 }
 0x331   : > { %2025 = vmatmul.mubr.bf16.gmra.mrb[132].mxu0 %v6690_v24  ;;  %2378 = vmatmul.mubr.bf16.gmra.mrb[132].mxu1 %v6690_v24 }
 0x332   : > { %2034 = vmatprep.mubr.bf16.mxu0 %v6178_v34  ;;  %2387 = vmatprep.mubr.bf16.mxu1 %v6178_v34 }
 0x339   : > { %2035 = vmatmul.mubr.bf16.gmra.mrb[136].mxu0 %v6704_v56  ;;  %2388 = vmatmul.mubr.bf16.gmra.mrb[136].mxu1 %v6704_v56 }
 0x33a   : > { %2044 = vmatprep.mubr.bf16.mxu0 %v6178_v34  ;;  %2397 = vmatprep.mubr.bf16.mxu1 %v6178_v34 }
 0x341   : > { %2045 = vmatmul.mubr.bf16.gmra.mrb[140].mxu0 %v6702_v55  ;;  %2398 = vmatmul.mubr.bf16.gmra.mrb[140].mxu1 %v6702_v55 }
 0x342   : > { %2054 = vmatprep.mubr.bf16.mxu0 %v6178_v34  ;;  %2407 = vmatprep.mubr.bf16.mxu1 %v6178_v34 }
 0x349   : > { %2055 = vmatmul.mubr.bf16.gmra.mrb[144].mxu0 %v6716_v45  ;;  %2408 = vmatmul.mubr.bf16.gmra.mrb[144].mxu1 %v6716_v45 }
 0x34a   : > { %2064 = vmatprep.mubr.bf16.mxu0 %v6178_v34  ;;  %2417 = vmatprep.mubr.bf16.mxu1 %v6178_v34 }
 0x351   : > { %2065 = vmatmul.mubr.bf16.gmra.mrb[148].mxu0 %v6714_v41  ;;  %2418 = vmatmul.mubr.bf16.gmra.mrb[148].mxu1 %v6714_v41 }
 0x352   : > { %2074 = vmatprep.mubr.bf16.mxu0 %v6178_v34  ;;  %2427 = vmatprep.mubr.bf16.mxu1 %v6178_v34 }
 0x359   : > { %2075 = vmatmul.mubr.bf16.gmra.mrb[152].mxu0 %v6728_v20  ;;  %2428 = vmatmul.mubr.bf16.gmra.mrb[152].mxu1 %v6728_v20 }
 0x35a   : > { %2084 = vmatprep.mubr.bf16.mxu0 %v6178_v34  ;;  %2437 = vmatprep.mubr.bf16.mxu1 %v6178_v34 }
 0x361   : > { %2085 = vmatmul.mubr.bf16.gmra.mrb[156].mxu0 %v6726_v19  ;;  %2438 = vmatmul.mubr.bf16.gmra.mrb[156].mxu1 %v6726_v19 }
 0x362   : > { %2094 = vmatprep.mubr.bf16.mxu0 %v6178_v34  ;;  %2447 = vmatprep.mubr.bf16.mxu1 %v6178_v34 }
 0x369   : > { %2095 = vmatmul.mubr.bf16.gmra.mrb[160].mxu0 %v6740_v51  ;;  %2448 = vmatmul.mubr.bf16.gmra.mrb[160].mxu1 %v6740_v51 }
 0x36a   : > { %2104 = vmatprep.mubr.bf16.mxu0 %v6178_v34  ;;  %2457 = vmatprep.mubr.bf16.mxu1 %v6178_v34 }
 0x371   : > { %2105 = vmatmul.mubr.bf16.gmra.mrb[164].mxu0 %v6738_v50  ;;  %2458 = vmatmul.mubr.bf16.gmra.mrb[164].mxu1 %v6738_v50 }
 0x372   : > { %2114 = vmatprep.mubr.bf16.mxu0 %v6178_v34  ;;  %2467 = vmatprep.mubr.bf16.mxu1 %v6178_v34 }
 0x379   : > { %2115 = vmatmul.mubr.bf16.gmra.mrb[168].mxu0 %v6752_v16  ;;  %2468 = vmatmul.mubr.bf16.gmra.mrb[168].mxu1 %v6752_v16 }
 0x37a   : > { %2124 = vmatprep.mubr.bf16.mxu0 %v6178_v34  ;;  %2477 = vmatprep.mubr.bf16.mxu1 %v6178_v34 }
 0x37c   : > { %v1856_v23 = vpop.f32.mrb[64].mxu0  ;;  %v2209_v6 = vpop.f32.mrb[64].mxu1 }
 0x37d   : > { %v1858_v7 = vpop.f32.mrb[65].mxu0  ;;  %v2211_v8 = vpop.f32.mrb[65].mxu1 }
 0x37e   : > { %v1860_v10 = vpop.f32.mrb[66].mxu0  ;;  %v2213_v13 = vpop.f32.mrb[66].mxu1 }
 0x37f   : > { %v3234_v14 = vmax.f32 %v1856_v23, %v1860_v10  ;;  %v3372_v17 = vmax.f32 %v2209_v6, %v2213_v13  ;;  %v1862_v18 = vpop.f32.mrb[67].mxu0  ;;  %v2215_v21 = vpop.f32.mrb[67].mxu1 }
 0x380   : > { %v3303_v22 = vmax.f32 %v1858_v7, %v1862_v18  ;;  %v3441_v27 = vmax.f32 %v2211_v8, %v2215_v21 }
 0x381   : > { %2125 = vmatmul.mubr.bf16.gmra.mrb[172].mxu0 %v6750_v15  ;;  %2478 = vmatmul.mubr.bf16.gmra.mrb[172].mxu1 %v6750_v15 }
 0x382   : > { %2134 = vmatprep.mubr.bf16.mxu0 %v6178_v34  ;;  %2487 = vmatprep.mubr.bf16.mxu1 %v6178_v34 }
 0x384   : > { %v1866_v28 = vpop.f32.mrb[68].mxu0  ;;  %v2219_v29 = vpop.f32.mrb[68].mxu1 }
 0x385   : > { %v3235_v30 = vmax.f32 %v3234_v14, %v1866_v28  ;;  %v3373_v33 = vmax.f32 %v3372_v17, %v2219_v29  ;;  %v1868_v35 = vpop.f32.mrb[69].mxu0  ;;  %v2221_v36 = vpop.f32.mrb[69].mxu1 }
 0x386   : > { %v3304_v37 = vmax.f32 %v3303_v22, %v1868_v35  ;;  %v3442_v57 = vmax.f32 %v3441_v27, %v2221_v36  ;;  %v1870_v58 = vpop.f32.mrb[70].mxu0  ;;  %v2223_v47 = vpop.f32.mrb[70].mxu1 }
 0x387   : > { %v3236_v59 = vmax.f32 %v3235_v30, %v1870_v58  ;;  %v3374_v60 = vmax.f32 %v3373_v33, %v2223_v47  ;;  %v1872_v61 = vpop.f32.mrb[71].mxu0  ;;  %v2225_v62 = vpop.f32.mrb[71].mxu1 }
 0x388   : > { %v3305_v63 = vmax.f32 %v3304_v37, %v1872_v61  ;;  %v3443_v0 = vmax.f32 %v3442_v57, %v2225_v62 }
 0x389   : > { %2135 = vmatmul.mubr.bf16.gmra.mrb[176].mxu0 %v6764_v42  ;;  %2488 = vmatmul.mubr.bf16.gmra.mrb[176].mxu1 %v6764_v42 }
 0x38a   : > { %2144 = vmatprep.mubr.bf16.mxu0 %v6178_v34  ;;  %2497 = vmatprep.mubr.bf16.mxu1 %v6178_v34 }
 0x38c   : > { %v1876_v1 = vpop.f32.mrb[72].mxu0  ;;  %v2229_v39 = vpop.f32.mrb[72].mxu1 }
 0x38d   : > { %v3237_v40 = vmax.f32 %v3236_v59, %v1876_v1  ;;  %v3375_v23 = vmax.f32 %v3374_v60, %v2229_v39  ;;  %v1878_v6 = vpop.f32.mrb[73].mxu0  ;;  %v2231_v7 = vpop.f32.mrb[73].mxu1 }
 0x38e   : > { %v3306_v8 = vmax.f32 %v3305_v63, %v1878_v6  ;;  %v3444_v10 = vmax.f32 %v3443_v0, %v2231_v7  ;;  %v1880_v13 = vpop.f32.mrb[74].mxu0  ;;  %v2233_v14 = vpop.f32.mrb[74].mxu1 }
 0x38f   : > { %v3238_v17 = vmax.f32 %v3237_v40, %v1880_v13  ;;  %v3376_v18 = vmax.f32 %v3375_v23, %v2233_v14  ;;  %v1882_v21 = vpop.f32.mrb[75].mxu0  ;;  %v2235_v22 = vpop.f32.mrb[75].mxu1 }
 0x390   : > { %v3307_v27 = vmax.f32 %v3306_v8, %v1882_v21  ;;  %v3445_v28 = vmax.f32 %v3444_v10, %v2235_v22 }
 0x391   : > { %2145 = vmatmul.mubr.bf16.gmra.mrb[180].mxu0 %v6762_v38  ;;  %2498 = vmatmul.mubr.bf16.gmra.mrb[180].mxu1 %v6762_v38 }
 0x392   : > { %2154 = vmatprep.mubr.bf16.mxu0 %v6178_v34  ;;  %2507 = vmatprep.mubr.bf16.mxu1 %v6178_v34 }
 0x394   : > { %v1886_v29 = vpop.f32.mrb[76].mxu0  ;;  %v2239_v30 = vpop.f32.mrb[76].mxu1 }
 0x395   : > { %v3239_v33 = vmax.f32 %v3238_v17, %v1886_v29  ;;  %v3377_v35 = vmax.f32 %v3376_v18, %v2239_v30  ;;  %v1888_v36 = vpop.f32.mrb[77].mxu0  ;;  %v2241_v37 = vpop.f32.mrb[77].mxu1 }
 0x396   : > { %v3308_v57 = vmax.f32 %v3307_v27, %v1888_v36  ;;  %v3446_v58 = vmax.f32 %v3445_v28, %v2241_v37  ;;  %v1890_v47 = vpop.f32.mrb[78].mxu0  ;;  %v2243_v59 = vpop.f32.mrb[78].mxu1 }
 0x397   : > { %v3240_v60 = vmax.f32 %v3239_v33, %v1890_v47  ;;  %v3378_v61 = vmax.f32 %v3377_v35, %v2243_v59  ;;  %v1892_v62 = vpop.f32.mrb[79].mxu0  ;;  %v2245_v63 = vpop.f32.mrb[79].mxu1 }
 0x398   : > { %v3309_v0 = vmax.f32 %v3308_v57, %v1892_v62  ;;  %v3447_v1 = vmax.f32 %v3446_v58, %v2245_v63 }
 0x399   : > { %2155 = vmatmul.mubr.bf16.gmra.mrb[184].mxu0 %v6776_v53  ;;  %2508 = vmatmul.mubr.bf16.gmra.mrb[184].mxu1 %v6776_v53 }
 0x39a   : > { %2164 = vmatprep.mubr.bf16.mxu0 %v6178_v34  ;;  %2517 = vmatprep.mubr.bf16.mxu1 %v6178_v34 }
 0x39c   : > { %v1896_v39 = vpop.f32.mrb[80].mxu0  ;;  %v2249_v40 = vpop.f32.mrb[80].mxu1 }
 0x39d   : > { %v3241_v23 = vmax.f32 %v3240_v60, %v1896_v39  ;;  %v3379_v6 = vmax.f32 %v3378_v61, %v2249_v40  ;;  %v1898_v7 = vpop.f32.mrb[81].mxu0  ;;  %v2251_v8 = vpop.f32.mrb[81].mxu1 }
 0x39e   : > { %v3310_v10 = vmax.f32 %v3309_v0, %v1898_v7  ;;  %v3448_v13 = vmax.f32 %v3447_v1, %v2251_v8  ;;  %v1900_v14 = vpop.f32.mrb[82].mxu0  ;;  %v2253_v17 = vpop.f32.mrb[82].mxu1 }
 0x39f   : > { %v3242_v18 = vmax.f32 %v3241_v23, %v1900_v14  ;;  %v3380_v21 = vmax.f32 %v3379_v6, %v2253_v17  ;;  %v1902_v22 = vpop.f32.mrb[83].mxu0  ;;  %v2255_v27 = vpop.f32.mrb[83].mxu1 }
 0x3a0   : > { %v3311_v28 = vmax.f32 %v3310_v10, %v1902_v22  ;;  %v3449_v29 = vmax.f32 %v3448_v13, %v2255_v27 }
 0x3a1   : > { %2165 = vmatmul.mubr.bf16.gmra.mrb[188].mxu0 %v6774_v49  ;;  %2518 = vmatmul.mubr.bf16.gmra.mrb[188].mxu1 %v6774_v49 }
 0x3a2   : > { %2560 = vmatprep.mubr.bf16.mxu0 %v6178_v34  ;;  %2913 = vmatprep.mubr.bf16.mxu1 %v6178_v34 }
 0x3a4   : > { %v1906_v30 = vpop.f32.mrb[84].mxu0  ;;  %v2259_v33 = vpop.f32.mrb[84].mxu1 }
 0x3a5   : > { %v3243_v35 = vmax.f32 %v3242_v18, %v1906_v30  ;;  %v3381_v36 = vmax.f32 %v3380_v21, %v2259_v33  ;;  %v1908_v37 = vpop.f32.mrb[85].mxu0  ;;  %v2261_v57 = vpop.f32.mrb[85].mxu1 }
 0x3a6   : > { %v3312_v58 = vmax.f32 %v3311_v28, %v1908_v37  ;;  %v3450_v47 = vmax.f32 %v3449_v29, %v2261_v57  ;;  %v1910_v59 = vpop.f32.mrb[86].mxu0  ;;  %v2263_v60 = vpop.f32.mrb[86].mxu1 }
 0x3a7   : > { %v3244_v61 = vmax.f32 %v3243_v35, %v1910_v59  ;;  %v3382_v62 = vmax.f32 %v3381_v36, %v2263_v60  ;;  %v1912_v63 = vpop.f32.mrb[87].mxu0  ;;  %v2265_v0 = vpop.f32.mrb[87].mxu1 }
 0x3a8   : > { %v3313_v1 = vmax.f32 %v3312_v58, %v1912_v63  ;;  %v3451_v39 = vmax.f32 %v3450_v47, %v2265_v0 }
 0x3a9   : > { %2561 = vmatmul.mubr.bf16.vlgmr.msra.gmra.mrb[192].mxu0 %v6590_v48  ;;  %2914 = vmatmul.mubr.bf16.vlgmr.msra.gmra.mrb[192].mxu1 %v6590_v48 }
 0x3aa   : > { %2570 = vmatprep.mubr.bf16.mxu0 %v6178_v34  ;;  %2923 = vmatprep.mubr.bf16.mxu1 %v6178_v34 }
 0x3ac   : > { %v1916_v40 = vpop.f32.mrb[88].mxu0  ;;  %v2269_v23 = vpop.f32.mrb[88].mxu1 }
 0x3ad   : > { %v3245_v6 = vmax.f32 %v3244_v61, %v1916_v40  ;;  %v3383_v7 = vmax.f32 %v3382_v62, %v2269_v23  ;;  %v1918_v8 = vpop.f32.mrb[89].mxu0  ;;  %v2271_v10 = vpop.f32.mrb[89].mxu1 }
 0x3ae   : > { %v3314_v13 = vmax.f32 %v3313_v1, %v1918_v8  ;;  %v3452_v14 = vmax.f32 %v3451_v39, %v2271_v10  ;;  %v1920_v17 = vpop.f32.mrb[90].mxu0  ;;  %v2273_v18 = vpop.f32.mrb[90].mxu1 }
 0x3af   : > { %v3246_v21 = vmax.f32 %v3245_v6, %v1920_v17  ;;  %v3384_v22 = vmax.f32 %v3383_v7, %v2273_v18  ;;  %v1922_v27 = vpop.f32.mrb[91].mxu0  ;;  %v2275_v28 = vpop.f32.mrb[91].mxu1 }
 0x3b0   : > { %v3315_v29 = vmax.f32 %v3314_v13, %v1922_v27  ;;  %v3453_v48 = vmax.f32 %v3452_v14, %v2275_v28 }
 0x3b1   : > { %2571 = vmatmul.mubr.bf16.gmra.mrb[196].mxu0 %v6588_v44  ;;  %2924 = vmatmul.mubr.bf16.gmra.mrb[196].mxu1 %v6588_v44 }
 0x3b2   : > { %2580 = vmatprep.mubr.bf16.mxu0 %v6178_v34  ;;  %2933 = vmatprep.mubr.bf16.mxu1 %v6178_v34 }
 0x3b4   : > { %v1926_v30 = vpop.f32.mrb[92].mxu0  ;;  %v2279_v33 = vpop.f32.mrb[92].mxu1 }
 0x3b5   : > { %v3247_v35 = vmax.f32 %v3246_v21, %v1926_v30  ;;  %v3385_v36 = vmax.f32 %v3384_v22, %v2279_v33  ;;  %v1928_v37 = vpop.f32.mrb[93].mxu0  ;;  %v2281_v57 = vpop.f32.mrb[93].mxu1 }
 0x3b6   : > { %v3316_v58 = vmax.f32 %v3315_v29, %v1928_v37  ;;  %v3454_v47 = vmax.f32 %v3453_v48, %v2281_v57  ;;  %v1930_v59 = vpop.f32.mrb[94].mxu0  ;;  %v2283_v60 = vpop.f32.mrb[94].mxu1 }
 0x3b7   : > { %v3248_v61 = vmax.f32 %v3247_v35, %v1930_v59  ;;  %v3386_v62 = vmax.f32 %v3385_v36, %v2283_v60  ;;  %v1932_v63 = vpop.f32.mrb[95].mxu0  ;;  %v2285_v0 = vpop.f32.mrb[95].mxu1 }
 0x3b8   : > { %v3317_v1 = vmax.f32 %v3316_v58, %v1932_v63  ;;  %v3455_v44 = vmax.f32 %v3454_v47, %v2285_v0 }
 0x3b9   : > { %2581 = vmatmul.mubr.bf16.gmra.mrb[200].mxu0 %v6608_v5  ;;  %2934 = vmatmul.mubr.bf16.gmra.mrb[200].mxu1 %v6608_v5 }
 0x3ba   : > { %2590 = vmatprep.mubr.bf16.mxu0 %v6178_v34  ;;  %2943 = vmatprep.mubr.bf16.mxu1 %v6178_v34 }
 0x3bc   : > { %v1936_v39 = vpop.f32.mrb[96].mxu0  ;;  %v2289_v40 = vpop.f32.mrb[96].mxu1 }
 0x3bd   : > { %v3249_v23 = vmax.f32 %v3248_v61, %v1936_v39  ;;  %v3387_v6 = vmax.f32 %v3386_v62, %v2289_v40  ;;  %v1938_v7 = vpop.f32.mrb[97].mxu0  ;;  %v2291_v8 = vpop.f32.mrb[97].mxu1 }
 0x3be   : > { %v3318_v10 = vmax.f32 %v3317_v1, %v1938_v7  ;;  %v3456_v13 = vmax.f32 %v3455_v44, %v2291_v8  ;;  %v1940_v14 = vpop.f32.mrb[98].mxu0  ;;  %v2293_v17 = vpop.f32.mrb[98].mxu1 }
 0x3bf   : > { %v3250_v18 = vmax.f32 %v3249_v23, %v1940_v14  ;;  %v3388_v21 = vmax.f32 %v3387_v6, %v2293_v17  ;;  %v1942_v22 = vpop.f32.mrb[99].mxu0  ;;  %v2295_v27 = vpop.f32.mrb[99].mxu1 }
 0x3c0   : > { %v3319_v28 = vmax.f32 %v3318_v10, %v1942_v22  ;;  %v3457_v5 = vmax.f32 %v3456_v13, %v2295_v27 }
 0x3c1   : > { %2591 = vmatmul.mubr.bf16.gmra.mrb[204].mxu0 %v6606_v4  ;;  %2944 = vmatmul.mubr.bf16.gmra.mrb[204].mxu1 %v6606_v4 }
 0x3c2   : > { %2600 = vmatprep.mubr.bf16.mxu0 %v6178_v34  ;;  %2953 = vmatprep.mubr.bf16.mxu1 %v6178_v34 }
 0x3c4   : > { %v1946_v29 = vpop.f32.mrb[100].mxu0  ;;  %v2299_v48 = vpop.f32.mrb[100].mxu1 }
 0x3c5   : > { %v3251_v30 = vmax.f32 %v3250_v18, %v1946_v29  ;;  %v3389_v33 = vmax.f32 %v3388_v21, %v2299_v48  ;;  %v1948_v35 = vpop.f32.mrb[101].mxu0  ;;  %v2301_v36 = vpop.f32.mrb[101].mxu1 }
 0x3c6   : > { %v3320_v37 = vmax.f32 %v3319_v28, %v1948_v35  ;;  %v3458_v57 = vmax.f32 %v3457_v5, %v2301_v36  ;;  %v1950_v58 = vpop.f32.mrb[102].mxu0  ;;  %v2303_v47 = vpop.f32.mrb[102].mxu1 }
 0x3c7   : > { %v3252_v59 = vmax.f32 %v3251_v30, %v1950_v58  ;;  %v3390_v60 = vmax.f32 %v3389_v33, %v2303_v47  ;;  %v1952_v61 = vpop.f32.mrb[103].mxu0  ;;  %v2305_v62 = vpop.f32.mrb[103].mxu1 }
 0x3c8   : > { %v3321_v63 = vmax.f32 %v3320_v37, %v1952_v61  ;;  %v3459_v4 = vmax.f32 %v3458_v57, %v2305_v62 }
 0x3c9   : > { %2601 = vmatmul.mubr.bf16.gmra.mrb[208].mxu0 %v6620_v32  ;;  %2954 = vmatmul.mubr.bf16.gmra.mrb[208].mxu1 %v6620_v32 }
 0x3ca   : > { %2610 = vmatprep.mubr.bf16.mxu0 %v6178_v34  ;;  %2963 = vmatprep.mubr.bf16.mxu1 %v6178_v34 }
 0x3cc   : > { %v1956_v0 = vpop.f32.mrb[104].mxu0  ;;  %v2309_v1 = vpop.f32.mrb[104].mxu1 }
 0x3cd   : > { %v3253_v44 = vmax.f32 %v3252_v59, %v1956_v0  ;;  %v3391_v39 = vmax.f32 %v3390_v60, %v2309_v1  ;;  %v1958_v40 = vpop.f32.mrb[105].mxu0  ;;  %v2311_v23 = vpop.f32.mrb[105].mxu1 }
 0x3ce   : > { %v3322_v6 = vmax.f32 %v3321_v63, %v1958_v40  ;;  %v3460_v7 = vmax.f32 %v3459_v4, %v2311_v23  ;;  %v1960_v8 = vpop.f32.mrb[106].mxu0  ;;  %v2313_v10 = vpop.f32.mrb[106].mxu1 }
 0x3cf   : > { %v3254_v13 = vmax.f32 %v3253_v44, %v1960_v8  ;;  %v3392_v14 = vmax.f32 %v3391_v39, %v2313_v10  ;;  %v1962_v17 = vpop.f32.mrb[107].mxu0  ;;  %v2315_v18 = vpop.f32.mrb[107].mxu1 }
 0x3d0   : > { %v3323_v21 = vmax.f32 %v3322_v6, %v1962_v17  ;;  %v3461_v32 = vmax.f32 %v3460_v7, %v2315_v18 }
 0x3d1   : > { %2611 = vmatmul.mubr.bf16.gmra.mrb[212].mxu0 %v6618_v31  ;;  %2964 = vmatmul.mubr.bf16.gmra.mrb[212].mxu1 %v6618_v31 }
 0x3d2   : > { %2620 = vmatprep.mubr.bf16.mxu0 %v6178_v34  ;;  %2973 = vmatprep.mubr.bf16.mxu1 %v6178_v34 }
 0x3d4   : > { %v1966_v22 = vpop.f32.mrb[108].mxu0  ;;  %v2319_v27 = vpop.f32.mrb[108].mxu1 }
 0x3d5   : > { %v3255_v28 = vmax.f32 %v3254_v13, %v1966_v22  ;;  %v3393_v5 = vmax.f32 %v3392_v14, %v2319_v27  ;;  %v1968_v29 = vpop.f32.mrb[109].mxu0  ;;  %v2321_v48 = vpop.f32.mrb[109].mxu1 }
 0x3d6   : > { %v3324_v30 = vmax.f32 %v3323_v21, %v1968_v29  ;;  %v3462_v33 = vmax.f32 %v3461_v32, %v2321_v48  ;;  %v1970_v35 = vpop.f32.mrb[110].mxu0  ;;  %v2323_v36 = vpop.f32.mrb[110].mxu1 }
 0x3d7   : > { %v3256_v37 = vmax.f32 %v3255_v28, %v1970_v35  ;;  %v3394_v57 = vmax.f32 %v3393_v5, %v2323_v36  ;;  %v1972_v58 = vpop.f32.mrb[111].mxu0  ;;  %v2325_v47 = vpop.f32.mrb[111].mxu1 }
 0x3d8   : > { %v3325_v59 = vmax.f32 %v3324_v30, %v1972_v58  ;;  %v3463_v31 = vmax.f32 %v3462_v33, %v2325_v47 }
 0x3d9   : > { %2621 = vmatmul.mubr.bf16.gmra.mrb[216].mxu0 %v6632_v46  ;;  %2974 = vmatmul.mubr.bf16.gmra.mrb[216].mxu1 %v6632_v46 }
 0x3da   : > { %2630 = vmatprep.mubr.bf16.mxu0 %v6178_v34  ;;  %2983 = vmatprep.mubr.bf16.mxu1 %v6178_v34 }
 0x3dc   : > { %v1976_v60 = vpop.f32.mrb[112].mxu0  ;;  %v2329_v61 = vpop.f32.mrb[112].mxu1 }
 0x3dd   : > { %v3257_v62 = vmax.f32 %v3256_v37, %v1976_v60  ;;  %v3395_v63 = vmax.f32 %v3394_v57, %v2329_v61  ;;  %v1978_v4 = vpop.f32.mrb[113].mxu0  ;;  %v2331_v0 = vpop.f32.mrb[113].mxu1 }
 0x3de   : > { %v3326_v1 = vmax.f32 %v3325_v59, %v1978_v4  ;;  %v3464_v44 = vmax.f32 %v3463_v31, %v2331_v0  ;;  %v1980_v39 = vpop.f32.mrb[114].mxu0  ;;  %v2333_v40 = vpop.f32.mrb[114].mxu1 }
 0x3df   : > { %v3258_v23 = vmax.f32 %v3257_v62, %v1980_v39  ;;  %v3396_v6 = vmax.f32 %v3395_v63, %v2333_v40  ;;  %v1982_v7 = vpop.f32.mrb[115].mxu0  ;;  %v2335_v8 = vpop.f32.mrb[115].mxu1 }
 0x3e0   : > { %v3327_v10 = vmax.f32 %v3326_v1, %v1982_v7  ;;  %v3465_v46 = vmax.f32 %v3464_v44, %v2335_v8 }
 0x3e1   : > { %2631 = vmatmul.mubr.bf16.gmra.mrb[220].mxu0 %v6630_v43  ;;  %2984 = vmatmul.mubr.bf16.gmra.mrb[220].mxu1 %v6630_v43 }
 0x3e2   : > { %2640 = vmatprep.mubr.bf16.mxu0 %v6178_v34  ;;  %2993 = vmatprep.mubr.bf16.mxu1 %v6178_v34 }
 0x3e4   : > { %v1986_v13 = vpop.f32.mrb[116].mxu0  ;;  %v2339_v14 = vpop.f32.mrb[116].mxu1 }
 0x3e5   : > { %v3259_v17 = vmax.f32 %v3258_v23, %v1986_v13  ;;  %v3397_v18 = vmax.f32 %v3396_v6, %v2339_v14  ;;  %v1988_v21 = vpop.f32.mrb[117].mxu0  ;;  %v2341_v32 = vpop.f32.mrb[117].mxu1 }
 0x3e6   : > { %v3328_v22 = vmax.f32 %v3327_v10, %v1988_v21  ;;  %v3466_v27 = vmax.f32 %v3465_v46, %v2341_v32  ;;  %v1990_v28 = vpop.f32.mrb[118].mxu0  ;;  %v2343_v5 = vpop.f32.mrb[118].mxu1 }
 0x3e7   : > { %v3260_v29 = vmax.f32 %v3259_v17, %v1990_v28  ;;  %v3398_v48 = vmax.f32 %v3397_v18, %v2343_v5  ;;  %v1992_v30 = vpop.f32.mrb[119].mxu0  ;;  %v2345_v33 = vpop.f32.mrb[119].mxu1 }
 0x3e8   : > { %v3329_v35 = vmax.f32 %v3328_v22, %v1992_v30  ;;  %v3467_v43 = vmax.f32 %v3466_v27, %v2345_v33 }
 0x3e9   : > { %2641 = vmatmul.mubr.bf16.gmra.mrb[224].mxu0 %v6644_v12  ;;  %2994 = vmatmul.mubr.bf16.gmra.mrb[224].mxu1 %v6644_v12 }
 0x3ea   : > { %2650 = vmatprep.mubr.bf16.mxu0 %v6178_v34  ;;  %3003 = vmatprep.mubr.bf16.mxu1 %v6178_v34 }
 0x3ec   : > { %v1996_v36 = vpop.f32.mrb[120].mxu0  ;;  %v2349_v37 = vpop.f32.mrb[120].mxu1 }
 0x3ed   : > { %v3261_v57 = vmax.f32 %v3260_v29, %v1996_v36  ;;  %v3399_v58 = vmax.f32 %v3398_v48, %v2349_v37  ;;  %v1998_v47 = vpop.f32.mrb[121].mxu0  ;;  %v2351_v59 = vpop.f32.mrb[121].mxu1 }
 0x3ee   : > { %v3330_v31 = vmax.f32 %v3329_v35, %v1998_v47  ;;  %v3468_v60 = vmax.f32 %v3467_v43, %v2351_v59  ;;  %v2000_v61 = vpop.f32.mrb[122].mxu0  ;;  %v2353_v62 = vpop.f32.mrb[122].mxu1 }
 0x3ef   : > { %v3262_v63 = vmax.f32 %v3261_v57, %v2000_v61  ;;  %v3400_v4 = vmax.f32 %v3399_v58, %v2353_v62  ;;  %v2002_v0 = vpop.f32.mrb[123].mxu0  ;;  %v2355_v1 = vpop.f32.mrb[123].mxu1 }
 0x3f0   : > { %v3331_v44 = vmax.f32 %v3330_v31, %v2002_v0  ;;  %v3469_v12 = vmax.f32 %v3468_v60, %v2355_v1 }
 0x3f1   : > { %2651 = vmatmul.mubr.bf16.gmra.mrb[228].mxu0 %v6642_v11  ;;  %3004 = vmatmul.mubr.bf16.gmra.mrb[228].mxu1 %v6642_v11 }
 0x3f2   : > { %2660 = vmatprep.mubr.bf16.mxu0 %v6178_v34  ;;  %3013 = vmatprep.mubr.bf16.mxu1 %v6178_v34 }
 0x3f4   : > { %v2006_v39 = vpop.f32.mrb[124].mxu0  ;;  %v2359_v40 = vpop.f32.mrb[124].mxu1 }
 0x3f5   : > { %v3263_v23 = vmax.f32 %v3262_v63, %v2006_v39  ;;  %v3401_v6 = vmax.f32 %v3400_v4, %v2359_v40  ;;  %v2008_v7 = vpop.f32.mrb[125].mxu0  ;;  %v2361_v8 = vpop.f32.mrb[125].mxu1 }
 0x3f6   : > { %v3332_v10 = vmax.f32 %v3331_v44, %v2008_v7  ;;  %v3470_v46 = vmax.f32 %v3469_v12, %v2361_v8  ;;  %v2010_v13 = vpop.f32.mrb[126].mxu0  ;;  %v2363_v14 = vpop.f32.mrb[126].mxu1 }
 0x3f7   : > { %v3264_v17 = vmax.f32 %v3263_v23, %v2010_v13  ;;  %v3402_v18 = vmax.f32 %v3401_v6, %v2363_v14  ;;  %v2012_v21 = vpop.f32.mrb[127].mxu0  ;;  %v2365_v32 = vpop.f32.mrb[127].mxu1 }
 0x3f8   : > { %v3333_v22 = vmax.f32 %v3332_v10, %v2012_v21  ;;  %v3471_v11 = vmax.f32 %v3470_v46, %v2365_v32 }
 0x3f9   : > { %2661 = vmatmul.mubr.bf16.gmra.mrb[232].mxu0 %v6656_v9  ;;  %3014 = vmatmul.mubr.bf16.gmra.mrb[232].mxu1 %v6656_v9 }
 0x3fa   : > { %2670 = vmatprep.mubr.bf16.mxu0 %v6178_v34  ;;  %3023 = vmatprep.mubr.bf16.mxu1 %v6178_v34 }
 0x3fc   : > { %v2016_v27 = vpop.f32.mrb[128].mxu0  ;;  %v2369_v28 = vpop.f32.mrb[128].mxu1 }
 0x3fd   : > { %v3265_v5 = vmax.f32 %v3264_v17, %v2016_v27  ;;  %v3403_v29 = vmax.f32 %v3402_v18, %v2369_v28  ;;  %v2018_v48 = vpop.f32.mrb[129].mxu0  ;;  %v2371_v30 = vpop.f32.mrb[129].mxu1 }
 0x3fe   : > { %v3334_v33 = vmax.f32 %v3333_v22, %v2018_v48  ;;  %v3472_v35 = vmax.f32 %v3471_v11, %v2371_v30  ;;  %v2020_v43 = vpop.f32.mrb[130].mxu0  ;;  %v2373_v36 = vpop.f32.mrb[130].mxu1 }
 0x3ff   : > { %v3266_v37 = vmax.f32 %v3265_v5, %v2020_v43  ;;  %v3404_v57 = vmax.f32 %v3403_v29, %v2373_v36  ;;  %v2022_v58 = vpop.f32.mrb[131].mxu0  ;;  %v2375_v47 = vpop.f32.mrb[131].mxu1 }
 0x400   : > { %v3335_v59 = vmax.f32 %v3334_v33, %v2022_v58  ;;  %v3473_v9 = vmax.f32 %v3472_v35, %v2375_v47 }
 0x401   : > { %2671 = vmatmul.mubr.bf16.gmra.mrb[236].mxu0 %v6654_v26  ;;  %3024 = vmatmul.mubr.bf16.gmra.mrb[236].mxu1 %v6654_v26 }
 0x402   : > { %2680 = vmatprep.mubr.bf16.mxu0 %v6178_v34  ;;  %3033 = vmatprep.mubr.bf16.mxu1 %v6178_v34 }
 0x404   : > { %v2026_v31 = vpop.f32.mrb[132].mxu0  ;;  %v2379_v60 = vpop.f32.mrb[132].mxu1 }
 0x405   : > { %v3267_v61 = vmax.f32 %v3266_v37, %v2026_v31  ;;  %v3405_v62 = vmax.f32 %v3404_v57, %v2379_v60  ;;  %v2028_v63 = vpop.f32.mrb[133].mxu0  ;;  %v2381_v4 = vpop.f32.mrb[133].mxu1 }
 0x406   : > { %v3336_v0 = vmax.f32 %v3335_v59, %v2028_v63  ;;  %v3474_v1 = vmax.f32 %v3473_v9, %v2381_v4  ;;  %v2030_v44 = vpop.f32.mrb[134].mxu0  ;;  %v2383_v12 = vpop.f32.mrb[134].mxu1 }
 0x407   : > { %v3268_v39 = vmax.f32 %v3267_v61, %v2030_v44  ;;  %v3406_v40 = vmax.f32 %v3405_v62, %v2383_v12  ;;  %v2032_v23 = vpop.f32.mrb[135].mxu0  ;;  %v2385_v6 = vpop.f32.mrb[135].mxu1 }
 0x408   : > { %v3337_v7 = vmax.f32 %v3336_v0, %v2032_v23  ;;  %v3475_v26 = vmax.f32 %v3474_v1, %v2385_v6 }
 0x409   : > { %2681 = vmatmul.mubr.bf16.gmra.mrb[240].mxu0 %v6668_v54  ;;  %3034 = vmatmul.mubr.bf16.gmra.mrb[240].mxu1 %v6668_v54 }
 0x40a   : > { %2690 = vmatprep.mubr.bf16.mxu0 %v6178_v34  ;;  %3043 = vmatprep.mubr.bf16.mxu1 %v6178_v34 }
 0x40c   : > { %v2036_v8 = vpop.f32.mrb[136].mxu0  ;;  %v2389_v10 = vpop.f32.mrb[136].mxu1 }
 0x40d   : > { %v3269_v46 = vmax.f32 %v3268_v39, %v2036_v8  ;;  %v3407_v13 = vmax.f32 %v3406_v40, %v2389_v10  ;;  %v2038_v14 = vpop.f32.mrb[137].mxu0  ;;  %v2391_v17 = vpop.f32.mrb[137].mxu1 }
 0x40e   : > { %v3338_v18 = vmax.f32 %v3337_v7, %v2038_v14  ;;  %v3476_v21 = vmax.f32 %v3475_v26, %v2391_v17  ;;  %v2040_v32 = vpop.f32.mrb[138].mxu0  ;;  %v2393_v22 = vpop.f32.mrb[138].mxu1 }
 0x40f   : > { %v3270_v11 = vmax.f32 %v3269_v46, %v2040_v32  ;;  %v3408_v27 = vmax.f32 %v3407_v13, %v2393_v22  ;;  %v2042_v28 = vpop.f32.mrb[139].mxu0  ;;  %v2395_v5 = vpop.f32.mrb[139].mxu1 }
 0x410   : > { %v3339_v29 = vmax.f32 %v3338_v18, %v2042_v28  ;;  %v3477_v54 = vmax.f32 %v3476_v21, %v2395_v5 }
 0x411   : > { %2691 = vmatmul.mubr.bf16.gmra.mrb[244].mxu0 %v6666_v52  ;;  %3044 = vmatmul.mubr.bf16.gmra.mrb[244].mxu1 %v6666_v52 }
 0x412   : > { %2700 = vmatprep.mubr.bf16.mxu0 %v6178_v34  ;;  %3053 = vmatprep.mubr.bf16.mxu1 %v6178_v34 }
 0x414   : > { %v2046_v48 = vpop.f32.mrb[140].mxu0  ;;  %v2399_v30 = vpop.f32.mrb[140].mxu1 }
 0x415   : > { %v3271_v33 = vmax.f32 %v3270_v11, %v2046_v48  ;;  %v3409_v35 = vmax.f32 %v3408_v27, %v2399_v30  ;;  %v2048_v43 = vpop.f32.mrb[141].mxu0  ;;  %v2401_v36 = vpop.f32.mrb[141].mxu1 }
 0x416   : > { %v3340_v37 = vmax.f32 %v3339_v29, %v2048_v43  ;;  %v3478_v57 = vmax.f32 %v3477_v54, %v2401_v36  ;;  %v2050_v58 = vpop.f32.mrb[142].mxu0  ;;  %v2403_v47 = vpop.f32.mrb[142].mxu1 }
 0x417   : > { %v3272_v59 = vmax.f32 %v3271_v33, %v2050_v58  ;;  %v3410_v9 = vmax.f32 %v3409_v35, %v2403_v47  ;;  %v2052_v31 = vpop.f32.mrb[143].mxu0  ;;  %v2405_v60 = vpop.f32.mrb[143].mxu1 }
 0x418   : > { %v3341_v61 = vmax.f32 %v3340_v37, %v2052_v31  ;;  %v3479_v52 = vmax.f32 %v3478_v57, %v2405_v60 }
 0x419   : > { %2701 = vmatmul.mubr.bf16.gmra.mrb[248].mxu0 %v6680_v3  ;;  %3054 = vmatmul.mubr.bf16.gmra.mrb[248].mxu1 %v6680_v3 }
 0x41a   : > { %2710 = vmatprep.mubr.bf16.mxu0 %v6178_v34  ;;  %3063 = vmatprep.mubr.bf16.mxu1 %v6178_v34 }
 0x41c   : > { %v2056_v62 = vpop.f32.mrb[144].mxu0  ;;  %v2409_v63 = vpop.f32.mrb[144].mxu1 }
 0x41d   : > { %v3273_v4 = vmax.f32 %v3272_v59, %v2056_v62  ;;  %v3411_v0 = vmax.f32 %v3410_v9, %v2409_v63  ;;  %v2058_v1 = vpop.f32.mrb[145].mxu0  ;;  %v2411_v44 = vpop.f32.mrb[145].mxu1 }
 0x41e   : > { %v3342_v12 = vmax.f32 %v3341_v61, %v2058_v1  ;;  %v3480_v39 = vmax.f32 %v3479_v52, %v2411_v44  ;;  %v2060_v40 = vpop.f32.mrb[146].mxu0  ;;  %v2413_v23 = vpop.f32.mrb[146].mxu1 }
 0x41f   : > { %v3274_v6 = vmax.f32 %v3273_v4, %v2060_v40  ;;  %v3412_v7 = vmax.f32 %v3411_v0, %v2413_v23  ;;  %v2062_v26 = vpop.f32.mrb[147].mxu0  ;;  %v2415_v8 = vpop.f32.mrb[147].mxu1 }
 0x420   : > { %v3343_v10 = vmax.f32 %v3342_v12, %v2062_v26  ;;  %v3481_v3 = vmax.f32 %v3480_v39, %v2415_v8 }
 0x421   : > { %2711 = vmatmul.mubr.bf16.gmra.mrb[252].mxu0 %v6678_v2  ;;  %3064 = vmatmul.mubr.bf16.gmra.mrb[252].mxu1 %v6678_v2 }
 0x422   : > { %2720 = vmatprep.mubr.bf16.mxu0 %v6178_v34  ;;  %3073 = vmatprep.mubr.bf16.mxu1 %v6178_v34 }
 0x424   : > { %v2066_v46 = vpop.f32.mrb[148].mxu0  ;;  %v2419_v13 = vpop.f32.mrb[148].mxu1 }
 0x425   : > { %v3275_v14 = vmax.f32 %v3274_v6, %v2066_v46  ;;  %v3413_v17 = vmax.f32 %v3412_v7, %v2419_v13  ;;  %v2068_v18 = vpop.f32.mrb[149].mxu0  ;;  %v2421_v21 = vpop.f32.mrb[149].mxu1 }
 0x426   : > { %v3344_v32 = vmax.f32 %v3343_v10, %v2068_v18  ;;  %v3482_v22 = vmax.f32 %v3481_v3, %v2421_v21  ;;  %v2070_v11 = vpop.f32.mrb[150].mxu0  ;;  %v2423_v27 = vpop.f32.mrb[150].mxu1 }
 0x427   : > { %v3276_v28 = vmax.f32 %v3275_v14, %v2070_v11  ;;  %v3414_v5 = vmax.f32 %v3413_v17, %v2423_v27  ;;  %v2072_v29 = vpop.f32.mrb[151].mxu0  ;;  %v2425_v54 = vpop.f32.mrb[151].mxu1 }
 0x428   : > { %v3345_v48 = vmax.f32 %v3344_v32, %v2072_v29  ;;  %v3483_v2 = vmax.f32 %v3482_v22, %v2425_v54 }
 0x429   : > { %2721 = vmatmul.mubr.bf16.gmra.mrb[0].mxu0 %v6692_v25  ;;  %3074 = vmatmul.mubr.bf16.gmra.mrb[0].mxu1 %v6692_v25 }
 0x42a   : > { %2730 = vmatprep.mubr.bf16.mxu0 %v6178_v34  ;;  %3083 = vmatprep.mubr.bf16.mxu1 %v6178_v34 }
 0x42c   : > { %v2076_v30 = vpop.f32.mrb[152].mxu0  ;;  %v2429_v33 = vpop.f32.mrb[152].mxu1 }
 0x42d   : > { %v3277_v35 = vmax.f32 %v3276_v28, %v2076_v30  ;;  %v3415_v43 = vmax.f32 %v3414_v5, %v2429_v33  ;;  %v2078_v36 = vpop.f32.mrb[153].mxu0  ;;  %v2431_v37 = vpop.f32.mrb[153].mxu1 }
 0x42e   : > { %v3346_v57 = vmax.f32 %v3345_v48, %v2078_v36  ;;  %v3484_v58 = vmax.f32 %v3483_v2, %v2431_v37  ;;  %v2080_v47 = vpop.f32.mrb[154].mxu0  ;;  %v2433_v59 = vpop.f32.mrb[154].mxu1 }
 0x42f   : > { %v3278_v9 = vmax.f32 %v3277_v35, %v2080_v47  ;;  %v3416_v31 = vmax.f32 %v3415_v43, %v2433_v59  ;;  %v2082_v60 = vpop.f32.mrb[155].mxu0  ;;  %v2435_v61 = vpop.f32.mrb[155].mxu1 }
 0x430   : > { %v3347_v52 = vmax.f32 %v3346_v57, %v2082_v60  ;;  %v3485_v25 = vmax.f32 %v3484_v58, %v2435_v61 }
 0x431   : > { %2731 = vmatmul.mubr.bf16.gmra.mrb[4].mxu0 %v6690_v24  ;;  %3084 = vmatmul.mubr.bf16.gmra.mrb[4].mxu1 %v6690_v24 }
 0x432   : > { %2740 = vmatprep.mubr.bf16.mxu0 %v6178_v34  ;;  %3093 = vmatprep.mubr.bf16.mxu1 %v6178_v34 }
 0x434   : > { %v2086_v62 = vpop.f32.mrb[156].mxu0  ;;  %v2439_v63 = vpop.f32.mrb[156].mxu1 }
 0x435   : > { %v3279_v4 = vmax.f32 %v3278_v9, %v2086_v62  ;;  %v3417_v0 = vmax.f32 %v3416_v31, %v2439_v63  ;;  %v2088_v1 = vpop.f32.mrb[157].mxu0  ;;  %v2441_v44 = vpop.f32.mrb[157].mxu1 }
 0x436   : > { %v3348_v12 = vmax.f32 %v3347_v52, %v2088_v1  ;;  %v3486_v39 = vmax.f32 %v3485_v25, %v2441_v44  ;;  %v2090_v40 = vpop.f32.mrb[158].mxu0  ;;  %v2443_v23 = vpop.f32.mrb[158].mxu1 }
 0x437   : > { %v3280_v6 = vmax.f32 %v3279_v4, %v2090_v40  ;;  %v3418_v7 = vmax.f32 %v3417_v0, %v2443_v23  ;;  %v2092_v26 = vpop.f32.mrb[159].mxu0  ;;  %v2445_v8 = vpop.f32.mrb[159].mxu1 }
 0x438   : > { %v3349_v10 = vmax.f32 %v3348_v12, %v2092_v26  ;;  %v3487_v24 = vmax.f32 %v3486_v39, %v2445_v8 }
 0x439   : > { %2741 = vmatmul.mubr.bf16.gmra.mrb[8].mxu0 %v6704_v56  ;;  %3094 = vmatmul.mubr.bf16.gmra.mrb[8].mxu1 %v6704_v56 }
 0x43a   : > { %2750 = vmatprep.mubr.bf16.mxu0 %v6178_v34  ;;  %3103 = vmatprep.mubr.bf16.mxu1 %v6178_v34 }
 0x43c   : > { %v2096_v3 = vpop.f32.mrb[160].mxu0  ;;  %v2449_v46 = vpop.f32.mrb[160].mxu1 }
 0x43d   : > { %v3281_v13 = vmax.f32 %v3280_v6, %v2096_v3  ;;  %v3419_v14 = vmax.f32 %v3418_v7, %v2449_v46  ;;  %v2098_v17 = vpop.f32.mrb[161].mxu0  ;;  %v2451_v18 = vpop.f32.mrb[161].mxu1 }
 0x43e   : > { %v3350_v21 = vmax.f32 %v3349_v10, %v2098_v17  ;;  %v3488_v32 = vmax.f32 %v3487_v24, %v2451_v18  ;;  %v2100_v22 = vpop.f32.mrb[162].mxu0  ;;  %v2453_v11 = vpop.f32.mrb[162].mxu1 }
 0x43f   : > { %v3282_v27 = vmax.f32 %v3281_v13, %v2100_v22  ;;  %v3420_v28 = vmax.f32 %v3419_v14, %v2453_v11  ;;  %v2102_v5 = vpop.f32.mrb[163].mxu0  ;;  %v2455_v29 = vpop.f32.mrb[163].mxu1 }
 0x440   : > { %v3351_v54 = vmax.f32 %v3350_v21, %v2102_v5  ;;  %v3489_v56 = vmax.f32 %v3488_v32, %v2455_v29 }
 0x441   : > { %2751 = vmatmul.mubr.bf16.gmra.mrb[12].mxu0 %v6702_v55  ;;  %3104 = vmatmul.mubr.bf16.gmra.mrb[12].mxu1 %v6702_v55 }
 0x442   : > { %2760 = vmatprep.mubr.bf16.mxu0 %v6178_v34  ;;  %3113 = vmatprep.mubr.bf16.mxu1 %v6178_v34 }
 0x444   : > { %v2106_v48 = vpop.f32.mrb[164].mxu0  ;;  %v2459_v2 = vpop.f32.mrb[164].mxu1 }
 0x445   : > { %v3283_v30 = vmax.f32 %v3282_v27, %v2106_v48  ;;  %v3421_v33 = vmax.f32 %v3420_v28, %v2459_v2  ;;  %v2108_v35 = vpop.f32.mrb[165].mxu0  ;;  %v2461_v43 = vpop.f32.mrb[165].mxu1 }
 0x446   : > { %v3352_v36 = vmax.f32 %v3351_v54, %v2108_v35  ;;  %v3490_v37 = vmax.f32 %v3489_v56, %v2461_v43  ;;  %v2110_v57 = vpop.f32.mrb[166].mxu0  ;;  %v2463_v58 = vpop.f32.mrb[166].mxu1 }
 0x447   : > { %v3284_v47 = vmax.f32 %v3283_v30, %v2110_v57  ;;  %v3422_v59 = vmax.f32 %v3421_v33, %v2463_v58  ;;  %v2112_v9 = vpop.f32.mrb[167].mxu0  ;;  %v2465_v31 = vpop.f32.mrb[167].mxu1 }
 0x448   : > { %v3353_v60 = vmax.f32 %v3352_v36, %v2112_v9  ;;  %v3491_v55 = vmax.f32 %v3490_v37, %v2465_v31 }
 0x449   : > { %2761 = vmatmul.mubr.bf16.gmra.mrb[16].mxu0 %v6716_v45  ;;  %3114 = vmatmul.mubr.bf16.gmra.mrb[16].mxu1 %v6716_v45 }
 0x44a   : > { %2770 = vmatprep.mubr.bf16.mxu0 %v6178_v34  ;;  %3123 = vmatprep.mubr.bf16.mxu1 %v6178_v34 }
 0x44c   : > { %v2116_v61 = vpop.f32.mrb[168].mxu0  ;;  %v2469_v52 = vpop.f32.mrb[168].mxu1 }
 0x44d   : > { %v3285_v25 = vmax.f32 %v3284_v47, %v2116_v61  ;;  %v3423_v62 = vmax.f32 %v3422_v59, %v2469_v52  ;;  %v2118_v63 = vpop.f32.mrb[169].mxu0  ;;  %v2471_v4 = vpop.f32.mrb[169].mxu1 }
 0x44e   : > { %v3354_v0 = vmax.f32 %v3353_v60, %v2118_v63  ;;  %v3492_v1 = vmax.f32 %v3491_v55, %v2471_v4  ;;  %v2120_v44 = vpop.f32.mrb[170].mxu0  ;;  %v2473_v12 = vpop.f32.mrb[170].mxu1  ;;  %v3801_v63 = vlaneseq }
 0x44f   : > { %v3286_v39 = vmax.f32 %v3285_v25, %v2120_v44  ;;  %v3424_v40 = vmax.f32 %v3423_v62, %v2473_v12  ;;  %v2122_v23 = vpop.f32.mrb[171].mxu0  ;;  %v2475_v6 = vpop.f32.mrb[171].mxu1 }
 0x450   : > { %v3355_v7 = vmax.f32 %v3354_v0, %v2122_v23  ;;  %v3493_v45 = vmax.f32 %v3492_v1, %v2475_v6 }
 0x451   : > { %2771 = vmatmul.mubr.bf16.gmra.mrb[20].mxu0 %v6714_v41  ;;  %3124 = vmatmul.mubr.bf16.gmra.mrb[20].mxu1 %v6714_v41 }
 0x452   : > { %2780 = vmatprep.mubr.bf16.mxu0 %v6178_v34  ;;  %3133 = vmatprep.mubr.bf16.mxu1 %v6178_v34 }
 0x454   : > { %v2126_v26 = vpop.f32.mrb[172].mxu0  ;;  %v2479_v8 = vpop.f32.mrb[172].mxu1 }
 0x455   : > { %v3287_v10 = vmax.f32 %v3286_v39, %v2126_v26  ;;  %v3425_v24 = vmax.f32 %v3424_v40, %v2479_v8  ;;  %v2128_v3 = vpop.f32.mrb[173].mxu0  ;;  %v2481_v46 = vpop.f32.mrb[173].mxu1  ;;  %v6946_v39 = vshrl.u32 %v3801_v63, 7 }
 0x456   : > { %v3356_v13 = vmax.f32 %v3355_v7, %v2128_v3  ;;  %v3494_v14 = vmax.f32 %v3493_v45, %v2481_v46  ;;  %v2130_v17 = vpop.f32.mrb[174].mxu0  ;;  %v2483_v18 = vpop.f32.mrb[174].mxu1 }
 0x457   : > { %v3288_v21 = vmax.f32 %v3287_v10, %v2130_v17  ;;  %v3426_v32 = vmax.f32 %v3425_v24, %v2483_v18  ;;  %v2132_v22 = vpop.f32.mrb[175].mxu0  ;;  %v2485_v11 = vpop.f32.mrb[175].mxu1  ;;  %v6949_v46 = vadd.s32 496, %v6946_v39 }
 0x458   : > { %v3357_v27 = vmax.f32 %v3356_v13, %v2132_v22  ;;  %v3495_v41 = vmax.f32 %v3494_v14, %v2485_v11 }
 0x459   : > { %2781 = vmatmul.mubr.bf16.gmra.mrb[24].mxu0 %v6728_v20  ;;  %3134 = vmatmul.mubr.bf16.gmra.mrb[24].mxu1 %v6728_v20  ;;  %vm3976_vm2 = vcmp.lt.s32.totalorder %v6949_v46, 500 }
 0x45a   : > { %2790 = vmatprep.mubr.bf16.mxu0 %v6178_v34  ;;  %3143 = vmatprep.mubr.bf16.mxu1 %v6178_v34 }
 0x45c   : > { %v2136_v28 = vpop.f32.mrb[176].mxu0  ;;  %v2489_v5 = vpop.f32.mrb[176].mxu1 }
 0x45d   : > { %v3289_v29 = vmax.f32 %v3288_v21, %v2136_v28  ;;  %v3427_v54 = vmax.f32 %v3426_v32, %v2489_v5  ;;  %v2138_v56 = vpop.f32.mrb[177].mxu0  ;;  %v2491_v48 = vpop.f32.mrb[177].mxu1 }
 0x45e   : > { %v3358_v2 = vmax.f32 %v3357_v27, %v2138_v56  ;;  %v3496_v30 = vmax.f32 %v3495_v41, %v2491_v48  ;;  %v2140_v33 = vpop.f32.mrb[178].mxu0  ;;  %v2493_v35 = vpop.f32.mrb[178].mxu1 }
 0x45f   : > { %v3290_v43 = vmax.f32 %v3289_v29, %v2140_v33  ;;  %v3428_v36 = vmax.f32 %v3427_v54, %v2493_v35  ;;  %v2142_v37 = vpop.f32.mrb[179].mxu0  ;;  %v2495_v57 = vpop.f32.mrb[179].mxu1 }
 0x460   : > { %v3359_v58 = vmax.f32 %v3358_v2, %v2142_v37  ;;  %v3497_v20 = vmax.f32 %v3496_v30, %v2495_v57 }
 0x461   : > { %2791 = vmatmul.mubr.bf16.gmra.mrb[28].mxu0 %v6726_v19  ;;  %3144 = vmatmul.mubr.bf16.gmra.mrb[28].mxu1 %v6726_v19 }
 0x462   : > { %2800 = vmatprep.mubr.bf16.mxu0 %v6178_v34  ;;  %3153 = vmatprep.mubr.bf16.mxu1 %v6178_v34 }
 0x464   : > { %v2146_v47 = vpop.f32.mrb[180].mxu0  ;;  %v2499_v59 = vpop.f32.mrb[180].mxu1 }
 0x465   : > { %v3291_v9 = vmax.f32 %v3290_v43, %v2146_v47  ;;  %v3429_v31 = vmax.f32 %v3428_v36, %v2499_v59  ;;  %v2148_v60 = vpop.f32.mrb[181].mxu0  ;;  %v2501_v55 = vpop.f32.mrb[181].mxu1  ;;  %v6179_v47 = vmov 1966171168  }
 0x466   : > { %v3360_v61 = vmax.f32 %v3359_v58, %v2148_v60  ;;  %v3498_v52 = vmax.f32 %v3497_v20, %v2501_v55  ;;  %v2150_v25 = vpop.f32.mrb[182].mxu0  ;;  %v2503_v62 = vpop.f32.mrb[182].mxu1  ;;  %v3799_v59 = vunpack.c.l.s4 %v6179_v47 }
 0x467   : > { %v3292_v4 = vmax.f32 %v3291_v9, %v2150_v25  ;;  %v3430_v0 = vmax.f32 %v3429_v31, %v2503_v62  ;;  %v2152_v1 = vpop.f32.mrb[183].mxu0  ;;  %v2505_v44 = vpop.f32.mrb[183].mxu1 }
 0x468   : > { %v3361_v19 = vmax.f32 %v3360_v61, %v2152_v1  ;;  %v3499_v12 = vmax.f32 %v3498_v52, %v2505_v44  ;;  %v3800_v1 = vunpack.c.0.s8 %v3799_v59 }
 0x469   : > { %2801 = vmatmul.mubr.bf16.gmra.mrb[32].mxu0 %v6740_v51  ;;  %3154 = vmatmul.mubr.bf16.gmra.mrb[32].mxu1 %v6740_v51 }
 0x46a   : > { %2810 = vmatprep.mubr.bf16.mxu0 %v6178_v34  ;;  %3163 = vmatprep.mubr.bf16.mxu1 %v6178_v34 }
 0x46c   : > { %v2156_v40 = vpop.f32.mrb[184].mxu0  ;;  %v2509_v23 = vpop.f32.mrb[184].mxu1 }
 0x46d   : > { %v3293_v6 = vmax.f32 %v3292_v4, %v2156_v40  ;;  %v3431_v7 = vmax.f32 %v3430_v0, %v2509_v23  ;;  %v2158_v45 = vpop.f32.mrb[185].mxu0  ;;  %v2511_v26 = vpop.f32.mrb[185].mxu1 }
 0x46e   : > { %v3362_v8 = vmax.f32 %v3361_v19, %v2158_v45  ;;  %v3500_v10 = vmax.f32 %v3499_v12, %v2511_v26  ;;  %v2160_v24 = vpop.f32.mrb[186].mxu0  ;;  %v2513_v3 = vpop.f32.mrb[186].mxu1 }
 0x46f   : > { %v3294_v51 = vmax.f32 %v3293_v6, %v2160_v24  ;;  %v3432_v13 = vmax.f32 %v3431_v7, %v2513_v3  ;;  %v2162_v14 = vpop.f32.mrb[187].mxu0  ;;  %v2515_v17 = vpop.f32.mrb[187].mxu1 }
 0x470   : > { %v3363_v18 = vmax.f32 %v3362_v8, %v2162_v14  ;;  %v3501_v21 = vmax.f32 %v3500_v10, %v2515_v17  ;;  %v6973_v17 = vsub.s32 %v3800_v1, %v6946_v39 }
 0x471   : > { %2811 = vmatmul.mubr.bf16.gmra.mrb[36].mxu0 %v6738_v50  ;;  %3164 = vmatmul.mubr.bf16.gmra.mrb[36].mxu1 %v6738_v50 }
 0x472   : > { %2820 = vmatprep.mubr.bf16.mxu0 %v6178_v34  ;;  %3173 = vmatprep.mubr.bf16.mxu1 %v6178_v34 }
 0x474   : > { %v2166_v32 = vpop.f32.mrb[188].mxu0  ;;  %v2519_v22 = vpop.f32.mrb[188].mxu1 }
 0x475   : > { %v4474_v11 = vsel %vm3976_vm2, %v2166_v32, -inf  ;;  %v4476_v27 = vsel %vm3976_vm2, %v2519_v22, -inf  ;;  %v2168_v41 = vpop.f32.mrb[189].mxu0  ;;  %v2521_v28 = vpop.f32.mrb[189].mxu1 }
 0x476   : > { %v4551_v5 = vmax.f32 %v3294_v51, %v4474_v11  ;;  %v4689_v29 = vmax.f32 %v3432_v13, %v4476_v27  ;;  %v4475_v50 = vsel %vm3976_vm2, %v2168_v41, -inf  ;;  %v4477_v54 = vsel %vm3976_vm2, %v2521_v28, -inf  ;;  %v2170_v56 = vpop.f32.mrb[190].mxu0  ;;  %v2523_v48 = vpop.f32.mrb[190].mxu1 }
 0x477   : > { %v4620_v2 = vmax.f32 %v3363_v18, %v4475_v50  ;;  %v4758_v30 = vmax.f32 %v3501_v21, %v4477_v54  ;;  %v2172_v33 = vpop.f32.mrb[191].mxu0  ;;  %v2525_v35 = vpop.f32.mrb[191].mxu1 }
 0x478   : > { %v4553_v43 = vrot.slane %v4551_v5, 4  ;;  %v4691_v36 = vrot.slane %v4689_v29, 4 }
 0x479   : > { %v4622_v37 = vrot.slane %v4620_v2, 4  ;;  %v4760_v57 = vrot.slane %v4758_v30, 4  ;;  %2821 = vmatmul.mubr.bf16.gmra.mrb[40].mxu0 %v6752_v16  ;;  %3174 = vmatmul.mubr.bf16.gmra.mrb[40].mxu1 %v6752_v16 }
 0x47a   : > { %v4554_v58 = vmax.f32 %v4551_v5, %v4553_v43  ;;  %v4692_v20 = vmax.f32 %v4689_v29, %v4691_v36  ;;  %2830 = vmatprep.mubr.bf16.mxu0 %v6178_v34  ;;  %3183 = vmatprep.mubr.bf16.mxu1 %v6178_v34 }
 0x47b   : > { %v4623_v9 = vmax.f32 %v4620_v2, %v4622_v37  ;;  %v4761_v31 = vmax.f32 %v4758_v30, %v4760_v57 }
 0x47c   : > { %v4555_v60 = vrot.slane %v4554_v58, 2  ;;  %v4693_v55 = vrot.slane %v4692_v20, 2  ;;  %v2562_v61 = vpop.f32.mrb[192].mxu0  ;;  %v2915_v52 = vpop.f32.mrb[192].mxu1 }
 0x47d   : > { %v4624_v25 = vrot.slane %v4623_v9, 2  ;;  %v4762_v62 = vrot.slane %v4761_v31, 2  ;;  %v2564_v63 = vpop.f32.mrb[193].mxu0  ;;  %v2917_v4 = vpop.f32.mrb[193].mxu1 }
 0x47e   : > { %v4556_v0 = vmax.f32 %v4554_v58, %v4555_v60  ;;  %v4694_v16 = vmax.f32 %v4692_v20, %v4693_v55  ;;  %v2566_v44 = vpop.f32.mrb[194].mxu0  ;;  %v2919_v19 = vpop.f32.mrb[194].mxu1 }
 0x47f   : > { %v4625_v12 = vmax.f32 %v4623_v9, %v4624_v25  ;;  %v4763_v40 = vmax.f32 %v4761_v31, %v4762_v62  ;;  %v3510_v23 = vmax.f32 %v2562_v61, %v2566_v44  ;;  %v3648_v6 = vmax.f32 %v2915_v52, %v2919_v19  ;;  %v2568_v7 = vpop.f32.mrb[195].mxu0  ;;  %v2921_v45 = vpop.f32.mrb[195].mxu1 }
 0x480   : > { %v4557_v26 = vrot.slane %v4556_v0, 1  ;;  %v4695_v8 = vrot.slane %v4694_v16, 1  ;;  %v3579_v10 = vmax.f32 %v2564_v63, %v2568_v7  ;;  %v3717_v24 = vmax.f32 %v2917_v4, %v2921_v45 }
 0x481   : > { %v4626_v3 = vrot.slane %v4625_v12, 1  ;;  %v4764_v51 = vrot.slane %v4763_v40, 1  ;;  %2831 = vmatmul.mubr.bf16.gmra.mrb[44].mxu0 %v6750_v15  ;;  %3184 = vmatmul.mubr.bf16.gmra.mrb[44].mxu1 %v6750_v15 }
 0x482   : > { %v4558_v13 = vmax.f32 %v4556_v0, %v4557_v26  ;;  %v4696_v14 = vmax.f32 %v4694_v16, %v4695_v8  ;;  %2840 = vmatprep.mubr.bf16.mxu0 %v6178_v34  ;;  %3193 = vmatprep.mubr.bf16.mxu1 %v6178_v34 }
 0x483   : > { %v4627_v18 = vmax.f32 %v4625_v12, %v4626_v3  ;;  %v4765_v21 = vmax.f32 %v4763_v40, %v4764_v51 }
 0x484   : > { %v2572_v32 = vpop.f32.mrb[196].mxu0  ;;  %v2925_v22 = vpop.f32.mrb[196].mxu1 }
 0x485   : > { %v5050_v11 = vcombine.low %v4558_v13, %v4627_v18  ;;  %v5051_v27 = vcombine.low %v4696_v14, %v4765_v21  ;;  %v3511_v41 = vmax.f32 %v3510_v23, %v2572_v32  ;;  %v3649_v28 = vmax.f32 %v3648_v6, %v2925_v22  ;;  %v2574_v5 = vpop.f32.mrb[197].mxu0  ;;  %v2927_v29 = vpop.f32.mrb[197].mxu1 }
 0x486   : > { %v3580_v15 = vmax.f32 %v3579_v10, %v2574_v5  ;;  %v3718_v50 = vmax.f32 %v3717_v24, %v2927_v29  ;;  %v2576_v54 = vpop.f32.mrb[198].mxu0  ;;  %v2929_v56 = vpop.f32.mrb[198].mxu1 }
 0x487   : > { %v6976_v48 = vrot.slane %v5050_v11, %v6973_v17  ;;  %v6979_v2 = vrot.slane %v5051_v27, %v6973_v17  ;;  %v3512_v30 = vmax.f32 %v3511_v41, %v2576_v54  ;;  %v3650_v33 = vmax.f32 %v3649_v28, %v2929_v56  ;;  %v2578_v35 = vpop.f32.mrb[199].mxu0  ;;  %v2931_v43 = vpop.f32.mrb[199].mxu1 }
 0x488   : > { %v3581_v36 = vmax.f32 %v3580_v15, %v2578_v35  ;;  %v3719_v37 = vmax.f32 %v3718_v50, %v2931_v43 }
 0x489   : > { %v5082_v57 = vcombine.low %v6976_v48, %v6979_v2  ;;  %2841 = vmatmul.mubr.bf16.gmra.mrb[48].mxu0 %v6764_v42  ;;  %3194 = vmatmul.mubr.bf16.gmra.mrb[48].mxu1 %v6764_v42  ;;  %v5125_v48 = vsub.s32 5, %v6946_v39  ;;  %v5129_v2 = vsub.s32 6, %v6946_v39 }
 0x48a   : > { %2850 = vmatprep.mubr.bf16.mxu0 %v6178_v34  ;;  %3203 = vmatprep.mubr.bf16.mxu1 %v6178_v34 }
 0x48c   : > { %v2582_v58 = vpop.f32.mrb[200].mxu0  ;;  %v2935_v20 = vpop.f32.mrb[200].mxu1 }
 0x48d   : > { %v3513_v47 = vmax.f32 %v3512_v30, %v2582_v58  ;;  %v3651_v59 = vmax.f32 %v3650_v33, %v2935_v20  ;;  %v2584_v9 = vpop.f32.mrb[201].mxu0  ;;  %v2937_v31 = vpop.f32.mrb[201].mxu1 }
 0x48e   : > { %v3582_v60 = vmax.f32 %v3581_v36, %v2584_v9  ;;  %v3720_v55 = vmax.f32 %v3719_v37, %v2937_v31  ;;  %v2586_v61 = vpop.f32.mrb[202].mxu0  ;;  %v2939_v52 = vpop.f32.mrb[202].mxu1 }
 0x48f   : > { %v3514_v25 = vmax.f32 %v3513_v47, %v2586_v61  ;;  %v3652_v62 = vmax.f32 %v3651_v59, %v2939_v52  ;;  %v2588_v63 = vpop.f32.mrb[203].mxu0  ;;  %v2941_v4 = vpop.f32.mrb[203].mxu1 }
 0x490   : > { %v3583_v0 = vmax.f32 %v3582_v60, %v2588_v63  ;;  %v3721_v42 = vmax.f32 %v3720_v55, %v2941_v4 }
 0x491   : > { %2851 = vmatmul.mubr.bf16.gmra.mrb[52].mxu0 %v6762_v38  ;;  %3204 = vmatmul.mubr.bf16.gmra.mrb[52].mxu1 %v6762_v38 }
 0x492   : > { %2860 = vmatprep.mubr.bf16.mxu0 %v6178_v34  ;;  %3213 = vmatprep.mubr.bf16.mxu1 %v6178_v34 }
 0x494   : > { %v2592_v16 = vpop.f32.mrb[204].mxu0  ;;  %v2945_v1 = vpop.f32.mrb[204].mxu1 }
 0x495   : > { %v3515_v44 = vmax.f32 %v3514_v25, %v2592_v16  ;;  %v3653_v19 = vmax.f32 %v3652_v62, %v2945_v1  ;;  %v2594_v12 = vpop.f32.mrb[205].mxu0  ;;  %v2947_v40 = vpop.f32.mrb[205].mxu1 }
 0x496   : > { %v3584_v23 = vmax.f32 %v3583_v0, %v2594_v12  ;;  %v3722_v6 = vmax.f32 %v3721_v42, %v2947_v40  ;;  %v2596_v7 = vpop.f32.mrb[206].mxu0  ;;  %v2949_v45 = vpop.f32.mrb[206].mxu1 }
 0x497   : > { %v3516_v26 = vmax.f32 %v3515_v44, %v2596_v7  ;;  %v3654_v8 = vmax.f32 %v3653_v19, %v2949_v45  ;;  %v2598_v10 = vpop.f32.mrb[207].mxu0  ;;  %v2951_v24 = vpop.f32.mrb[207].mxu1 }
 0x498   : > { %v3585_v3 = vmax.f32 %v3584_v23, %v2598_v10  ;;  %v3723_v38 = vmax.f32 %v3722_v6, %v2951_v24 }
 0x499   : > { %2861 = vmatmul.mubr.bf16.gmra.mrb[56].mxu0 %v6776_v53  ;;  %3214 = vmatmul.mubr.bf16.gmra.mrb[56].mxu1 %v6776_v53 }
 0x49a   : > { %2870 = vmatprep.mubr.bf16.mxu0 %v6178_v34  ;;  %3223 = vmatprep.mubr.bf16.mxu1 %v6178_v34 }
 0x49c   : > { %v2602_v51 = vpop.f32.mrb[208].mxu0  ;;  %v2955_v13 = vpop.f32.mrb[208].mxu1 }
 0x49d   : > { %v3517_v14 = vmax.f32 %v3516_v26, %v2602_v51  ;;  %v3655_v18 = vmax.f32 %v3654_v8, %v2955_v13  ;;  %v2604_v21 = vpop.f32.mrb[209].mxu0  ;;  %v2957_v32 = vpop.f32.mrb[209].mxu1 }
 0x49e   : > { %v3586_v22 = vmax.f32 %v3585_v3, %v2604_v21  ;;  %v3724_v11 = vmax.f32 %v3723_v38, %v2957_v32  ;;  %v2606_v27 = vpop.f32.mrb[210].mxu0  ;;  %v2959_v41 = vpop.f32.mrb[210].mxu1 }
 0x49f   : > { %v3518_v28 = vmax.f32 %v3517_v14, %v2606_v27  ;;  %v3656_v5 = vmax.f32 %v3655_v18, %v2959_v41  ;;  %v2608_v29 = vpop.f32.mrb[211].mxu0  ;;  %v2961_v15 = vpop.f32.mrb[211].mxu1 }
 0x4a0   : > { %v3587_v50 = vmax.f32 %v3586_v22, %v2608_v29  ;;  %v3725_v53 = vmax.f32 %v3724_v11, %v2961_v15 }
 0x4a1   : > { %2871 = vmatmul.mubr.bf16.gmra.mrb[60].mxu0 %v6774_v49  ;;  %3224 = vmatmul.mubr.bf16.gmra.mrb[60].mxu1 %v6774_v49 }
 0x4a4   : > { %v2612_v34 = vpop.f32.mrb[212].mxu0  ;;  %v2965_v54 = vpop.f32.mrb[212].mxu1 }
 0x4a5   : > { %v3519_v56 = vmax.f32 %v3518_v28, %v2612_v34  ;;  %v3657_v30 = vmax.f32 %v3656_v5, %v2965_v54  ;;  %v2614_v33 = vpop.f32.mrb[213].mxu0  ;;  %v2967_v35 = vpop.f32.mrb[213].mxu1 }
 0x4a6   : > { %v3588_v43 = vmax.f32 %v3587_v50, %v2614_v33  ;;  %v3726_v36 = vmax.f32 %v3725_v53, %v2967_v35  ;;  %v2616_v37 = vpop.f32.mrb[214].mxu0  ;;  %v2969_v58 = vpop.f32.mrb[214].mxu1 }
 0x4a7   : > { %v3520_v20 = vmax.f32 %v3519_v56, %v2616_v37  ;;  %v3658_v47 = vmax.f32 %v3657_v30, %v2969_v58  ;;  %v2618_v59 = vpop.f32.mrb[215].mxu0  ;;  %v2971_v9 = vpop.f32.mrb[215].mxu1 }
 0x4a8   : > { %v3589_v31 = vmax.f32 %v3588_v43, %v2618_v59  ;;  %v3727_v60 = vmax.f32 %v3726_v36, %v2971_v9 }
 0x4ac   : > { %v2622_v55 = vpop.f32.mrb[216].mxu0  ;;  %v2975_v61 = vpop.f32.mrb[216].mxu1 }
 0x4ad   : > { %v3521_v52 = vmax.f32 %v3520_v20, %v2622_v55  ;;  %v3659_v49 = vmax.f32 %v3658_v47, %v2975_v61  ;;  %v2624_v25 = vpop.f32.mrb[217].mxu0  ;;  %v2977_v62 = vpop.f32.mrb[217].mxu1 }
 0x4ae   : > { %v3590_v63 = vmax.f32 %v3589_v31, %v2624_v25  ;;  %v3728_v4 = vmax.f32 %v3727_v60, %v2977_v62  ;;  %v2626_v0 = vpop.f32.mrb[218].mxu0  ;;  %v2979_v42 = vpop.f32.mrb[218].mxu1 }
 0x4af   : > { %v3522_v16 = vmax.f32 %v3521_v52, %v2626_v0  ;;  %v3660_v1 = vmax.f32 %v3659_v49, %v2979_v42  ;;  %v2628_v44 = vpop.f32.mrb[219].mxu0  ;;  %v2981_v19 = vpop.f32.mrb[219].mxu1 }
 0x4b0   : > { %v3591_v12 = vmax.f32 %v3590_v63, %v2628_v44  ;;  %v3729_v40 = vmax.f32 %v3728_v4, %v2981_v19 }
 0x4b4   : > { %v2632_v23 = vpop.f32.mrb[220].mxu0  ;;  %v2985_v6 = vpop.f32.mrb[220].mxu1 }
 0x4b5   : > { %v3523_v7 = vmax.f32 %v3522_v16, %v2632_v23  ;;  %v3661_v45 = vmax.f32 %v3660_v1, %v2985_v6  ;;  %v2634_v26 = vpop.f32.mrb[221].mxu0  ;;  %v2987_v8 = vpop.f32.mrb[221].mxu1 }
 0x4b6   : > { %v3592_v10 = vmax.f32 %v3591_v12, %v2634_v26  ;;  %v3730_v24 = vmax.f32 %v3729_v40, %v2987_v8  ;;  %v2636_v3 = vpop.f32.mrb[222].mxu0  ;;  %v2989_v38 = vpop.f32.mrb[222].mxu1 }
 0x4b7   : > { %v3524_v51 = vmax.f32 %v3523_v7, %v2636_v3  ;;  %v3662_v13 = vmax.f32 %v3661_v45, %v2989_v38  ;;  %v2638_v14 = vpop.f32.mrb[223].mxu0  ;;  %v2991_v18 = vpop.f32.mrb[223].mxu1 }
 0x4b8   : > { %v3593_v21 = vmax.f32 %v3592_v10, %v2638_v14  ;;  %v3731_v32 = vmax.f32 %v3730_v24, %v2991_v18 }
 0x4bc   : > { %v2642_v22 = vpop.f32.mrb[224].mxu0  ;;  %v2995_v11 = vpop.f32.mrb[224].mxu1 }
 0x4bd   : > { %v3525_v27 = vmax.f32 %v3524_v51, %v2642_v22  ;;  %v3663_v41 = vmax.f32 %v3662_v13, %v2995_v11  ;;  %v2644_v28 = vpop.f32.mrb[225].mxu0  ;;  %v2997_v5 = vpop.f32.mrb[225].mxu1 }
 0x4be   : > { %v3594_v29 = vmax.f32 %v3593_v21, %v2644_v28  ;;  %v3732_v15 = vmax.f32 %v3731_v32, %v2997_v5  ;;  %v2646_v50 = vpop.f32.mrb[226].mxu0  ;;  %v2999_v53 = vpop.f32.mrb[226].mxu1 }
 0x4bf   : > { %v3526_v34 = vmax.f32 %v3525_v27, %v2646_v50  ;;  %v3664_v54 = vmax.f32 %v3663_v41, %v2999_v53  ;;  %v2648_v56 = vpop.f32.mrb[227].mxu0  ;;  %v3001_v30 = vpop.f32.mrb[227].mxu1 }
 0x4c0   : > { %v3595_v33 = vmax.f32 %v3594_v29, %v2648_v56  ;;  %v3733_v35 = vmax.f32 %v3732_v15, %v3001_v30 }
 0x4c4   : > { %v2652_v43 = vpop.f32.mrb[228].mxu0  ;;  %v3005_v36 = vpop.f32.mrb[228].mxu1 }
 0x4c5   : > { %v3527_v37 = vmax.f32 %v3526_v34, %v2652_v43  ;;  %v3665_v58 = vmax.f32 %v3664_v54, %v3005_v36  ;;  %v2654_v20 = vpop.f32.mrb[229].mxu0  ;;  %v3007_v47 = vpop.f32.mrb[229].mxu1 }
 0x4c6   : > { %v3596_v59 = vmax.f32 %v3595_v33, %v2654_v20  ;;  %v3734_v9 = vmax.f32 %v3733_v35, %v3007_v47  ;;  %v2656_v31 = vpop.f32.mrb[230].mxu0  ;;  %v3009_v60 = vpop.f32.mrb[230].mxu1 }
 0x4c7   : > { %v3528_v55 = vmax.f32 %v3527_v37, %v2656_v31  ;;  %v3666_v61 = vmax.f32 %v3665_v58, %v3009_v60  ;;  %v2658_v52 = vpop.f32.mrb[231].mxu0  ;;  %v3011_v49 = vpop.f32.mrb[231].mxu1 }
 0x4c8   : > { %v3597_v25 = vmax.f32 %v3596_v59, %v2658_v52  ;;  %v3735_v62 = vmax.f32 %v3734_v9, %v3011_v49 }
 0x4cc   : > { %v2662_v63 = vpop.f32.mrb[232].mxu0  ;;  %v3015_v4 = vpop.f32.mrb[232].mxu1 }
 0x4cd   : > { %v3529_v0 = vmax.f32 %v3528_v55, %v2662_v63  ;;  %v3667_v42 = vmax.f32 %v3666_v61, %v3015_v4  ;;  %v2664_v16 = vpop.f32.mrb[233].mxu0  ;;  %v3017_v1 = vpop.f32.mrb[233].mxu1 }
 0x4ce   : > { %v3598_v44 = vmax.f32 %v3597_v25, %v2664_v16  ;;  %v3736_v19 = vmax.f32 %v3735_v62, %v3017_v1  ;;  %v2666_v12 = vpop.f32.mrb[234].mxu0  ;;  %v3019_v40 = vpop.f32.mrb[234].mxu1 }
 0x4cf   : > { %v3530_v23 = vmax.f32 %v3529_v0, %v2666_v12  ;;  %v3668_v6 = vmax.f32 %v3667_v42, %v3019_v40  ;;  %v2668_v7 = vpop.f32.mrb[235].mxu0  ;;  %v3021_v45 = vpop.f32.mrb[235].mxu1 }
 0x4d0   : > { %v3599_v26 = vmax.f32 %v3598_v44, %v2668_v7  ;;  %v3737_v8 = vmax.f32 %v3736_v19, %v3021_v45 }
 0x4d4   : > { %v2672_v10 = vpop.f32.mrb[236].mxu0  ;;  %v3025_v24 = vpop.f32.mrb[236].mxu1 }
 0x4d5   : > { %v3531_v3 = vmax.f32 %v3530_v23, %v2672_v10  ;;  %v3669_v38 = vmax.f32 %v3668_v6, %v3025_v24  ;;  %v2674_v51 = vpop.f32.mrb[237].mxu0  ;;  %v3027_v13 = vpop.f32.mrb[237].mxu1 }
 0x4d6   : > { %v3600_v14 = vmax.f32 %v3599_v26, %v2674_v51  ;;  %v3738_v18 = vmax.f32 %v3737_v8, %v3027_v13  ;;  %v2676_v21 = vpop.f32.mrb[238].mxu0  ;;  %v3029_v32 = vpop.f32.mrb[238].mxu1 }
 0x4d7   : > { %v3532_v22 = vmax.f32 %v3531_v3, %v2676_v21  ;;  %v3670_v11 = vmax.f32 %v3669_v38, %v3029_v32  ;;  %v2678_v27 = vpop.f32.mrb[239].mxu0  ;;  %v3031_v41 = vpop.f32.mrb[239].mxu1 }
 0x4d8   : > { %v3601_v28 = vmax.f32 %v3600_v14, %v2678_v27  ;;  %v3739_v5 = vmax.f32 %v3738_v18, %v3031_v41 }
 0x4dc   : > { %v2682_v29 = vpop.f32.mrb[240].mxu0  ;;  %v3035_v15 = vpop.f32.mrb[240].mxu1 }
 0x4dd   : > { %v3533_v50 = vmax.f32 %v3532_v22, %v2682_v29  ;;  %v3671_v53 = vmax.f32 %v3670_v11, %v3035_v15  ;;  %v2684_v34 = vpop.f32.mrb[241].mxu0  ;;  %v3037_v54 = vpop.f32.mrb[241].mxu1 }
 0x4de   : > { %v3602_v56 = vmax.f32 %v3601_v28, %v2684_v34  ;;  %v3740_v30 = vmax.f32 %v3739_v5, %v3037_v54  ;;  %v2686_v33 = vpop.f32.mrb[242].mxu0  ;;  %v3039_v35 = vpop.f32.mrb[242].mxu1 }
 0x4df   : > { %v3534_v43 = vmax.f32 %v3533_v50, %v2686_v33  ;;  %v3672_v36 = vmax.f32 %v3671_v53, %v3039_v35  ;;  %v2688_v37 = vpop.f32.mrb[243].mxu0  ;;  %v3041_v58 = vpop.f32.mrb[243].mxu1 }
 0x4e0   : > { %v3603_v20 = vmax.f32 %v3602_v56, %v2688_v37  ;;  %v3741_v47 = vmax.f32 %v3740_v30, %v3041_v58 }
 0x4e4   : > { %v2692_v59 = vpop.f32.mrb[244].mxu0  ;;  %v3045_v9 = vpop.f32.mrb[244].mxu1 }
 0x4e5   : > { %v3535_v31 = vmax.f32 %v3534_v43, %v2692_v59  ;;  %v3673_v60 = vmax.f32 %v3672_v36, %v3045_v9  ;;  %v2694_v55 = vpop.f32.mrb[245].mxu0  ;;  %v3047_v61 = vpop.f32.mrb[245].mxu1 }
 0x4e6   : > { %v3604_v52 = vmax.f32 %v3603_v20, %v2694_v55  ;;  %v3742_v49 = vmax.f32 %v3741_v47, %v3047_v61  ;;  %v2696_v25 = vpop.f32.mrb[246].mxu0  ;;  %v3049_v62 = vpop.f32.mrb[246].mxu1 }
 0x4e7   : > { %v3536_v63 = vmax.f32 %v3535_v31, %v2696_v25  ;;  %v3674_v4 = vmax.f32 %v3673_v60, %v3049_v62  ;;  %v2698_v0 = vpop.f32.mrb[247].mxu0  ;;  %v3051_v42 = vpop.f32.mrb[247].mxu1 }
 0x4e8   : > { %v3605_v16 = vmax.f32 %v3604_v52, %v2698_v0  ;;  %v3743_v1 = vmax.f32 %v3742_v49, %v3051_v42 }
 0x4ec   : > { %v2702_v44 = vpop.f32.mrb[248].mxu0  ;;  %v3055_v19 = vpop.f32.mrb[248].mxu1 }
 0x4ed   : > { %v3537_v12 = vmax.f32 %v3536_v63, %v2702_v44  ;;  %v3675_v40 = vmax.f32 %v3674_v4, %v3055_v19  ;;  %v2704_v23 = vpop.f32.mrb[249].mxu0  ;;  %v3057_v6 = vpop.f32.mrb[249].mxu1 }
 0x4ee   : > { %v3606_v7 = vmax.f32 %v3605_v16, %v2704_v23  ;;  %v3744_v45 = vmax.f32 %v3743_v1, %v3057_v6  ;;  %v2706_v26 = vpop.f32.mrb[250].mxu0  ;;  %v3059_v8 = vpop.f32.mrb[250].mxu1 }
 0x4ef   : > { %v3538_v10 = vmax.f32 %v3537_v12, %v2706_v26  ;;  %v3676_v24 = vmax.f32 %v3675_v40, %v3059_v8  ;;  %v2708_v3 = vpop.f32.mrb[251].mxu0  ;;  %v3061_v38 = vpop.f32.mrb[251].mxu1 }
 0x4f0   : > { %v3607_v51 = vmax.f32 %v3606_v7, %v2708_v3  ;;  %v3745_v13 = vmax.f32 %v3744_v45, %v3061_v38 }
 0x4f4   : > { %v2712_v14 = vpop.f32.mrb[252].mxu0  ;;  %v3065_v18 = vpop.f32.mrb[252].mxu1 }
 0x4f5   : > { %v3539_v21 = vmax.f32 %v3538_v10, %v2712_v14  ;;  %v3677_v32 = vmax.f32 %v3676_v24, %v3065_v18  ;;  %v2714_v22 = vpop.f32.mrb[253].mxu0  ;;  %v3067_v11 = vpop.f32.mrb[253].mxu1 }
 0x4f6   : > { %v3608_v27 = vmax.f32 %v3607_v51, %v2714_v22  ;;  %v3746_v41 = vmax.f32 %v3745_v13, %v3067_v11  ;;  %v2716_v28 = vpop.f32.mrb[254].mxu0  ;;  %v3069_v5 = vpop.f32.mrb[254].mxu1 }
 0x4f7   : > { %v3540_v29 = vmax.f32 %v3539_v21, %v2716_v28  ;;  %v3678_v15 = vmax.f32 %v3677_v32, %v3069_v5  ;;  %v2718_v50 = vpop.f32.mrb[255].mxu0  ;;  %v3071_v53 = vpop.f32.mrb[255].mxu1 }
 0x4f8   : > { %v3609_v34 = vmax.f32 %v3608_v27, %v2718_v50  ;;  %v3747_v54 = vmax.f32 %v3746_v41, %v3071_v53 }
 0x4fc   : > { %v2722_v56 = vpop.f32.mrb[0].mxu0  ;;  %v3075_v30 = vpop.f32.mrb[0].mxu1 }
 0x4fd   : > { %v3541_v33 = vmax.f32 %v3540_v29, %v2722_v56  ;;  %v3679_v35 = vmax.f32 %v3678_v15, %v3075_v30  ;;  %v2724_v43 = vpop.f32.mrb[1].mxu0  ;;  %v3077_v36 = vpop.f32.mrb[1].mxu1 }
 0x4fe   : > { %v3610_v37 = vmax.f32 %v3609_v34, %v2724_v43  ;;  %v3748_v58 = vmax.f32 %v3747_v54, %v3077_v36  ;;  %v2726_v20 = vpop.f32.mrb[2].mxu0  ;;  %v3079_v47 = vpop.f32.mrb[2].mxu1 }
 0x4ff   : > { %v3542_v59 = vmax.f32 %v3541_v33, %v2726_v20  ;;  %v3680_v9 = vmax.f32 %v3679_v35, %v3079_v47  ;;  %v2728_v31 = vpop.f32.mrb[3].mxu0  ;;  %v3081_v60 = vpop.f32.mrb[3].mxu1 }
 0x500   : > { %v3611_v55 = vmax.f32 %v3610_v37, %v2728_v31  ;;  %v3749_v61 = vmax.f32 %v3748_v58, %v3081_v60 }
 0x504   : > { %v2732_v52 = vpop.f32.mrb[4].mxu0  ;;  %v3085_v49 = vpop.f32.mrb[4].mxu1 }
 0x505   : > { %v3543_v25 = vmax.f32 %v3542_v59, %v2732_v52  ;;  %v3681_v62 = vmax.f32 %v3680_v9, %v3085_v49  ;;  %v2734_v63 = vpop.f32.mrb[5].mxu0  ;;  %v3087_v4 = vpop.f32.mrb[5].mxu1 }
 0x506   : > { %v3612_v0 = vmax.f32 %v3611_v55, %v2734_v63  ;;  %v3750_v42 = vmax.f32 %v3749_v61, %v3087_v4  ;;  %v2736_v16 = vpop.f32.mrb[6].mxu0  ;;  %v3089_v1 = vpop.f32.mrb[6].mxu1 }
 0x507   : > { %v3544_v44 = vmax.f32 %v3543_v25, %v2736_v16  ;;  %v3682_v19 = vmax.f32 %v3681_v62, %v3089_v1  ;;  %v2738_v12 = vpop.f32.mrb[7].mxu0  ;;  %v3091_v40 = vpop.f32.mrb[7].mxu1 }
 0x508   : > { %v3613_v23 = vmax.f32 %v3612_v0, %v2738_v12  ;;  %v3751_v6 = vmax.f32 %v3750_v42, %v3091_v40 }
 0x50c   : > { %v2742_v7 = vpop.f32.mrb[8].mxu0  ;;  %v3095_v45 = vpop.f32.mrb[8].mxu1 }
 0x50d   : > { %v3545_v26 = vmax.f32 %v3544_v44, %v2742_v7  ;;  %v3683_v8 = vmax.f32 %v3682_v19, %v3095_v45  ;;  %v2744_v10 = vpop.f32.mrb[9].mxu0  ;;  %v3097_v24 = vpop.f32.mrb[9].mxu1 }
 0x50e   : > { %v3614_v3 = vmax.f32 %v3613_v23, %v2744_v10  ;;  %v3752_v38 = vmax.f32 %v3751_v6, %v3097_v24  ;;  %v2746_v51 = vpop.f32.mrb[10].mxu0  ;;  %v3099_v13 = vpop.f32.mrb[10].mxu1 }
 0x50f   : > { %v3546_v14 = vmax.f32 %v3545_v26, %v2746_v51  ;;  %v3684_v18 = vmax.f32 %v3683_v8, %v3099_v13  ;;  %v2748_v21 = vpop.f32.mrb[11].mxu0  ;;  %v3101_v32 = vpop.f32.mrb[11].mxu1 }
 0x510   : > { %v3615_v22 = vmax.f32 %v3614_v3, %v2748_v21  ;;  %v3753_v11 = vmax.f32 %v3752_v38, %v3101_v32 }
 0x514   : > { %v2752_v27 = vpop.f32.mrb[12].mxu0  ;;  %v3105_v41 = vpop.f32.mrb[12].mxu1 }
 0x515   : > { %v3547_v28 = vmax.f32 %v3546_v14, %v2752_v27  ;;  %v3685_v5 = vmax.f32 %v3684_v18, %v3105_v41  ;;  %v2754_v29 = vpop.f32.mrb[13].mxu0  ;;  %v3107_v15 = vpop.f32.mrb[13].mxu1 }
 0x516   : > { %v3616_v50 = vmax.f32 %v3615_v22, %v2754_v29  ;;  %v3754_v53 = vmax.f32 %v3753_v11, %v3107_v15  ;;  %v2756_v34 = vpop.f32.mrb[14].mxu0  ;;  %v3109_v54 = vpop.f32.mrb[14].mxu1 }
 0x517   : > { %v3548_v56 = vmax.f32 %v3547_v28, %v2756_v34  ;;  %v3686_v30 = vmax.f32 %v3685_v5, %v3109_v54  ;;  %v2758_v33 = vpop.f32.mrb[15].mxu0  ;;  %v3111_v35 = vpop.f32.mrb[15].mxu1 }
 0x518   : > { %v3617_v43 = vmax.f32 %v3616_v50, %v2758_v33  ;;  %v3755_v36 = vmax.f32 %v3754_v53, %v3111_v35 }
 0x51c   : > { %v2762_v37 = vpop.f32.mrb[16].mxu0  ;;  %v3115_v58 = vpop.f32.mrb[16].mxu1 }
 0x51d   : > { %v3549_v20 = vmax.f32 %v3548_v56, %v2762_v37  ;;  %v3687_v47 = vmax.f32 %v3686_v30, %v3115_v58  ;;  %v2764_v59 = vpop.f32.mrb[17].mxu0  ;;  %v3117_v9 = vpop.f32.mrb[17].mxu1 }
 0x51e   : > { %v3618_v31 = vmax.f32 %v3617_v43, %v2764_v59  ;;  %v3756_v60 = vmax.f32 %v3755_v36, %v3117_v9  ;;  %v2766_v55 = vpop.f32.mrb[18].mxu0  ;;  %v3119_v61 = vpop.f32.mrb[18].mxu1 }
 0x51f   : > { %v3550_v52 = vmax.f32 %v3549_v20, %v2766_v55  ;;  %v3688_v49 = vmax.f32 %v3687_v47, %v3119_v61  ;;  %v2768_v25 = vpop.f32.mrb[19].mxu0  ;;  %v3121_v62 = vpop.f32.mrb[19].mxu1 }
 0x520   : > { %v3619_v63 = vmax.f32 %v3618_v31, %v2768_v25  ;;  %v3757_v4 = vmax.f32 %v3756_v60, %v3121_v62 }
 0x524   : > { %v2772_v0 = vpop.f32.mrb[20].mxu0  ;;  %v3125_v42 = vpop.f32.mrb[20].mxu1 }
 0x525   : > { %v3551_v16 = vmax.f32 %v3550_v52, %v2772_v0  ;;  %v3689_v1 = vmax.f32 %v3688_v49, %v3125_v42  ;;  %v2774_v44 = vpop.f32.mrb[21].mxu0  ;;  %v3127_v19 = vpop.f32.mrb[21].mxu1 }
 0x526   : > { %v3620_v12 = vmax.f32 %v3619_v63, %v2774_v44  ;;  %v3758_v40 = vmax.f32 %v3757_v4, %v3127_v19  ;;  %v2776_v23 = vpop.f32.mrb[22].mxu0  ;;  %v3129_v6 = vpop.f32.mrb[22].mxu1 }
 0x527   : > { %v3552_v7 = vmax.f32 %v3551_v16, %v2776_v23  ;;  %v3690_v45 = vmax.f32 %v3689_v1, %v3129_v6  ;;  %v2778_v26 = vpop.f32.mrb[23].mxu0  ;;  %v3131_v8 = vpop.f32.mrb[23].mxu1 }
 0x528   : > { %v3621_v10 = vmax.f32 %v3620_v12, %v2778_v26  ;;  %v3759_v24 = vmax.f32 %v3758_v40, %v3131_v8 }
 0x52c   : > { %v2782_v3 = vpop.f32.mrb[24].mxu0  ;;  %v3135_v38 = vpop.f32.mrb[24].mxu1 }
 0x52d   : > { %v3553_v51 = vmax.f32 %v3552_v7, %v2782_v3  ;;  %v3691_v13 = vmax.f32 %v3690_v45, %v3135_v38  ;;  %v2784_v14 = vpop.f32.mrb[25].mxu0  ;;  %v3137_v18 = vpop.f32.mrb[25].mxu1 }
 0x52e   : > { %v3622_v21 = vmax.f32 %v3621_v10, %v2784_v14  ;;  %v3760_v32 = vmax.f32 %v3759_v24, %v3137_v18  ;;  %v2786_v22 = vpop.f32.mrb[26].mxu0  ;;  %v3139_v11 = vpop.f32.mrb[26].mxu1 }
 0x52f   : > { %v3554_v27 = vmax.f32 %v3553_v51, %v2786_v22  ;;  %v3692_v41 = vmax.f32 %v3691_v13, %v3139_v11  ;;  %v2788_v28 = vpop.f32.mrb[27].mxu0  ;;  %v3141_v5 = vpop.f32.mrb[27].mxu1 }
 0x530   : > { %v3623_v29 = vmax.f32 %v3622_v21, %v2788_v28  ;;  %v3761_v15 = vmax.f32 %v3760_v32, %v3141_v5 }
 0x534   : > { %v2792_v50 = vpop.f32.mrb[28].mxu0  ;;  %v3145_v53 = vpop.f32.mrb[28].mxu1 }
 0x535   : > { %v3555_v34 = vmax.f32 %v3554_v27, %v2792_v50  ;;  %v3693_v54 = vmax.f32 %v3692_v41, %v3145_v53  ;;  %v2794_v56 = vpop.f32.mrb[29].mxu0  ;;  %v3147_v30 = vpop.f32.mrb[29].mxu1 }
 0x536   : > { %v3624_v33 = vmax.f32 %v3623_v29, %v2794_v56  ;;  %v3762_v35 = vmax.f32 %v3761_v15, %v3147_v30  ;;  %v2796_v43 = vpop.f32.mrb[30].mxu0  ;;  %v3149_v36 = vpop.f32.mrb[30].mxu1 }
 0x537   : > { %v3556_v37 = vmax.f32 %v3555_v34, %v2796_v43  ;;  %v3694_v58 = vmax.f32 %v3693_v54, %v3149_v36  ;;  %v2798_v20 = vpop.f32.mrb[31].mxu0  ;;  %v3151_v47 = vpop.f32.mrb[31].mxu1 }
 0x538   : > { %v3625_v59 = vmax.f32 %v3624_v33, %v2798_v20  ;;  %v3763_v9 = vmax.f32 %v3762_v35, %v3151_v47 }
 0x53c   : > { %v2802_v31 = vpop.f32.mrb[32].mxu0  ;;  %v3155_v60 = vpop.f32.mrb[32].mxu1 }
 0x53d   : > { %v3557_v55 = vmax.f32 %v3556_v37, %v2802_v31  ;;  %v3695_v61 = vmax.f32 %v3694_v58, %v3155_v60  ;;  %v2804_v52 = vpop.f32.mrb[33].mxu0  ;;  %v3157_v49 = vpop.f32.mrb[33].mxu1 }
 0x53e   : > { %v3626_v25 = vmax.f32 %v3625_v59, %v2804_v52  ;;  %v3764_v62 = vmax.f32 %v3763_v9, %v3157_v49  ;;  %v2806_v63 = vpop.f32.mrb[34].mxu0  ;;  %v3159_v4 = vpop.f32.mrb[34].mxu1 }
 0x53f   : > { %v3558_v0 = vmax.f32 %v3557_v55, %v2806_v63  ;;  %v3696_v42 = vmax.f32 %v3695_v61, %v3159_v4  ;;  %v2808_v16 = vpop.f32.mrb[35].mxu0  ;;  %v3161_v1 = vpop.f32.mrb[35].mxu1 }
 0x540   : > { %v3627_v44 = vmax.f32 %v3626_v25, %v2808_v16  ;;  %v3765_v19 = vmax.f32 %v3764_v62, %v3161_v1 }
 0x544   : > { %v2812_v12 = vpop.f32.mrb[36].mxu0  ;;  %v3165_v40 = vpop.f32.mrb[36].mxu1 }
 0x545   : > { %v3559_v23 = vmax.f32 %v3558_v0, %v2812_v12  ;;  %v3697_v6 = vmax.f32 %v3696_v42, %v3165_v40  ;;  %v2814_v7 = vpop.f32.mrb[37].mxu0  ;;  %v3167_v45 = vpop.f32.mrb[37].mxu1 }
 0x546   : > { %v3628_v26 = vmax.f32 %v3627_v44, %v2814_v7  ;;  %v3766_v8 = vmax.f32 %v3765_v19, %v3167_v45  ;;  %v2816_v10 = vpop.f32.mrb[38].mxu0  ;;  %v3169_v24 = vpop.f32.mrb[38].mxu1 }
 0x547   : > { %v3560_v3 = vmax.f32 %v3559_v23, %v2816_v10  ;;  %v3698_v38 = vmax.f32 %v3697_v6, %v3169_v24  ;;  %v2818_v51 = vpop.f32.mrb[39].mxu0  ;;  %v3171_v13 = vpop.f32.mrb[39].mxu1 }
 0x548   : > { %v3629_v14 = vmax.f32 %v3628_v26, %v2818_v51  ;;  %v3767_v18 = vmax.f32 %v3766_v8, %v3171_v13 }
 0x54c   : > { %v2822_v21 = vpop.f32.mrb[40].mxu0  ;;  %v3175_v32 = vpop.f32.mrb[40].mxu1 }
 0x54d   : > { %v3561_v22 = vmax.f32 %v3560_v3, %v2822_v21  ;;  %v3699_v11 = vmax.f32 %v3698_v38, %v3175_v32  ;;  %v2824_v27 = vpop.f32.mrb[41].mxu0  ;;  %v3177_v41 = vpop.f32.mrb[41].mxu1 }
 0x54e   : > { %v3630_v28 = vmax.f32 %v3629_v14, %v2824_v27  ;;  %v3768_v5 = vmax.f32 %v3767_v18, %v3177_v41  ;;  %v2826_v29 = vpop.f32.mrb[42].mxu0  ;;  %v3179_v15 = vpop.f32.mrb[42].mxu1 }
 0x54f   : > { %v3562_v50 = vmax.f32 %v3561_v22, %v2826_v29  ;;  %v3700_v53 = vmax.f32 %v3699_v11, %v3179_v15  ;;  %v2828_v34 = vpop.f32.mrb[43].mxu0  ;;  %v3181_v54 = vpop.f32.mrb[43].mxu1 }
 0x550   : > { %v3631_v56 = vmax.f32 %v3630_v28, %v2828_v34  ;;  %v3769_v30 = vmax.f32 %v3768_v5, %v3181_v54 }
 0x554   : > { %v2832_v33 = vpop.f32.mrb[44].mxu0  ;;  %v3185_v35 = vpop.f32.mrb[44].mxu1 }
 0x555   : > { %v3563_v43 = vmax.f32 %v3562_v50, %v2832_v33  ;;  %v3701_v36 = vmax.f32 %v3700_v53, %v3185_v35  ;;  %v2834_v37 = vpop.f32.mrb[45].mxu0  ;;  %v3187_v58 = vpop.f32.mrb[45].mxu1 }
 0x556   : > { %v3632_v20 = vmax.f32 %v3631_v56, %v2834_v37  ;;  %v3770_v47 = vmax.f32 %v3769_v30, %v3187_v58  ;;  %v2836_v59 = vpop.f32.mrb[46].mxu0  ;;  %v3189_v9 = vpop.f32.mrb[46].mxu1 }
 0x557   : > { %v3564_v31 = vmax.f32 %v3563_v43, %v2836_v59  ;;  %v3702_v60 = vmax.f32 %v3701_v36, %v3189_v9  ;;  %v2838_v55 = vpop.f32.mrb[47].mxu0  ;;  %v3191_v61 = vpop.f32.mrb[47].mxu1 }
 0x558   : > { %v3633_v52 = vmax.f32 %v3632_v20, %v2838_v55  ;;  %v3771_v49 = vmax.f32 %v3770_v47, %v3191_v61 }
 0x55c   : > { %v2842_v25 = vpop.f32.mrb[48].mxu0  ;;  %v3195_v62 = vpop.f32.mrb[48].mxu1 }
 0x55d   : > { %v3565_v63 = vmax.f32 %v3564_v31, %v2842_v25  ;;  %v3703_v4 = vmax.f32 %v3702_v60, %v3195_v62  ;;  %v2844_v0 = vpop.f32.mrb[49].mxu0  ;;  %v3197_v42 = vpop.f32.mrb[49].mxu1 }
 0x55e   : > { %v3634_v16 = vmax.f32 %v3633_v52, %v2844_v0  ;;  %v3772_v1 = vmax.f32 %v3771_v49, %v3197_v42  ;;  %v2846_v44 = vpop.f32.mrb[50].mxu0  ;;  %v3199_v19 = vpop.f32.mrb[50].mxu1 }
 0x55f   : > { %v3566_v12 = vmax.f32 %v3565_v63, %v2846_v44  ;;  %v3704_v40 = vmax.f32 %v3703_v4, %v3199_v19  ;;  %v2848_v23 = vpop.f32.mrb[51].mxu0  ;;  %v3201_v6 = vpop.f32.mrb[51].mxu1 }
 0x560   : > { %v3635_v7 = vmax.f32 %v3634_v16, %v2848_v23  ;;  %v3773_v45 = vmax.f32 %v3772_v1, %v3201_v6 }
 0x564   : > { %v2852_v26 = vpop.f32.mrb[52].mxu0  ;;  %v3205_v8 = vpop.f32.mrb[52].mxu1 }
 0x565   : > { %v3567_v10 = vmax.f32 %v3566_v12, %v2852_v26  ;;  %v3705_v24 = vmax.f32 %v3704_v40, %v3205_v8  ;;  %v2854_v3 = vpop.f32.mrb[53].mxu0  ;;  %v3207_v38 = vpop.f32.mrb[53].mxu1 }
 0x566   : > { %v3636_v51 = vmax.f32 %v3635_v7, %v2854_v3  ;;  %v3774_v13 = vmax.f32 %v3773_v45, %v3207_v38  ;;  %v2856_v14 = vpop.f32.mrb[54].mxu0  ;;  %v3209_v18 = vpop.f32.mrb[54].mxu1 }
 0x567   : > { %v3568_v21 = vmax.f32 %v3567_v10, %v2856_v14  ;;  %v3706_v32 = vmax.f32 %v3705_v24, %v3209_v18  ;;  %v2858_v22 = vpop.f32.mrb[55].mxu0  ;;  %v3211_v11 = vpop.f32.mrb[55].mxu1 }
 0x568   : > { %v3637_v27 = vmax.f32 %v3636_v51, %v2858_v22  ;;  %v3775_v41 = vmax.f32 %v3774_v13, %v3211_v11 }
 0x56c   : > { %v2862_v28 = vpop.f32.mrb[56].mxu0  ;;  %v3215_v5 = vpop.f32.mrb[56].mxu1 }
 0x56d   : > { %v3569_v29 = vmax.f32 %v3568_v21, %v2862_v28  ;;  %v3707_v15 = vmax.f32 %v3706_v32, %v3215_v5  ;;  %v2864_v50 = vpop.f32.mrb[57].mxu0  ;;  %v3217_v53 = vpop.f32.mrb[57].mxu1 }
 0x56e   : > { %v3638_v34 = vmax.f32 %v3637_v27, %v2864_v50  ;;  %v3776_v54 = vmax.f32 %v3775_v41, %v3217_v53  ;;  %v2866_v56 = vpop.f32.mrb[58].mxu0  ;;  %v3219_v30 = vpop.f32.mrb[58].mxu1 }
 0x56f   : > { %v3570_v33 = vmax.f32 %v3569_v29, %v2866_v56  ;;  %v3708_v35 = vmax.f32 %v3707_v15, %v3219_v30  ;;  %v2868_v43 = vpop.f32.mrb[59].mxu0  ;;  %v3221_v36 = vpop.f32.mrb[59].mxu1  ;;  %v5109_v56 = vsub.s32 1, %v6946_v39  ;;  %v5113_v30 = vsub.s32 2, %v6946_v39 }
 0x570   : > { %v3639_v37 = vmax.f32 %v3638_v34, %v2868_v43  ;;  %v3777_v58 = vmax.f32 %v3776_v54, %v3221_v36  ;;  %v5090_v34 = vrot.slane %v5082_v57, %v6973_v17  ;;  %v5105_v54 = vsub.s32 0, %v6946_v39 }
 0x571   : > { %v5121_v43 = vsub.s32 4, %v6946_v39  ;;  %v5133_v57 = vsub.s32 7, %v6946_v39 }
 0x574   : > { %v2872_v20 = vpop.f32.mrb[60].mxu0  ;;  %v3225_v47 = vpop.f32.mrb[60].mxu1 }
 0x575   : > { %v4478_v59 = vsel %vm3976_vm2, %v2872_v20, -inf  ;;  %v4480_v9 = vsel %vm3976_vm2, %v3225_v47, -inf  ;;  %v2874_v31 = vpop.f32.mrb[61].mxu0  ;;  %v3227_v60 = vpop.f32.mrb[61].mxu1 }
 0x576   : > { %v4827_v55 = vmax.f32 %v3570_v33, %v4478_v59  ;;  %v4965_v61 = vmax.f32 %v3708_v35, %v4480_v9  ;;  %v4479_v52 = vsel %vm3976_vm2, %v2874_v31, -inf  ;;  %v4481_v49 = vsel %vm3976_vm2, %v3227_v60, -inf  ;;  %v2876_v25 = vpop.f32.mrb[62].mxu0  ;;  %v3229_v62 = vpop.f32.mrb[62].mxu1 }
 0x577   : > { %v4896_v63 = vmax.f32 %v3639_v37, %v4479_v52  ;;  %v5034_v4 = vmax.f32 %v3777_v58, %v4481_v49  ;;  %v2878_v0 = vpop.f32.mrb[63].mxu0  ;;  %v3231_v42 = vpop.f32.mrb[63].mxu1  ;;  %vm5225_vm2 = vsmask.f32 4352  ;;  %v5117_v35 = vsub.s32 3, %v6946_v39 }
 0x578   : > { %v4829_v16 = vrot.slane %v4827_v55, 4  ;;  %v4967_v1 = vrot.slane %v4965_v61, 4  ;;  %vm5226_vm4 = vmand %vm5224_vm1, %vm5225_vm2 }
 0x579   : > { %v4898_v44 = vrot.slane %v4896_v63, 4  ;;  %v5036_v19 = vrot.slane %v5034_v4, 4  ;;  %vm7050_vm7 = vmor %vm5226_vm4, %vm5223_vm3 }
 0x57a   : > { %v4830_v12 = vmax.f32 %v4827_v55, %v4829_v16  ;;  %v4968_v40 = vmax.f32 %v4965_v61, %v4967_v1  ;;  %vm5231_vm11 = vmor %vm7054_vm8, %vm7050_vm7 }
 0x57b   : > { %v4899_v23 = vmax.f32 %v4896_v63, %v4898_v44  ;;  %v5037_v6 = vmax.f32 %v5034_v4, %v5036_v19  ;;  %vm5235_vm15 = vmor %vm5234_vm12, %vm5231_vm11  ;;  %v5240_v19 = vld [vmem:[%s330_s15] sm:$0xff] }
 0x57c   : > { %v4831_v46 = vrot.slane %v4830_v12, 2  ;;  %v4969_v7 = vrot.slane %v4968_v40, 2  ;;  %vm5239_vm1 = vmor %vm5238_vm0, %vm5235_vm15 }
 0x57d   : > { %v4900_v45 = vrot.slane %v4899_v23, 2  ;;  %v5038_v26 = vrot.slane %v5037_v6, 2 }
 0x57e   : > { %v4832_v10 = vmax.f32 %v4830_v12, %v4831_v46  ;;  %v4970_v24 = vmax.f32 %v4968_v40, %v4969_v7 }
 0x57f   : > { %v4901_v38 = vmax.f32 %v4899_v23, %v4900_v45  ;;  %v5039_v51 = vmax.f32 %v5037_v6, %v5038_v26 }
 0x580   : > { %v4833_v13 = vrot.slane %v4832_v10, 1  ;;  %v4971_v14 = vrot.slane %v4970_v24, 1 }
 0x581   : > { %v4902_v18 = vrot.slane %v4901_v38, 1  ;;  %v5040_v21 = vrot.slane %v5039_v51, 1 }
 0x582   : > { %v4834_v32 = vmax.f32 %v4832_v10, %v4833_v13  ;;  %v4972_v22 = vmax.f32 %v4970_v24, %v4971_v14 }
 0x583   : > { %v4903_v11 = vmax.f32 %v4901_v38, %v4902_v18  ;;  %v5041_v27 = vmax.f32 %v5039_v51, %v5040_v21 }
 0x585   : > { %v5052_v41 = vcombine.low %v4834_v32, %v4903_v11  ;;  %v5053_v28 = vcombine.low %v4972_v22, %v5041_v27 }
 0x587   : > { %v5074_v15 = vrot.slane %v5052_v41, %v6973_v17  ;;  %v5081_v50 = vrot.slane %v5053_v28, %v6973_v17 }
 0x589   : > { %v5083_v53 = vcombine.low %v5074_v15, %v5081_v50 }
 0x58b   : > { %v5097_v33 = vrot.slane %v5083_v53, %v6973_v17 }
 0x58d   : > { %v5098_v36 = vcombine.low %v5090_v34, %v5097_v33 }
 0x58f   : > { %v5106_v20 = vrot.slane %v5098_v36, %v5105_v54  ;;  %v5110_v39 = vrot.slane %v5098_v36, %v5109_v56  ;;  %v5114_v47 = vrot.slane %v5098_v36, %v5113_v30  ;;  %v5118_v59 = vrot.slane %v5098_v36, %v5117_v35 }
 0x590   : > { %v5122_v9 = vrot.slane %v5098_v36, %v5121_v43  ;;  %v5126_v31 = vrot.slane %v5098_v36, %v5125_v48  ;;  %v5130_v60 = vrot.slane %v5098_v36, %v5129_v2  ;;  %v5134_v55 = vrot.slane %v5098_v36, %v5133_v57 }
 0x591   : > { %v5671_v61 = vpack.c.bf16 %v5110_v39, %v5106_v20  ;;  %v5672_v52 = vpack.c.bf16 %v5118_v59, %v5114_v47 }
 0x592   : > { %v5673_v49 = vpack.c.bf16 %v5126_v31, %v5122_v9  ;;  %v5674_v25 = vpack.c.bf16 %v5134_v55, %v5130_v60 }
 0x593   : > { %v5169_v62 = vrot.slane %v5671_v61, %v6973_v17  ;;  %v5176_v63 = vrot.slane %v5672_v52, %v6973_v17 }
 0x594   : > { %v5183_v4 = vrot.slane %v5673_v49, %v6973_v17  ;;  %v5190_v0 = vrot.slane %v5674_v25, %v6973_v17 }
 0x595   : > { %v5191_v42 = vcombine.low %v5169_v62, %v5176_v63 }
 0x596   : > { %v5192_v16 = vcombine.low %v5183_v4, %v5190_v0 }
 0x597   : > { %v5199_v1 = vrot.slane %v5191_v42, %v6973_v17 }
 0x598   : > { %v5206_v44 = vrot.slane %v5192_v16, %v6973_v17 }
 0x59a   : > { %v5207_v12 = vcombine.low %v5199_v1, %v5206_v44 }
 0x59c   : > { %v5241_v40 = vsel %vm5239_vm1, %v5207_v12, %v5240_v19 }
 0x59d   : > { %5242 = vst [vmem:[%s330_s15] sm:$0xff] %v5241_v40 }
 0x59e PF: > { %s21_s26 = sadd.s32 1, %s6166_s26   ;;  %s7126_s21 = smov %s6150_s22 }
 0x59f   : > { %p18_p4 = scmp.ge.s32.totalorder %s21_s26, 6   ;;  %s7127_s22 = smov %s6154_s23 }
 0x5a0   : > { %s7128_s23 = smov %s6359_s13  ;;  %s7129_s24 = smov %s6162_s25 }
 0x5a1   : > { %s7130_s25 = smov %s7132_s14  ;;  %20 = sbr.rel (!%p18_p4) target bundleno = 6 (0x6), region = 104 }
 0x5a8   :  { %5430 = vsyncpa [#allocation4], 1 }
 0x5a9   :  { %5432 = vsyncpa [#allocation4 + $0x1], 1 }
 0x5aa   :  { %5433 = vsyncpa [#allocation6], 1 }
 0x5ab   :  { %5434 = vsyncpa [#allocation9], 1 }

</bundles_post_ra>
